<compile_context>
chip_gen: v7x
topology: tpu7x:2x2x1
jax: 0.10.0
libtpu: 0.0.40
codegen_flags: <defaults>
</compile_context>

<pallas_src>
import functools
import math

import jax
import jax.numpy as jnp
from jax.experimental import pallas as pl
from jax.experimental.pallas import tpu as pltpu

BN_EPS = 1e-5
VMEM_LIMIT = 32 * 1024 * 1024  # safe scoped-VMEM bound on v5e/v6e/v7x


def _round_up(x, m):
    return (x + m - 1) // m * m


def _min_parallel_steps():
    # v7x has 2 TensorCores per chip -> keep >=2 parallel grid steps so both
    # get work; v5e/v6e have a single TC, so take the largest tile instead.
    try:
        kind = jax.devices()[0].device_kind.lower()
    except Exception:
        return 1
    return 2 if "v7" in kind else 1


def _pick_tile_m(M):
    min_steps = _min_parallel_steps()
    for tm in (512, 256, 128, 64, 32, 16, 8):
        if M % tm == 0 and M // tm >= min_steps:
            return tm
    return min(512, _round_up(M, 8))


# --------------------------------------------------------------------------
# Kernel 1: fused BN1 + ReLU1 + 1x1 conv (+ folded BN2 scale) + bias + ReLU2
# --------------------------------------------------------------------------

def _bottleneck_kernel(x_ref, s1_ref, b1_ref, w_ref, b2_ref, o_ref):
    # BN affine + ReLU in f32 on the VPU (v5e has no bf16 VALU); cast to bf16
    # only for the MXU matmul.
    x = x_ref[...].astype(jnp.float32)
    x = jnp.maximum(x * s1_ref[...] + b1_ref[...], 0.0)
    acc = jnp.dot(x.astype(jnp.bfloat16), w_ref[...],
                  preferred_element_type=jnp.float32)
    # BN2 scale already folded into w; epilogue is bias + ReLU only.
    o_ref[...] = jnp.maximum(acc + b2_ref[...], 0.0).astype(o_ref.dtype)


def bottleneck_fused(x, s1, b1, w1s, b2, out_dtype=jnp.bfloat16):
    """x:(M,Cin) bf16, s1/b1:(Cin,) f32, w1s:(Cin,Cmid) (BN2-scaled), b2:(Cmid,)."""
    M, Cin = x.shape
    Cmid = w1s.shape[1]
    tm = _pick_tile_m(M)
    m_pad = _round_up(M, tm)
    if m_pad != M:  # avoided when M tiles evenly (no pad round trip)
        x = jnp.pad(x, ((0, m_pad - M), (0, 0)))

    out = pl.pallas_call(
        _bottleneck_kernel,
        out_shape=jax.ShapeDtypeStruct((m_pad, Cmid), out_dtype),
        grid=(m_pad // tm,),
        in_specs=[
            pl.BlockSpec((tm, Cin), lambda i: (i, 0)),
            pl.BlockSpec((1, Cin), lambda i: (0, 0)),
            pl.BlockSpec((1, Cin), lambda i: (0, 0)),
            # constant index map -> W1 loaded once and stays VMEM-resident
            pl.BlockSpec((Cin, Cmid), lambda i: (0, 0)),
            pl.BlockSpec((1, Cmid), lambda i: (0, 0)),
        ],
        out_specs=pl.BlockSpec((tm, Cmid), lambda i: (i, 0)),
        compiler_params=pltpu.CompilerParams(
            dimension_semantics=("parallel",),
            vmem_limit_bytes=VMEM_LIMIT),
    )(x,
      s1.reshape(1, Cin).astype(jnp.float32),
      b1.reshape(1, Cin).astype(jnp.float32),
      w1s.astype(jnp.bfloat16),
      b2.reshape(1, Cmid).astype(jnp.float32))
    return out[:M] if m_pad != M else out


# --------------------------------------------------------------------------
# Kernel 2: 3x3 conv (stride 1, pad 1) on the *flattened* padded image.
#
# Per grid step (one batch image): the whole zero-padded image, flattened to
# (Hp*Wp + 2 guard rows, Cmid), is resident in VMEM.  Each of the 9 taps is a
# static row-shifted slice (offset ky*Wp + kx) feeding a single MXU matmul of
# M = H*Wp rows against the (Cmid, Cout) weight slice of the resident
# (3,3,Cmid,Cout) kernel, accumulated in an f32 VMEM scratch.  Only the flat
# rows with a valid column index are kept by the wrapper.
# --------------------------------------------------------------------------

def _conv3x3_flat_kernel(fp_ref, w_ref, o_ref, acc_ref, *, wp):
    m = o_ref.shape[1]
    first = True
    for ky in range(3):                      # static unroll over the 9 taps
        for kx in range(3):
            s = ky * wp + kx                 # pure row shift in the flat layout
            contrib = jnp.dot(fp_ref[0, s:s + m, :], w_ref[ky, kx],
                              preferred_element_type=jnp.float32)
            if first:
                acc_ref[...] = contrib
                first = False
            else:
                acc_ref[...] += contrib
    o_ref[0] = acc_ref[...].astype(o_ref.dtype)


def conv3x3_flat(fp, w2, wp, m_out):
    """fp:(N, Hp*Wp+2, Cmid) bf16 flat padded (+1 guard row each end),
    w2:(3,3,Cmid,Cout) -> (N, m_out, Cout) bf16, m_out = H*Wp."""
    N, Pg, Cmid = fp.shape
    Cout = w2.shape[-1]
    # NOTE: the whole padded image is resident per step; for very large
    # feature maps this block should be row-blocked (fits easily for DenseNet
    # sizes up to ~112x112xCmid under the 32 MiB scoped-VMEM budget).
    kernel = functools.partial(_conv3x3_flat_kernel, wp=wp)
    return pl.pallas_call(
        kernel,
        out_shape=jax.ShapeDtypeStruct((N, m_out, Cout), jnp.bfloat16),
        grid=(N,),
        in_specs=[
            pl.BlockSpec((1, Pg, Cmid), lambda n: (n, 0, 0)),
            # constant index map -> 3x3 weight loaded once, stays resident
            pl.BlockSpec((3, 3, Cmid, Cout), lambda n: (0, 0, 0, 0)),
        ],
        out_specs=pl.BlockSpec((1, m_out, Cout), lambda n: (n, 0, 0)),
        scratch_shapes=[pltpu.VMEM((m_out, Cout), jnp.float32)],
        compiler_params=pltpu.CompilerParams(
            dimension_semantics=("parallel",),
            vmem_limit_bytes=VMEM_LIMIT),
    )(fp.astype(jnp.bfloat16), w2.astype(jnp.bfloat16))


# --------------------------------------------------------------------------
# Parameters (eval-mode BatchNorm folded to scale/shift)
# --------------------------------------------------------------------------

def _bn_init(c):
    return {"gamma": jnp.ones((c,), jnp.float32),
            "beta": jnp.zeros((c,), jnp.float32),
            "mean": jnp.zeros((c,), jnp.float32),
            "var": jnp.ones((c,), jnp.float32)}


def _bn_scale_shift(bn):
    scale = bn["gamma"] * jax.lax.rsqrt(bn["var"] + BN_EPS)
    shift = bn["beta"] - bn["mean"] * scale
    return scale, shift


def init_dense_layer_params(key, num_input_features, growth_rate, bn_size):
    cmid = bn_size * growth_rate
    k1, k2 = jax.random.split(key)

    def kaiming(k, shape_hwio):
        kh, kw, cin, _ = shape_hwio
        std = math.sqrt(2.0 / (kh * kw * cin))
        return std * jax.random.normal(k, shape_hwio, jnp.float32)

    return {
        "norm1": _bn_init(num_input_features),
        "conv1": kaiming(k1, (1, 1, num_input_features, cmid)
                         ).reshape(num_input_features, cmid),   # (Cin, Cmid)
        "norm2": _bn_init(cmid),
        "conv2": kaiming(k2, (3, 3, cmid, growth_rate)),         # HWIO
    }


# --------------------------------------------------------------------------
# Forward pass (matches _DenseLayer.forward, eval semantics)
# --------------------------------------------------------------------------

def dense_layer_forward(params, inputs):
    if not isinstance(inputs, (list, tuple)):
        inputs = [inputs]
    # torch.cat(prev_features, 1) + NCHW->NHWC + bf16 cast, one fused XLA op.
    feats = jnp.concatenate(
        [jnp.transpose(t, (0, 2, 3, 1)).astype(jnp.bfloat16) for t in inputs],
        axis=-1)
    N, H, W, Cin = feats.shape

    s1, b1 = _bn_scale_shift(params["norm1"])
    s2, b2 = _bn_scale_shift(params["norm2"])
    w1s = params["conv1"] * s2[None, :]          # fold BN2 scale into W1 (f32)

    # bottleneck = relu2(norm2(conv1(relu1(norm1(cat)))))  -- one fused kernel
    y = bottleneck_fused(feats.reshape(N * H * W, Cin), s1, b1, w1s, b2)
    Cmid = y.shape[-1]

    # Spatial zero-pad (matches conv2's implicit padding), flatten the padded
    # image and add one zero guard row at each end so every tap slice of the
    # flat layout stays in range.  XLA fuses these pads into a single copy of
    # the small bf16 bottleneck tensor.
    Hp, Wp = H + 2, W + 2
    yp = jnp.pad(y.reshape(N, H, W, Cmid), ((0, 0), (1, 1), (1, 1), (0, 0)))
    fp = jnp.pad(yp.reshape(N, Hp * Wp, Cmid), ((0, 0), (1, 1), (0, 0)))

    o = conv3x3_flat(fp, params["conv2"], wp=Wp, m_out=H * Wp)  # (N, H*Wp, Cout)
    Cout = o.shape[-1]

    # Keep only the valid columns (flat rows with padded column index 1..W).
    new = o.reshape(N, H, Wp, Cout)[:, :, 1:W + 1, :]           # (N, H, W, Cout)

    # dropout: identity in eval mode (drop_rate only applies in training)
    return jnp.transpose(new, (0, 3, 1, 2)).astype(jnp.float32)  # NHWC -> NCHW


# --------------------------------------------------------------------------
# Pure-JAX reference: mirrors the kernel's bf16 roundings but performs every
# dot / conv in f32 so it runs on any backend (CPU DotThunk rejects bf16 dots).
# --------------------------------------------------------------------------

def _rt_bf16(x):
    return x.astype(jnp.bfloat16).astype(jnp.float32)


def _reference_forward(params, inputs):
    feats = jnp.concatenate(list(inputs), axis=1)          # NCHW f32
    x = _rt_bf16(feats)
    s1, b1 = _bn_scale_shift(params["norm1"])
    s2, b2 = _bn_scale_shift(params["norm2"])
    x = jnp.maximum(x * s1[None, :, None, None] + b1[None, :, None, None], 0.0)
    x = _rt_bf16(x)
    w1s = _rt_bf16(params["conv1"] * s2[None, :])
    bott = jnp.einsum("nchw,cd->ndhw", x, w1s)             # f32 matmul
    y = jnp.maximum(bott + b2[None, :, None, None], 0.0)
    y = _rt_bf16(y)
    w2 = _rt_bf16(params["conv2"])
    out = jax.lax.conv_general_dilated(
        y, w2, window_strides=(1, 1), padding=((1, 1), (1, 1)),
        dimension_numbers=("NCHW", "HWIO", "NCHW"))        # f32 conv
    return out


# --------------------------------------------------------------------------

if __name__ == "__main__":
    num_input_features = 32
    growth_rate = 8
    bn_size = 4
    # drop_rate = 0.0 (eval-mode dropout is the identity regardless)

    key = jax.random.PRNGKey(0)
    kp, ka, kb = jax.random.split(key, 3)
    params = init_dense_layer_params(kp, num_input_features, growth_rate, bn_size)

    # prev_features passed as a list (exercises the torch.cat path), NCHW.
    x0 = jax.random.normal(ka, (2, 24, 16, 16), jnp.float32)
    x1 = jax.random.normal(kb, (2, 8, 16, 16), jnp.float32)

    fwd = jax.jit(lambda p, a, b: dense_layer_forward(p, [a, b]))
    out = jax.block_until_ready(fwd(params, x0, x1))

    assert out.shape == (2, growth_rate, 16, 16), out.shape
    assert bool(jnp.all(jnp.isfinite(out)))

    ref = jax.block_until_ready(_reference_forward(params, [x0, x1]))
    max_err = float(jnp.max(jnp.abs(out - ref)))
    assert max_err < 0.1, f"mismatch vs reference: max_err={max_err}"

    print("KERNEL_OK")
</pallas_src>

<mosaic_0001>
module attributes {stable_mosaic.version = 11 : i64} {
  func.func @_bottleneck_kernel(%arg0: i32, %arg1: memref<512x32xbf16, #tpu.memory_space<vmem>>, %arg2: memref<1x32xf32, #tpu.memory_space<vmem>>, %arg3: memref<1x32xf32, #tpu.memory_space<vmem>>, %arg4: memref<32x32xbf16, #tpu.memory_space<vmem>>, %arg5: memref<1x32xf32, #tpu.memory_space<vmem>>, %arg6: memref<512x32xbf16, #tpu.memory_space<vmem>>) attributes {dimension_semantics = [#tpu.dimension_semantics<parallel>], iteration_bounds = array<i64: 1>, scalar_prefetch = 0 : i64, scratch_operands = 0 : i64, tpu.core_type = #tpu.core_type<tc>, window_params = [{transform_indices = @transform_0, window_bounds = array<i64: 512, 32>}, {pipeline_mode = #tpu.pipeline_mode<synchronous>, transform_indices = @transform_1, window_bounds = array<i64: 1, 32>}, {pipeline_mode = #tpu.pipeline_mode<synchronous>, transform_indices = @transform_2, window_bounds = array<i64: 1, 32>}, {pipeline_mode = #tpu.pipeline_mode<synchronous>, transform_indices = @transform_3, window_bounds = array<i64: 32, 32>}, {pipeline_mode = #tpu.pipeline_mode<synchronous>, transform_indices = @transform_4, window_bounds = array<i64: 1, 32>}, {transform_indices = @transform_5, window_bounds = array<i64: 512, 32>}]} {
    %c0 = arith.constant 0 : index
    %c0_0 = arith.constant 0 : index
    %0 = vector.load %arg1[%c0, %c0_0] : memref<512x32xbf16, #tpu.memory_space<vmem>>, vector<512x32xbf16>
    %1 = arith.extf %0 : vector<512x32xbf16> to vector<512x32xf32>
    %c0_1 = arith.constant 0 : index
    %c0_2 = arith.constant 0 : index
    %2 = vector.load %arg2[%c0_1, %c0_2] : memref<1x32xf32, #tpu.memory_space<vmem>>, vector<1x32xf32>
    %3 = vector.broadcast %2 : vector<1x32xf32> to vector<512x32xf32>
    %4 = arith.mulf %1, %3 : vector<512x32xf32>
    %c0_3 = arith.constant 0 : index
    %c0_4 = arith.constant 0 : index
    %5 = vector.load %arg3[%c0_3, %c0_4] : memref<1x32xf32, #tpu.memory_space<vmem>>, vector<1x32xf32>
    %6 = vector.broadcast %5 : vector<1x32xf32> to vector<512x32xf32>
    %7 = arith.addf %4, %6 : vector<512x32xf32>
    %cst = arith.constant 0.000000e+00 : f32
    %8 = vector.broadcast %cst : f32 to vector<512x32xf32>
    %9 = arith.maximumf %7, %8 : vector<512x32xf32>
    %10 = arith.truncf %9 : vector<512x32xf32> to vector<512x32xbf16>
    %c0_5 = arith.constant 0 : index
    %c0_6 = arith.constant 0 : index
    %11 = vector.load %arg4[%c0_5, %c0_6] : memref<32x32xbf16, #tpu.memory_space<vmem>>, vector<32x32xbf16>
    %cst_7 = arith.constant dense<0.000000e+00> : vector<512x32xf32>
    %12 = tpu.matmul %10, %11, %cst_7 {dimension_numbers = #tpu.dot_dimension_numbers<[1], [0], [0], [1], [0, 0, 1, 1], [], []>} : vector<512x32xbf16>, vector<32x32xbf16>, vector<512x32xf32> -> vector<512x32xf32>
    %c0_8 = arith.constant 0 : index
    %c0_9 = arith.constant 0 : index
    %13 = vector.load %arg5[%c0_8, %c0_9] : memref<1x32xf32, #tpu.memory_space<vmem>>, vector<1x32xf32>
    %14 = vector.broadcast %13 : vector<1x32xf32> to vector<512x32xf32>
    %15 = arith.addf %12, %14 : vector<512x32xf32>
    %cst_10 = arith.constant 0.000000e+00 : f32
    %16 = vector.broadcast %cst_10 : f32 to vector<512x32xf32>
    %17 = arith.maximumf %15, %16 : vector<512x32xf32>
    %18 = arith.truncf %17 : vector<512x32xf32> to vector<512x32xbf16>
    %c0_11 = arith.constant 0 : index
    %c0_12 = arith.constant 0 : index
    %19 = vector.load %arg6[%c0_11, %c0_12] : memref<512x32xbf16, #tpu.memory_space<vmem>>, vector<512x32xbf16>
    tpu.vector_store %arg6[%c0_11, %c0_12], %18 {strides = array<i32>} : memref<512x32xbf16, #tpu.memory_space<vmem>>, vector<512x32xbf16>,
    return
  }
  func.func @transform_0(%arg0: i32) -> (i32, i32) {
    %c0_i32 = arith.constant 0 : i32
    %c0_i32_0 = arith.constant 0 : i32
    return %arg0, %c0_i32 : i32, i32
  }
  func.func @transform_1(%arg0: i32) -> (i32, i32) {
    %c0_i32 = arith.constant 0 : i32
    %c0_i32_0 = arith.constant 0 : i32
    %c0_i32_1 = arith.constant 0 : i32
    return %c0_i32, %c0_i32_0 : i32, i32
  }
  func.func @transform_2(%arg0: i32) -> (i32, i32) {
    %c0_i32 = arith.constant 0 : i32
    %c0_i32_0 = arith.constant 0 : i32
    %c0_i32_1 = arith.constant 0 : i32
    return %c0_i32, %c0_i32_0 : i32, i32
  }
  func.func @transform_3(%arg0: i32) -> (i32, i32) {
    %c0_i32 = arith.constant 0 : i32
    %c0_i32_0 = arith.constant 0 : i32
    %c0_i32_1 = arith.constant 0 : i32
    return %c0_i32, %c0_i32_0 : i32, i32
  }
  func.func @transform_4(%arg0: i32) -> (i32, i32) {
    %c0_i32 = arith.constant 0 : i32
    %c0_i32_0 = arith.constant 0 : i32
    %c0_i32_1 = arith.constant 0 : i32
    return %c0_i32, %c0_i32_0 : i32, i32
  }
  func.func @transform_5(%arg0: i32) -> (i32, i32) {
    %c0_i32 = arith.constant 0 : i32
    %c0_i32_0 = arith.constant 0 : i32
    return %arg0, %c0_i32 : i32, i32
  }
}

module attributes {stable_mosaic.version = 11 : i64} {
  func.func @_conv3x3_flat_kernel(%arg0: i32, %arg1: memref<1x326x32xbf16, #tpu.memory_space<vmem>>, %arg2: memref<3x3x32x8xbf16, #tpu.memory_space<vmem>>, %arg3: memref<1x288x8xbf16, #tpu.memory_space<vmem>>, %arg4: memref<288x8xf32, #tpu.memory_space<vmem>>) attributes {dimension_semantics = [#tpu.dimension_semantics<parallel>], iteration_bounds = array<i64: 2>, scalar_prefetch = 0 : i64, scratch_operands = 1 : i64, tpu.core_type = #tpu.core_type<tc>, window_params = [{transform_indices = @transform_0, window_bounds = array<i64: 1, 326, 32>}, {pipeline_mode = #tpu.pipeline_mode<synchronous>, transform_indices = @transform_1, window_bounds = array<i64: 3, 3, 32, 8>}, {transform_indices = @transform_2, window_bounds = array<i64: 1, 288, 8>}]} {
    %c0 = arith.constant 0 : index
    %c0_0 = arith.constant 0 : index
    %c0_1 = arith.constant 0 : index
    %0 = vector.load %arg1[%c0, %c0_0, %c0_1] : memref<1x326x32xbf16, #tpu.memory_space<vmem>>, vector<1x288x32xbf16>
    %1 = vector.shape_cast %0 : vector<1x288x32xbf16> to vector<288x32xbf16>
    %c0_2 = arith.constant 0 : index
    %c0_3 = arith.constant 0 : index
    %c0_4 = arith.constant 0 : index
    %c0_5 = arith.constant 0 : index
    %2 = vector.load %arg2[%c0_2, %c0_3, %c0_4, %c0_5] : memref<3x3x32x8xbf16, #tpu.memory_space<vmem>>, vector<1x1x32x8xbf16>
    %3 = vector.shape_cast %2 : vector<1x1x32x8xbf16> to vector<32x8xbf16>
    %cst = arith.constant dense<0.000000e+00> : vector<288x8xf32>
    %4 = tpu.matmul %1, %3, %cst {dimension_numbers = #tpu.dot_dimension_numbers<[1], [0], [0], [1], [0, 0, 1, 1], [], []>} : vector<288x32xbf16>, vector<32x8xbf16>, vector<288x8xf32> -> vector<288x8xf32>
    %c0_6 = arith.constant 0 : index
    %c0_7 = arith.constant 0 : index
    %5 = vector.load %arg4[%c0_6, %c0_7] : memref<288x8xf32, #tpu.memory_space<vmem>>, vector<288x8xf32>
    tpu.vector_store %arg4[%c0_6, %c0_7], %4 {strides = array<i32>} : memref<288x8xf32, #tpu.memory_space<vmem>>, vector<288x8xf32>,
    %c0_8 = arith.constant 0 : index
    %c1 = arith.constant 1 : index
    %c0_9 = arith.constant 0 : index
    %6 = vector.load %arg1[%c0_8, %c1, %c0_9] : memref<1x326x32xbf16, #tpu.memory_space<vmem>>, vector<1x288x32xbf16>
    %7 = vector.shape_cast %6 : vector<1x288x32xbf16> to vector<288x32xbf16>
    %c0_10 = arith.constant 0 : index
    %c1_11 = arith.constant 1 : index
    %c0_12 = arith.constant 0 : index
    %c0_13 = arith.constant 0 : index
    %8 = vector.load %arg2[%c0_10, %c1_11, %c0_12, %c0_13] : memref<3x3x32x8xbf16, #tpu.memory_space<vmem>>, vector<1x1x32x8xbf16>
    %9 = vector.shape_cast %8 : vector<1x1x32x8xbf16> to vector<32x8xbf16>
    %cst_14 = arith.constant dense<0.000000e+00> : vector<288x8xf32>
    %10 = tpu.matmul %7, %9, %cst_14 {dimension_numbers = #tpu.dot_dimension_numbers<[1], [0], [0], [1], [0, 0, 1, 1], [], []>} : vector<288x32xbf16>, vector<32x8xbf16>, vector<288x8xf32> -> vector<288x8xf32>
    %c0_15 = arith.constant 0 : index
    %c0_16 = arith.constant 0 : index
    %11 = vector.load %arg4[%c0_15, %c0_16] : memref<288x8xf32, #tpu.memory_space<vmem>>, vector<288x8xf32>
    %12 = arith.addf %11, %10 : vector<288x8xf32>
    %c0_17 = arith.constant 0 : index
    %c0_18 = arith.constant 0 : index
    %13 = vector.load %arg4[%c0_17, %c0_18] : memref<288x8xf32, #tpu.memory_space<vmem>>, vector<288x8xf32>
    tpu.vector_store %arg4[%c0_17, %c0_18], %12 {strides = array<i32>} : memref<288x8xf32, #tpu.memory_space<vmem>>, vector<288x8xf32>,
    %c0_19 = arith.constant 0 : index
    %c2 = arith.constant 2 : index
    %c0_20 = arith.constant 0 : index
    %14 = vector.load %arg1[%c0_19, %c2, %c0_20] : memref<1x326x32xbf16, #tpu.memory_space<vmem>>, vector<1x288x32xbf16>
    %15 = vector.shape_cast %14 : vector<1x288x32xbf16> to vector<288x32xbf16>
    %c0_21 = arith.constant 0 : index
    %c2_22 = arith.constant 2 : index
    %c0_23 = arith.constant 0 : index
    %c0_24 = arith.constant 0 : index
    %16 = vector.load %arg2[%c0_21, %c2_22, %c0_23, %c0_24] : memref<3x3x32x8xbf16, #tpu.memory_space<vmem>>, vector<1x1x32x8xbf16>
    %17 = vector.shape_cast %16 : vector<1x1x32x8xbf16> to vector<32x8xbf16>
    %cst_25 = arith.constant dense<0.000000e+00> : vector<288x8xf32>
    %18 = tpu.matmul %15, %17, %cst_25 {dimension_numbers = #tpu.dot_dimension_numbers<[1], [0], [0], [1], [0, 0, 1, 1], [], []>} : vector<288x32xbf16>, vector<32x8xbf16>, vector<288x8xf32> -> vector<288x8xf32>
    %c0_26 = arith.constant 0 : index
    %c0_27 = arith.constant 0 : index
    %19 = vector.load %arg4[%c0_26, %c0_27] : memref<288x8xf32, #tpu.memory_space<vmem>>, vector<288x8xf32>
    %20 = arith.addf %19, %18 : vector<288x8xf32>
    %c0_28 = arith.constant 0 : index
    %c0_29 = arith.constant 0 : index
    %21 = vector.load %arg4[%c0_28, %c0_29] : memref<288x8xf32, #tpu.memory_space<vmem>>, vector<288x8xf32>
    tpu.vector_store %arg4[%c0_28, %c0_29], %20 {strides = array<i32>} : memref<288x8xf32, #tpu.memory_space<vmem>>, vector<288x8xf32>,
    %c0_30 = arith.constant 0 : index
    %c18 = arith.constant 18 : index
    %c0_31 = arith.constant 0 : index
    %22 = vector.load %arg1[%c0_30, %c18, %c0_31] : memref<1x326x32xbf16, #tpu.memory_space<vmem>>, vector<1x288x32xbf16>
    %23 = vector.shape_cast %22 : vector<1x288x32xbf16> to vector<288x32xbf16>
    %c1_32 = arith.constant 1 : index
    %c0_33 = arith.constant 0 : index
    %c0_34 = arith.constant 0 : index
    %c0_35 = arith.constant 0 : index
    %24 = vector.load %arg2[%c1_32, %c0_33, %c0_34, %c0_35] : memref<3x3x32x8xbf16, #tpu.memory_space<vmem>>, vector<1x1x32x8xbf16>
    %25 = vector.shape_cast %24 : vector<1x1x32x8xbf16> to vector<32x8xbf16>
    %cst_36 = arith.constant dense<0.000000e+00> : vector<288x8xf32>
    %26 = tpu.matmul %23, %25, %cst_36 {dimension_numbers = #tpu.dot_dimension_numbers<[1], [0], [0], [1], [0, 0, 1, 1], [], []>} : vector<288x32xbf16>, vector<32x8xbf16>, vector<288x8xf32> -> vector<288x8xf32>
    %c0_37 = arith.constant 0 : index
    %c0_38 = arith.constant 0 : index
    %27 = vector.load %arg4[%c0_37, %c0_38] : memref<288x8xf32, #tpu.memory_space<vmem>>, vector<288x8xf32>
    %28 = arith.addf %27, %26 : vector<288x8xf32>
    %c0_39 = arith.constant 0 : index
    %c0_40 = arith.constant 0 : index
    %29 = vector.load %arg4[%c0_39, %c0_40] : memref<288x8xf32, #tpu.memory_space<vmem>>, vector<288x8xf32>
    tpu.vector_store %arg4[%c0_39, %c0_40], %28 {strides = array<i32>} : memref<288x8xf32, #tpu.memory_space<vmem>>, vector<288x8xf32>,
    %c0_41 = arith.constant 0 : index
    %c19 = arith.constant 19 : index
    %c0_42 = arith.constant 0 : index
    %30 = vector.load %arg1[%c0_41, %c19, %c0_42] : memref<1x326x32xbf16, #tpu.memory_space<vmem>>, vector<1x288x32xbf16>
    %31 = vector.shape_cast %30 : vector<1x288x32xbf16> to vector<288x32xbf16>
    %c1_43 = arith.constant 1 : index
    %c1_44 = arith.constant 1 : index
    %c0_45 = arith.constant 0 : index
    %c0_46 = arith.constant 0 : index
    %32 = vector.load %arg2[%c1_43, %c1_44, %c0_45, %c0_46] : memref<3x3x32x8xbf16, #tpu.memory_space<vmem>>, vector<1x1x32x8xbf16>
    %33 = vector.shape_cast %32 : vector<1x1x32x8xbf16> to vector<32x8xbf16>
    %cst_47 = arith.constant dense<0.000000e+00> : vector<288x8xf32>
    %34 = tpu.matmul %31, %33, %cst_47 {dimension_numbers = #tpu.dot_dimension_numbers<[1], [0], [0], [1], [0, 0, 1, 1], [], []>} : vector<288x32xbf16>, vector<32x8xbf16>, vector<288x8xf32> -> vector<288x8xf32>
    %c0_48 = arith.constant 0 : index
    %c0_49 = arith.constant 0 : index
    %35 = vector.load %arg4[%c0_48, %c0_49] : memref<288x8xf32, #tpu.memory_space<vmem>>, vector<288x8xf32>
    %36 = arith.addf %35, %34 : vector<288x8xf32>
    %c0_50 = arith.constant 0 : index
    %c0_51 = arith.constant 0 : index
    %37 = vector.load %arg4[%c0_50, %c0_51] : memref<288x8xf32, #tpu.memory_space<vmem>>, vector<288x8xf32>
    tpu.vector_store %arg4[%c0_50, %c0_51], %36 {strides = array<i32>} : memref<288x8xf32, #tpu.memory_space<vmem>>, vector<288x8xf32>,
    %c0_52 = arith.constant 0 : index
    %c20 = arith.constant 20 : index
    %c0_53 = arith.constant 0 : index
    %38 = vector.load %arg1[%c0_52, %c20, %c0_53] : memref<1x326x32xbf16, #tpu.memory_space<vmem>>, vector<1x288x32xbf16>
    %39 = vector.shape_cast %38 : vector<1x288x32xbf16> to vector<288x32xbf16>
    %c1_54 = arith.constant 1 : index
    %c2_55 = arith.constant 2 : index
    %c0_56 = arith.constant 0 : index
    %c0_57 = arith.constant 0 : index
    %40 = vector.load %arg2[%c1_54, %c2_55, %c0_56, %c0_57] : memref<3x3x32x8xbf16, #tpu.memory_space<vmem>>, vector<1x1x32x8xbf16>
    %41 = vector.shape_cast %40 : vector<1x1x32x8xbf16> to vector<32x8xbf16>
    %cst_58 = arith.constant dense<0.000000e+00> : vector<288x8xf32>
    %42 = tpu.matmul %39, %41, %cst_58 {dimension_numbers = #tpu.dot_dimension_numbers<[1], [0], [0], [1], [0, 0, 1, 1], [], []>} : vector<288x32xbf16>, vector<32x8xbf16>, vector<288x8xf32> -> vector<288x8xf32>
    %c0_59 = arith.constant 0 : index
    %c0_60 = arith.constant 0 : index
    %43 = vector.load %arg4[%c0_59, %c0_60] : memref<288x8xf32, #tpu.memory_space<vmem>>, vector<288x8xf32>
    %44 = arith.addf %43, %42 : vector<288x8xf32>
    %c0_61 = arith.constant 0 : index
    %c0_62 = arith.constant 0 : index
    %45 = vector.load %arg4[%c0_61, %c0_62] : memref<288x8xf32, #tpu.memory_space<vmem>>, vector<288x8xf32>
    tpu.vector_store %arg4[%c0_61, %c0_62], %44 {strides = array<i32>} : memref<288x8xf32, #tpu.memory_space<vmem>>, vector<288x8xf32>,
    %c0_63 = arith.constant 0 : index
    %c36 = arith.constant 36 : index
    %c0_64 = arith.constant 0 : index
    %46 = vector.load %arg1[%c0_63, %c36, %c0_64] : memref<1x326x32xbf16, #tpu.memory_space<vmem>>, vector<1x288x32xbf16>
    %47 = vector.shape_cast %46 : vector<1x288x32xbf16> to vector<288x32xbf16>
    %c2_65 = arith.constant 2 : index
    %c0_66 = arith.constant 0 : index
    %c0_67 = arith.constant 0 : index
    %c0_68 = arith.constant 0 : index
    %48 = vector.load %arg2[%c2_65, %c0_66, %c0_67, %c0_68] : memref<3x3x32x8xbf16, #tpu.memory_space<vmem>>, vector<1x1x32x8xbf16>
    %49 = vector.shape_cast %48 : vector<1x1x32x8xbf16> to vector<32x8xbf16>
    %cst_69 = arith.constant dense<0.000000e+00> : vector<288x8xf32>
    %50 = tpu.matmul %47, %49, %cst_69 {dimension_numbers = #tpu.dot_dimension_numbers<[1], [0], [0], [1], [0, 0, 1, 1], [], []>} : vector<288x32xbf16>, vector<32x8xbf16>, vector<288x8xf32> -> vector<288x8xf32>
    %c0_70 = arith.constant 0 : index
    %c0_71 = arith.constant 0 : index
    %51 = vector.load %arg4[%c0_70, %c0_71] : memref<288x8xf32, #tpu.memory_space<vmem>>, vector<288x8xf32>
    %52 = arith.addf %51, %50 : vector<288x8xf32>
    %c0_72 = arith.constant 0 : index
    %c0_73 = arith.constant 0 : index
    %53 = vector.load %arg4[%c0_72, %c0_73] : memref<288x8xf32, #tpu.memory_space<vmem>>, vector<288x8xf32>
    tpu.vector_store %arg4[%c0_72, %c0_73], %52 {strides = array<i32>} : memref<288x8xf32, #tpu.memory_space<vmem>>, vector<288x8xf32>,
    %c0_74 = arith.constant 0 : index
    %c37 = arith.constant 37 : index
    %c0_75 = arith.constant 0 : index
    %54 = vector.load %arg1[%c0_74, %c37, %c0_75] : memref<1x326x32xbf16, #tpu.memory_space<vmem>>, vector<1x288x32xbf16>
    %55 = vector.shape_cast %54 : vector<1x288x32xbf16> to vector<288x32xbf16>
    %c2_76 = arith.constant 2 : index
    %c1_77 = arith.constant 1 : index
    %c0_78 = arith.constant 0 : index
    %c0_79 = arith.constant 0 : index
    %56 = vector.load %arg2[%c2_76, %c1_77, %c0_78, %c0_79] : memref<3x3x32x8xbf16, #tpu.memory_space<vmem>>, vector<1x1x32x8xbf16>
    %57 = vector.shape_cast %56 : vector<1x1x32x8xbf16> to vector<32x8xbf16>
    %cst_80 = arith.constant dense<0.000000e+00> : vector<288x8xf32>
    %58 = tpu.matmul %55, %57, %cst_80 {dimension_numbers = #tpu.dot_dimension_numbers<[1], [0], [0], [1], [0, 0, 1, 1], [], []>} : vector<288x32xbf16>, vector<32x8xbf16>, vector<288x8xf32> -> vector<288x8xf32>
    %c0_81 = arith.constant 0 : index
    %c0_82 = arith.constant 0 : index
    %59 = vector.load %arg4[%c0_81, %c0_82] : memref<288x8xf32, #tpu.memory_space<vmem>>, vector<288x8xf32>
    %60 = arith.addf %59, %58 : vector<288x8xf32>
    %c0_83 = arith.constant 0 : index
    %c0_84 = arith.constant 0 : index
    %61 = vector.load %arg4[%c0_83, %c0_84] : memref<288x8xf32, #tpu.memory_space<vmem>>, vector<288x8xf32>
    tpu.vector_store %arg4[%c0_83, %c0_84], %60 {strides = array<i32>} : memref<288x8xf32, #tpu.memory_space<vmem>>, vector<288x8xf32>,
    %c0_85 = arith.constant 0 : index
    %c38 = arith.constant 38 : index
    %c0_86 = arith.constant 0 : index
    %62 = vector.load %arg1[%c0_85, %c38, %c0_86] : memref<1x326x32xbf16, #tpu.memory_space<vmem>>, vector<1x288x32xbf16>
    %63 = vector.shape_cast %62 : vector<1x288x32xbf16> to vector<288x32xbf16>
    %c2_87 = arith.constant 2 : index
    %c2_88 = arith.constant 2 : index
    %c0_89 = arith.constant 0 : index
    %c0_90 = arith.constant 0 : index
    %64 = vector.load %arg2[%c2_87, %c2_88, %c0_89, %c0_90] : memref<3x3x32x8xbf16, #tpu.memory_space<vmem>>, vector<1x1x32x8xbf16>
    %65 = vector.shape_cast %64 : vector<1x1x32x8xbf16> to vector<32x8xbf16>
    %cst_91 = arith.constant dense<0.000000e+00> : vector<288x8xf32>
    %66 = tpu.matmul %63, %65, %cst_91 {dimension_numbers = #tpu.dot_dimension_numbers<[1], [0], [0], [1], [0, 0, 1, 1], [], []>} : vector<288x32xbf16>, vector<32x8xbf16>, vector<288x8xf32> -> vector<288x8xf32>
    %c0_92 = arith.constant 0 : index
    %c0_93 = arith.constant 0 : index
    %67 = vector.load %arg4[%c0_92, %c0_93] : memref<288x8xf32, #tpu.memory_space<vmem>>, vector<288x8xf32>
    %68 = arith.addf %67, %66 : vector<288x8xf32>
    %c0_94 = arith.constant 0 : index
    %c0_95 = arith.constant 0 : index
    %69 = vector.load %arg4[%c0_94, %c0_95] : memref<288x8xf32, #tpu.memory_space<vmem>>, vector<288x8xf32>
    tpu.vector_store %arg4[%c0_94, %c0_95], %68 {strides = array<i32>} : memref<288x8xf32, #tpu.memory_space<vmem>>, vector<288x8xf32>,
    %c0_96 = arith.constant 0 : index
    %c0_97 = arith.constant 0 : index
    %70 = vector.load %arg4[%c0_96, %c0_97] : memref<288x8xf32, #tpu.memory_space<vmem>>, vector<288x8xf32>
    %71 = arith.truncf %70 : vector<288x8xf32> to vector<288x8xbf16>
    %c0_98 = arith.constant 0 : index
    %c0_99 = arith.constant 0 : index
    %c0_100 = arith.constant 0 : index
    %72 = vector.load %arg3[%c0_98, %c0_99, %c0_100] : memref<1x288x8xbf16, #tpu.memory_space<vmem>>, vector<1x288x8xbf16>
    %73 = vector.shape_cast %72 : vector<1x288x8xbf16> to vector<288x8xbf16>
    %74 = vector.shape_cast %71 : vector<288x8xbf16> to vector<1x288x8xbf16>
    tpu.vector_store %arg3[%c0_98, %c0_99, %c0_100], %74 {strides = array<i32>} : memref<1x288x8xbf16, #tpu.memory_space<vmem>>, vector<1x288x8xbf16>,
    return
  }
  func.func @transform_0(%arg0: i32) -> (i32, i32, i32) {
    %c0_i32 = arith.constant 0 : i32
    %c0_i32_0 = arith.constant 0 : i32
    %c0_i32_1 = arith.constant 0 : i32
    return %arg0, %c0_i32, %c0_i32_0 : i32, i32, i32
  }
  func.func @transform_1(%arg0: i32) -> (i32, i32, i32, i32) {
    %c0_i32 = arith.constant 0 : i32
    %c0_i32_0 = arith.constant 0 : i32
    %c0_i32_1 = arith.constant 0 : i32
    %c0_i32_2 = arith.constant 0 : i32
    %c0_i32_3 = arith.constant 0 : i32
    return %c0_i32, %c0_i32_0, %c0_i32_1, %c0_i32_2 : i32, i32, i32, i32
  }
  func.func @transform_2(%arg0: i32) -> (i32, i32, i32) {
    %c0_i32 = arith.constant 0 : i32
    %c0_i32_0 = arith.constant 0 : i32
    %c0_i32_1 = arith.constant 0 : i32
    return %arg0, %c0_i32, %c0_i32_0 : i32, i32, i32
  }
}

</mosaic_0001>

<bundles_post_ra>
// kernel: _lambda_.2
= control target key start
LH: loop header
LB: loop body
LE: loop exit
PB: predicated region body
PF: predicated region fallthrough
CT: control target
= control target key end

     0   :  { %vm410_vm0 = vcmask 261120   ;;  %vm1116_vm1 = vcmask 257024   ;;  %s2244_s3 = inlined_call_operand.vmem [shape: bf16[32,32], index: 3, kind: input, shape index: {}]   ;;  %s2245_s0 = inlined_call_operand.vmem [shape: bf16[512,32], index: 0, kind: input, shape index: {}]   ;;  %s2246_s1 = inlined_call_operand.vmem [shape: f32[1,32], index: 1, kind: input, shape index: {}]   ;;  %s2247_s2 = inlined_call_operand.vmem [shape: f32[1,32], index: 2, kind: input, shape index: {}]   ;;  %s2248_s4 = inlined_call_operand.vmem [shape: f32[1,32], index: 4, kind: input, shape index: {}]   ;;  %s2249_s5 = inlined_call_operand.vmem [shape: bf16[512,32], index: 5, kind: output, shape index: {}]  }
   0x1   :  { %v1615_v0 = vld [vmem:[%s2244_s3] sm:$0xff]   ;;  %v1616_v1 = vld [vmem:[%s2244_s3 + $0x8] sm:$0xff]   ;;  %v1479_v14 = vld [vmem:[%s2245_s0 + $0x10] sm:$0xff]  }
   0x2   :  { %1543 = vmatprep.subr.bf16.mxu0 %v1615_v0  ;;  %1611 = vmatprep.subr.bf16.mxu1 %v1615_v0  ;;  %v1351_v2 = vld [vmem:[%s2245_s0] sm:$0xff]   ;;  %v1478_v7 = vld [vmem:[%s2245_s0 + $0x8] sm:$0xff]   ;;  %v1360_v26 = vunpack.c.l.bf16 %v1479_v14  ;;  %v1495_v35 = vld [vmem:[%s2245_s0 + $0x90] sm:$0xff]   ;;  %v1361_v44 = vunpack.c.h.bf16 %v1479_v14 }
   0x3   :  { %v1659_v3 = vld [vmem:[%s2246_s1] ss:$0 sm:$0xff]  ;;  %1544 = vmatpush3.bf16.msra.mxu0 %v1615_v0  ;;  %1613 = vmatpush3.bf16.msra.mxu1 %v1615_v0  ;;  %v1352_v4 = vunpack.c.l.bf16 %v1351_v2  ;;  %v1353_v5 = vunpack.c.h.bf16 %v1351_v2  ;;  %v1494_v8 = vld [vmem:[%s2245_s0 + $0x88] sm:$0xff]   ;;  %v1356_v12 = vunpack.c.l.bf16 %v1478_v7  ;;  %v1357_v13 = vunpack.c.h.bf16 %v1478_v7  ;;  %v1480_v40 = vld [vmem:[%s2245_s0 + $0x18] sm:$0xff]  }
   0x4   :  { %v1493_v6 = vld [vmem:[%s2245_s0 + $0x80] sm:$0xff]   ;;  %1545 = vmatprep.subr.bf16.mxu0 %v1616_v1  ;;  %1612 = vmatprep.subr.bf16.mxu1 %v1616_v1  ;;  %v1420_v17 = vunpack.c.l.bf16 %v1494_v8  ;;  %v1421_v18 = vunpack.c.h.bf16 %v1494_v8  ;;  %v1496_v45 = vld [vmem:[%s2245_s0 + $0x98] sm:$0xff]   ;;  %v160_v48 = vmul.f32 %v1360_v26, %v1659_v3  ;;  %v1424_v49 = vunpack.c.l.bf16 %v1495_v35 }
   0x5   :  { %v1673_v9 = vld [vmem:[%s2247_s2] ss:$0 sm:$0xff]  ;;  %v1416_v10 = vunpack.c.l.bf16 %v1493_v6  ;;  %v1417_v11 = vunpack.c.h.bf16 %v1493_v6  ;;  %v156_v15 = vmul.f32 %v1352_v4, %v1659_v3  ;;  %v157_v16 = vmul.f32 %v1353_v5, %v1659_v3 }
   0x6   :  { %v158_v21 = vmul.f32 %v1356_v12, %v1659_v3  ;;  %v159_v22 = vmul.f32 %v1357_v13, %v1659_v3  ;;  %v190_v25 = vmul.f32 %v1420_v17, %v1659_v3  ;;  %v191_v33 = vmul.f32 %v1421_v18, %v1659_v3  ;;  %v1481_v62 = vld [vmem:[%s2245_s0 + $0x20] sm:$0xff]  }
   0x7   :  { %v188_v19 = vmul.f32 %v1416_v10, %v1659_v3  ;;  %v189_v20 = vmul.f32 %v1417_v11, %v1659_v3  ;;  %1546 = vmatpush3.bf16.msra.mxu0 %v1616_v1  ;;  %1614 = vmatpush3.bf16.msra.mxu1 %v1616_v1  ;;  %v227_v23 = vadd.f32 %v1673_v9, %v156_v15  ;;  %v1425_v52 = vunpack.c.h.bf16 %v1495_v35  ;;  %v1497_v13 = vld [vmem:[%s2245_s0 + $0xa0] sm:$0xff]  }
   0x8   :  { %v228_v24 = vadd.f32 %v1673_v9, %v157_v16  ;;  %v229_v29 = vadd.f32 %v1673_v9, %v158_v21  ;;  %v230_v30 = vadd.f32 %v1673_v9, %v159_v22  ;;  %v261_v34 = vadd.f32 %v1673_v9, %v190_v25  ;;  %v1482_v22 = vld [vmem:[%s2245_s0 + $0x28] sm:$0xff]  }
   0x9   :  { %v259_v27 = vadd.f32 %v1673_v9, %v188_v19  ;;  %v260_v28 = vadd.f32 %v1673_v9, %v189_v20  ;;  %v291_v31 = vmax.f32 %v227_v23, 0.0  ;;  %v262_v42 = vadd.f32 %v1673_v9, %v191_v33 }
   0xa   :  { %v292_v32 = vmax.f32 %v228_v24, 0.0  ;;  %v293_v38 = vmax.f32 %v229_v29, 0.0  ;;  %v294_v39 = vmax.f32 %v230_v30, 0.0  ;;  %v325_v43 = vmax.f32 %v261_v34, 0.0 }
   0xb   :  { %v323_v36 = vmax.f32 %v259_v27, 0.0  ;;  %v324_v37 = vmax.f32 %v260_v28, 0.0  ;;  %v326_v50 = vmax.f32 %v262_v42, 0.0  ;;  %v161_v51 = vmul.f32 %v1361_v44, %v1659_v3  ;;  %v1498_v27 = vld [vmem:[%s2245_s0 + $0xa8] sm:$0xff]  }
   0xc   :  { %v355_v41 = vpack.c.bf16 %v292_v32, %v291_v31  ;;  %v356_v47 = vpack.c.bf16 %v294_v39, %v293_v38  ;;  %v1364_v53 = vunpack.c.l.bf16 %v1480_v40  ;;  %v231_v54 = vadd.f32 %v1673_v9, %v160_v48 }
   0xd   :  { %v371_v46 = vpack.c.bf16 %v324_v37, %v323_v36  ;;  %v192_v55 = vmul.f32 %v1424_v49, %v1659_v3  ;;  %v1365_v56 = vunpack.c.h.bf16 %v1480_v40  ;;  %v1428_v57 = vunpack.c.l.bf16 %v1496_v45  ;;  %v1483_v36 = vld [vmem:[%s2245_s0 + $0x30] sm:$0xff]  }
   0xe   :  { %1547 = vmatprep.mubr.msk.bf16.mxu0 %vm410_vm0, %v355_v41  ;;  %v372_v58 = vpack.c.bf16 %v326_v50, %v325_v43  ;;  %v232_v59 = vadd.f32 %v1673_v9, %v161_v51  ;;  %v193_v60 = vmul.f32 %v1425_v52, %v1659_v3  ;;  %v162_v61 = vmul.f32 %v1364_v53, %v1659_v3  ;;  %v1499_v53 = vld [vmem:[%s2245_s0 + $0xb0] sm:$0xff]  }
   0xf   :  { %1579 = vmatprep.mubr.msk.bf16.mxu1 %vm410_vm0, %v371_v46  ;;  %1548 = vmatmul.mubr.msk.bf16.vlgmr.msra.gmra.mrb[0].mxu0 %vm410_vm0, %v356_v47  ;;  %v295_v63 = vmax.f32 %v231_v54, 0.0  ;;  %v263_v0 = vadd.f32 %v1673_v9, %v192_v55  ;;  %v163_v1 = vmul.f32 %v1365_v56, %v1659_v3  ;;  %v1429_v2 = vunpack.c.h.bf16 %v1496_v45 }
  0x10   :  { %1580 = vmatmul.mubr.msk.bf16.vlgmr.msra.gmra.mrb[0].mxu1 %vm410_vm0, %v372_v58  ;;  %v296_v4 = vmax.f32 %v232_v59, 0.0  ;;  %v264_v5 = vadd.f32 %v1673_v9, %v193_v60  ;;  %v233_v6 = vadd.f32 %v1673_v9, %v162_v61  ;;  %v194_v7 = vmul.f32 %v1428_v57, %v1659_v3  ;;  %v1484_v58 = vld [vmem:[%s2245_s0 + $0x38] sm:$0xff]  }
  0x11   :  { %v327_v8 = vmax.f32 %v263_v0, 0.0  ;;  %v234_v10 = vadd.f32 %v1673_v9, %v163_v1  ;;  %v195_v11 = vmul.f32 %v1429_v2, %v1659_v3  ;;  %v1368_v12 = vunpack.c.l.bf16 %v1481_v62 }
  0x12   :  { %v357_v14 = vpack.c.bf16 %v296_v4, %v295_v63  ;;  %v328_v15 = vmax.f32 %v264_v5, 0.0  ;;  %v297_v16 = vmax.f32 %v233_v6, 0.0  ;;  %v265_v17 = vadd.f32 %v1673_v9, %v194_v7  ;;  %v1500_v4 = vld [vmem:[%s2245_s0 + $0xb8] sm:$0xff]  }
  0x13   :  { %v298_v18 = vmax.f32 %v234_v10, 0.0  ;;  %v266_v19 = vadd.f32 %v1673_v9, %v195_v11  ;;  %v1369_v20 = vunpack.c.h.bf16 %v1481_v62  ;;  %v164_v21 = vmul.f32 %v1368_v12, %v1659_v3 }
  0x14   :  { %1551 = vmatprep.mubr.msk.bf16.mxu0 %vm410_vm0, %v357_v14  ;;  %v373_v23 = vpack.c.bf16 %v328_v15, %v327_v8  ;;  %v329_v24 = vmax.f32 %v265_v17, 0.0  ;;  %v1432_v25 = vunpack.c.l.bf16 %v1497_v13  ;;  %v1433_v26 = vunpack.c.h.bf16 %v1497_v13 }
  0x15   :  { %v358_v28 = vpack.c.bf16 %v298_v18, %v297_v16  ;;  %v330_v29 = vmax.f32 %v266_v19, 0.0  ;;  %v165_v30 = vmul.f32 %v1369_v20, %v1659_v3  ;;  %v235_v31 = vadd.f32 %v1673_v9, %v164_v21  ;;  %v1485_v18 = vld [vmem:[%s2245_s0 + $0x40] sm:$0xff]  }
  0x16   :  { %1583 = vmatprep.mubr.msk.bf16.mxu1 %vm410_vm0, %v373_v23  ;;  %v196_v32 = vmul.f32 %v1432_v25, %v1659_v3  ;;  %v197_v33 = vmul.f32 %v1433_v26, %v1659_v3  ;;  %v1372_v34 = vunpack.c.l.bf16 %v1482_v22  ;;  %v1373_v35 = vunpack.c.h.bf16 %v1482_v22 }
  0x17   :  { %1552 = vmatmul.mubr.msk.bf16.gmra.mrb[4].mxu0 %vm410_vm0, %v358_v28  ;;  %v374_v37 = vpack.c.bf16 %v330_v29, %v329_v24  ;;  %v236_v38 = vadd.f32 %v1673_v9, %v165_v30  ;;  %v299_v39 = vmax.f32 %v235_v31, 0.0  ;;  %v1436_v40 = vunpack.c.l.bf16 %v1498_v27 }
  0x18   :  { %v267_v41 = vadd.f32 %v1673_v9, %v196_v32  ;;  %v268_v42 = vadd.f32 %v1673_v9, %v197_v33  ;;  %v166_v43 = vmul.f32 %v1372_v34, %v1659_v3  ;;  %v167_v44 = vmul.f32 %v1373_v35, %v1659_v3 }
  0x19   :  { %1584 = vmatmul.mubr.msk.bf16.gmra.mrb[4].mxu1 %vm410_vm0, %v374_v37  ;;  %v300_v45 = vmax.f32 %v236_v38, 0.0  ;;  %v1437_v46 = vunpack.c.h.bf16 %v1498_v27  ;;  %v198_v47 = vmul.f32 %v1436_v40, %v1659_v3  ;;  %v1376_v48 = vunpack.c.l.bf16 %v1483_v36  ;;  %v1501_v27 = vld [vmem:[%s2245_s0 + $0xc0] sm:$0xff]   ;;  %v1486_v40 = vld [vmem:[%s2245_s0 + $0x48] sm:$0xff]  }
  0x1a   :  { %v331_v49 = vmax.f32 %v267_v41, 0.0  ;;  %v332_v50 = vmax.f32 %v268_v42, 0.0  ;;  %v237_v51 = vadd.f32 %v1673_v9, %v166_v43  ;;  %v238_v52 = vadd.f32 %v1673_v9, %v167_v44 }
  0x1b   :  { %v359_v54 = vpack.c.bf16 %v300_v45, %v299_v39  ;;  %v199_v55 = vmul.f32 %v1437_v46, %v1659_v3  ;;  %v269_v56 = vadd.f32 %v1673_v9, %v198_v47  ;;  %v1377_v57 = vunpack.c.h.bf16 %v1483_v36  ;;  %v1502_v45 = vld [vmem:[%s2245_s0 + $0xc8] sm:$0xff]  }
  0x1c   :  { %v375_v59 = vpack.c.bf16 %v332_v50, %v331_v49  ;;  %v301_v60 = vmax.f32 %v237_v51, 0.0  ;;  %v302_v61 = vmax.f32 %v238_v52, 0.0  ;;  %v168_v62 = vmul.f32 %v1376_v48, %v1659_v3 }
  0x1d   :  { %1555 = vmatprep.mubr.msk.bf16.mxu0 %vm410_vm0, %v359_v54  ;;  %v270_v63 = vadd.f32 %v1673_v9, %v199_v55  ;;  %v333_v0 = vmax.f32 %v269_v56, 0.0  ;;  %v169_v1 = vmul.f32 %v1377_v57, %v1659_v3  ;;  %v1440_v2 = vunpack.c.l.bf16 %v1499_v53 }
  0x1e   :  { %1587 = vmatprep.mubr.msk.bf16.mxu1 %vm410_vm0, %v375_v59  ;;  %v360_v5 = vpack.c.bf16 %v302_v61, %v301_v60  ;;  %v239_v6 = vadd.f32 %v1673_v9, %v168_v62  ;;  %v1441_v7 = vunpack.c.h.bf16 %v1499_v53  ;;  %v1380_v8 = vunpack.c.l.bf16 %v1484_v58 }
  0x1f   :  { %v334_v10 = vmax.f32 %v270_v63, 0.0  ;;  %v240_v11 = vadd.f32 %v1673_v9, %v169_v1  ;;  %v200_v12 = vmul.f32 %v1440_v2, %v1659_v3  ;;  %v1381_v13 = vunpack.c.h.bf16 %v1484_v58  ;;  %v1487_v58 = vld [vmem:[%s2245_s0 + $0x50] sm:$0xff]  }
  0x20   :  { %1556 = vmatmul.mubr.msk.bf16.gmra.mrb[8].mxu0 %vm410_vm0, %v360_v5  ;;  %v303_v14 = vmax.f32 %v239_v6, 0.0  ;;  %v201_v15 = vmul.f32 %v1441_v7, %v1659_v3  ;;  %v170_v16 = vmul.f32 %v1380_v8, %v1659_v3  ;;  %v1444_v17 = vunpack.c.l.bf16 %v1500_v4  ;;  %v1503_v8 = vld [vmem:[%s2245_s0 + $0xd0] sm:$0xff]  }
  0x21   :  { %v376_v19 = vpack.c.bf16 %v334_v10, %v333_v0  ;;  %v304_v20 = vmax.f32 %v240_v11, 0.0  ;;  %v271_v21 = vadd.f32 %v1673_v9, %v200_v12  ;;  %v171_v22 = vmul.f32 %v1381_v13, %v1659_v3 }
  0x22   :  { %v272_v23 = vadd.f32 %v1673_v9, %v201_v15  ;;  %v241_v24 = vadd.f32 %v1673_v9, %v170_v16  ;;  %v1445_v25 = vunpack.c.h.bf16 %v1500_v4  ;;  %v202_v26 = vmul.f32 %v1444_v17, %v1659_v3 }
  0x23   :  { %1588 = vmatmul.mubr.msk.bf16.gmra.mrb[8].mxu1 %vm410_vm0, %v376_v19  ;;  %v361_v28 = vpack.c.bf16 %v304_v20, %v303_v14  ;;  %v335_v29 = vmax.f32 %v271_v21, 0.0  ;;  %v242_v30 = vadd.f32 %v1673_v9, %v171_v22  ;;  %v1384_v31 = vunpack.c.l.bf16 %v1485_v18  ;;  %v1488_v14 = vld [vmem:[%s2245_s0 + $0x58] sm:$0xff]  }
  0x24   :  { %v336_v32 = vmax.f32 %v272_v23, 0.0  ;;  %v305_v33 = vmax.f32 %v241_v24, 0.0  ;;  %v203_v34 = vmul.f32 %v1445_v25, %v1659_v3  ;;  %v273_v35 = vadd.f32 %v1673_v9, %v202_v26  ;;  %v1504_v23 = vld [vmem:[%s2245_s0 + $0xd8] sm:$0xff]  }
  0x25   :  { %1559 = vmatprep.mubr.msk.bf16.mxu0 %vm410_vm0, %v361_v28  ;;  %v306_v36 = vmax.f32 %v242_v30, 0.0  ;;  %v1385_v37 = vunpack.c.h.bf16 %v1485_v18  ;;  %v172_v38 = vmul.f32 %v1384_v31, %v1659_v3  ;;  %v1448_v39 = vunpack.c.l.bf16 %v1501_v27 }
  0x26   :  { %v377_v41 = vpack.c.bf16 %v336_v32, %v335_v29  ;;  %v274_v42 = vadd.f32 %v1673_v9, %v203_v34  ;;  %v337_v43 = vmax.f32 %v273_v35, 0.0  ;;  %v1449_v44 = vunpack.c.h.bf16 %v1501_v27 }
  0x27   :  { %v362_v46 = vpack.c.bf16 %v306_v36, %v305_v33  ;;  %v173_v47 = vmul.f32 %v1385_v37, %v1659_v3  ;;  %v243_v48 = vadd.f32 %v1673_v9, %v172_v38  ;;  %v204_v49 = vmul.f32 %v1448_v39, %v1659_v3  ;;  %v1489_v36 = vld [vmem:[%s2245_s0 + $0x60] sm:$0xff]  }
  0x28   :  { %1591 = vmatprep.mubr.msk.bf16.mxu1 %vm410_vm0, %v377_v41  ;;  %v338_v50 = vmax.f32 %v274_v42, 0.0  ;;  %v205_v51 = vmul.f32 %v1449_v44, %v1659_v3  ;;  %v1388_v52 = vunpack.c.l.bf16 %v1486_v40  ;;  %v1389_v53 = vunpack.c.h.bf16 %v1486_v40 }
  0x29   :  { %1560 = vmatmul.mubr.msk.bf16.gmra.mrb[12].mxu0 %vm410_vm0, %v362_v46  ;;  %v244_v54 = vadd.f32 %v1673_v9, %v173_v47  ;;  %v307_v55 = vmax.f32 %v243_v48, 0.0  ;;  %v275_v56 = vadd.f32 %v1673_v9, %v204_v49  ;;  %v1452_v57 = vunpack.c.l.bf16 %v1502_v45 }
  0x2a   :  { %v378_v59 = vpack.c.bf16 %v338_v50, %v337_v43  ;;  %v276_v60 = vadd.f32 %v1673_v9, %v205_v51  ;;  %v174_v61 = vmul.f32 %v1388_v52, %v1659_v3  ;;  %v175_v62 = vmul.f32 %v1389_v53, %v1659_v3 }
  0x2b   :  { %v308_v63 = vmax.f32 %v244_v54, 0.0  ;;  %v339_v0 = vmax.f32 %v275_v56, 0.0  ;;  %v1453_v1 = vunpack.c.h.bf16 %v1502_v45  ;;  %v206_v2 = vmul.f32 %v1452_v57, %v1659_v3  ;;  %v1505_v45 = vld [vmem:[%s2245_s0 + $0xe0] sm:$0xff]  }
  0x2c   :  { %1592 = vmatmul.mubr.msk.bf16.gmra.mrb[12].mxu1 %vm410_vm0, %v378_v59  ;;  %v340_v4 = vmax.f32 %v276_v60, 0.0  ;;  %v245_v5 = vadd.f32 %v1673_v9, %v174_v61  ;;  %v246_v6 = vadd.f32 %v1673_v9, %v175_v62  ;;  %v1392_v7 = vunpack.c.l.bf16 %v1487_v58 }
  0x2d   :  { %v363_v10 = vpack.c.bf16 %v308_v63, %v307_v55  ;;  %v207_v11 = vmul.f32 %v1453_v1, %v1659_v3  ;;  %v277_v12 = vadd.f32 %v1673_v9, %v206_v2  ;;  %v1393_v13 = vunpack.c.h.bf16 %v1487_v58  ;;  %v1490_v58 = vld [vmem:[%s2245_s0 + $0x68] sm:$0xff]  }
  0x2e   :  { %v379_v15 = vpack.c.bf16 %v340_v4, %v339_v0  ;;  %v309_v16 = vmax.f32 %v245_v5, 0.0  ;;  %v310_v17 = vmax.f32 %v246_v6, 0.0  ;;  %v176_v18 = vmul.f32 %v1392_v7, %v1659_v3  ;;  %v1506_v63 = vld [vmem:[%s2245_s0 + $0xe8] sm:$0xff]  }
  0x2f   :  { %1563 = vmatprep.mubr.msk.bf16.mxu0 %vm410_vm0, %v363_v10  ;;  %v278_v19 = vadd.f32 %v1673_v9, %v207_v11  ;;  %v341_v20 = vmax.f32 %v277_v12, 0.0  ;;  %v177_v21 = vmul.f32 %v1393_v13, %v1659_v3  ;;  %v1456_v22 = vunpack.c.l.bf16 %v1503_v8 }
  0x30   :  { %1595 = vmatprep.mubr.msk.bf16.mxu1 %vm410_vm0, %v379_v15  ;;  %v364_v24 = vpack.c.bf16 %v310_v17, %v309_v16  ;;  %v247_v25 = vadd.f32 %v1673_v9, %v176_v18  ;;  %v1457_v26 = vunpack.c.h.bf16 %v1503_v8  ;;  %v1396_v27 = vunpack.c.l.bf16 %v1488_v14 }
  0x31   :  { %v342_v28 = vmax.f32 %v278_v19, 0.0  ;;  %v248_v29 = vadd.f32 %v1673_v9, %v177_v21  ;;  %v208_v30 = vmul.f32 %v1456_v22, %v1659_v3  ;;  %v1397_v31 = vunpack.c.h.bf16 %v1488_v14  ;;  %v1491_v14 = vld [vmem:[%s2245_s0 + $0x70] sm:$0xff]  }
  0x32   :  { %1564 = vmatmul.mubr.msk.bf16.gmra.mrb[16].mxu0 %vm410_vm0, %v364_v24  ;;  %v311_v32 = vmax.f32 %v247_v25, 0.0  ;;  %v209_v33 = vmul.f32 %v1457_v26, %v1659_v3  ;;  %v178_v34 = vmul.f32 %v1396_v27, %v1659_v3  ;;  %v1460_v35 = vunpack.c.l.bf16 %v1504_v23  ;;  %v1507_v27 = vld [vmem:[%s2245_s0 + $0xf0] sm:$0xff]  }
  0x33   :  { %v380_v37 = vpack.c.bf16 %v342_v28, %v341_v20  ;;  %v312_v38 = vmax.f32 %v248_v29, 0.0  ;;  %v279_v39 = vadd.f32 %v1673_v9, %v208_v30  ;;  %v179_v40 = vmul.f32 %v1397_v31, %v1659_v3 }
  0x34   :  { %v280_v41 = vadd.f32 %v1673_v9, %v209_v33  ;;  %v249_v42 = vadd.f32 %v1673_v9, %v178_v34  ;;  %v1461_v43 = vunpack.c.h.bf16 %v1504_v23  ;;  %v210_v44 = vmul.f32 %v1460_v35, %v1659_v3 }
  0x35   :  { %1596 = vmatmul.mubr.msk.bf16.gmra.mrb[16].mxu1 %vm410_vm0, %v380_v37  ;;  %v365_v46 = vpack.c.bf16 %v312_v38, %v311_v32  ;;  %v343_v47 = vmax.f32 %v279_v39, 0.0  ;;  %v250_v48 = vadd.f32 %v1673_v9, %v179_v40  ;;  %v1400_v49 = vunpack.c.l.bf16 %v1489_v36  ;;  %v1492_v32 = vld [vmem:[%s2245_s0 + $0x78] sm:$0xff]  }
  0x36   :  { %v344_v50 = vmax.f32 %v280_v41, 0.0  ;;  %v313_v51 = vmax.f32 %v249_v42, 0.0  ;;  %v211_v52 = vmul.f32 %v1461_v43, %v1659_v3  ;;  %v281_v53 = vadd.f32 %v1673_v9, %v210_v44  ;;  %v1508_v41 = vld [vmem:[%s2245_s0 + $0xf8] sm:$0xff]  }
  0x37   :  { %1567 = vmatprep.mubr.msk.bf16.mxu0 %vm410_vm0, %v365_v46  ;;  %v314_v54 = vmax.f32 %v250_v48, 0.0  ;;  %v1401_v55 = vunpack.c.h.bf16 %v1489_v36  ;;  %v180_v56 = vmul.f32 %v1400_v49, %v1659_v3  ;;  %v1464_v57 = vunpack.c.l.bf16 %v1505_v45 }
  0x38   :  { %v381_v59 = vpack.c.bf16 %v344_v50, %v343_v47  ;;  %v282_v60 = vadd.f32 %v1673_v9, %v211_v52  ;;  %v345_v61 = vmax.f32 %v281_v53, 0.0  ;;  %v1465_v62 = vunpack.c.h.bf16 %v1505_v45 }
  0x39   :  { %v366_v0 = vpack.c.bf16 %v314_v54, %v313_v51  ;;  %v181_v1 = vmul.f32 %v1401_v55, %v1659_v3  ;;  %v251_v2 = vadd.f32 %v1673_v9, %v180_v56  ;;  %v212_v4 = vmul.f32 %v1464_v57, %v1659_v3 }
  0x3a   :  { %1599 = vmatprep.mubr.msk.bf16.mxu1 %vm410_vm0, %v381_v59  ;;  %v346_v5 = vmax.f32 %v282_v60, 0.0  ;;  %v213_v6 = vmul.f32 %v1465_v62, %v1659_v3  ;;  %v1404_v7 = vunpack.c.l.bf16 %v1490_v58  ;;  %v1405_v8 = vunpack.c.h.bf16 %v1490_v58 }
  0x3b   :  { %1568 = vmatmul.mubr.msk.bf16.gmra.mrb[20].mxu0 %vm410_vm0, %v366_v0  ;;  %v252_v10 = vadd.f32 %v1673_v9, %v181_v1  ;;  %v315_v11 = vmax.f32 %v251_v2, 0.0  ;;  %v283_v12 = vadd.f32 %v1673_v9, %v212_v4  ;;  %v1468_v13 = vunpack.c.l.bf16 %v1506_v63 }
  0x3c   :  { %v382_v15 = vpack.c.bf16 %v346_v5, %v345_v61  ;;  %v284_v16 = vadd.f32 %v1673_v9, %v213_v6  ;;  %v182_v17 = vmul.f32 %v1404_v7, %v1659_v3  ;;  %v183_v18 = vmul.f32 %v1405_v8, %v1659_v3 }
  0x3d   :  { %v316_v19 = vmax.f32 %v252_v10, 0.0  ;;  %v347_v20 = vmax.f32 %v283_v12, 0.0  ;;  %v1469_v21 = vunpack.c.h.bf16 %v1506_v63  ;;  %v214_v22 = vmul.f32 %v1468_v13, %v1659_v3 }
  0x3e   :  { %1600 = vmatmul.mubr.msk.bf16.gmra.mrb[20].mxu1 %vm410_vm0, %v382_v15  ;;  %v348_v23 = vmax.f32 %v284_v16, 0.0  ;;  %v253_v24 = vadd.f32 %v1673_v9, %v182_v17  ;;  %v254_v25 = vadd.f32 %v1673_v9, %v183_v18  ;;  %v1408_v26 = vunpack.c.l.bf16 %v1491_v14 }
  0x3f   :  { %v367_v28 = vpack.c.bf16 %v316_v19, %v315_v11  ;;  %v215_v29 = vmul.f32 %v1469_v21, %v1659_v3  ;;  %v285_v30 = vadd.f32 %v1673_v9, %v214_v22  ;;  %v1409_v31 = vunpack.c.h.bf16 %v1491_v14 }
  0x40   :  { %v383_v33 = vpack.c.bf16 %v348_v23, %v347_v20  ;;  %v317_v34 = vmax.f32 %v253_v24, 0.0  ;;  %v318_v35 = vmax.f32 %v254_v25, 0.0  ;;  %v184_v36 = vmul.f32 %v1408_v26, %v1659_v3 }
  0x41   :  { %1571 = vmatprep.mubr.msk.bf16.mxu0 %vm410_vm0, %v367_v28  ;;  %v286_v37 = vadd.f32 %v1673_v9, %v215_v29  ;;  %v349_v38 = vmax.f32 %v285_v30, 0.0  ;;  %v185_v39 = vmul.f32 %v1409_v31, %v1659_v3  ;;  %v1472_v40 = vunpack.c.l.bf16 %v1507_v27 }
  0x42   :  { %1603 = vmatprep.mubr.msk.bf16.mxu1 %vm410_vm0, %v383_v33  ;;  %v368_v42 = vpack.c.bf16 %v318_v35, %v317_v34  ;;  %v255_v43 = vadd.f32 %v1673_v9, %v184_v36  ;;  %v1473_v44 = vunpack.c.h.bf16 %v1507_v27  ;;  %v1412_v45 = vunpack.c.l.bf16 %v1492_v32 }
  0x43   :  { %v350_v46 = vmax.f32 %v286_v37, 0.0  ;;  %v256_v47 = vadd.f32 %v1673_v9, %v185_v39  ;;  %v216_v48 = vmul.f32 %v1472_v40, %v1659_v3  ;;  %v1413_v49 = vunpack.c.h.bf16 %v1492_v32 }
  0x44   :  { %1572 = vmatmul.mubr.msk.bf16.gmra.mrb[24].mxu0 %vm410_vm0, %v368_v42  ;;  %v319_v50 = vmax.f32 %v255_v43, 0.0  ;;  %v217_v51 = vmul.f32 %v1473_v44, %v1659_v3  ;;  %v186_v52 = vmul.f32 %v1412_v45, %v1659_v3  ;;  %v1476_v53 = vunpack.c.l.bf16 %v1508_v41 }
  0x45   :  { %v384_v54 = vpack.c.bf16 %v350_v46, %v349_v38  ;;  %v320_v55 = vmax.f32 %v256_v47, 0.0  ;;  %v287_v56 = vadd.f32 %v1673_v9, %v216_v48  ;;  %v187_v57 = vmul.f32 %v1413_v49, %v1659_v3 }
  0x46   :  { %v288_v58 = vadd.f32 %v1673_v9, %v217_v51  ;;  %v257_v59 = vadd.f32 %v1673_v9, %v186_v52  ;;  %v1477_v60 = vunpack.c.h.bf16 %v1508_v41  ;;  %v218_v61 = vmul.f32 %v1476_v53, %v1659_v3 }
  0x47   :  { %1604 = vmatmul.mubr.msk.bf16.gmra.mrb[24].mxu1 %vm410_vm0, %v384_v54  ;;  %v369_v62 = vpack.c.bf16 %v320_v55, %v319_v50  ;;  %v351_v63 = vmax.f32 %v287_v56, 0.0  ;;  %v258_v0 = vadd.f32 %v1673_v9, %v187_v57 }
  0x48   :  { %v352_v1 = vmax.f32 %v288_v58, 0.0  ;;  %v321_v2 = vmax.f32 %v257_v59, 0.0  ;;  %v219_v4 = vmul.f32 %v1477_v60, %v1659_v3  ;;  %v289_v5 = vadd.f32 %v1673_v9, %v218_v61  ;;  %v1922_v3 = vld [vmem:[%s2248_s4] ss:$0 sm:$0xff] }
  0x49   :  { %1575 = vmatprep.mubr.msk.bf16.mxu0 %vm410_vm0, %v369_v62  ;;  %v322_v6 = vmax.f32 %v258_v0, 0.0 }
  0x4a   :  { %v385_v7 = vpack.c.bf16 %v352_v1, %v351_v63  ;;  %v290_v8 = vadd.f32 %v1673_v9, %v219_v4  ;;  %v353_v10 = vmax.f32 %v289_v5, 0.0 }
  0x4b   :  { %v370_v11 = vpack.c.bf16 %v322_v6, %v321_v2 }
  0x4c   :  { %1607 = vmatprep.mubr.msk.bf16.mxu1 %vm410_vm0, %v385_v7  ;;  %v354_v12 = vmax.f32 %v290_v8, 0.0 }
  0x4d   :  { %1576 = vmatmul.mubr.msk.bf16.gmra.mrb[28].mxu0 %vm410_vm0, %v370_v11 }
  0x4e   :  { %v386_v13 = vpack.c.bf16 %v354_v12, %v353_v10 }
  0x50   :  { %1608 = vmatmul.mubr.msk.bf16.gmra.mrb[28].mxu1 %vm410_vm0, %v386_v13 }
  0xe2   :  { %v1549_v14 = vpop.f32.mrb[0].mxu0 }
  0xe3   :  { %v550_v15 = vadd.f32 %v1549_v14, %v1922_v3  ;;  %v541_v16 = vpop.f32.mrb[1].mxu0  ;;  %v1581_v19 = vpop.f32.mrb[0].mxu1 }
  0xe4   :  { %v542_v9 = vadd.f32 %v1922_v3, %v541_v16  ;;  %v1550_v17 = vpop.f32.mrb[2].mxu0  ;;  %v678_v22 = vadd.f32 %v1581_v19, %v1922_v3  ;;  %v669_v24 = vpop.f32.mrb[1].mxu1 }
  0xe5   :  { %v798_v18 = vmax.f32 %v550_v15, 0.0  ;;  %v553_v20 = vadd.f32 %v1550_v17, %v1922_v3  ;;  %v544_v21 = vpop.f32.mrb[3].mxu0  ;;  %v670_v27 = vadd.f32 %v1922_v3, %v669_v24  ;;  %v1582_v29 = vpop.f32.mrb[2].mxu1 }
  0xe6   :  { %v796_v23 = vmax.f32 %v542_v9, 0.0  ;;  %v545_v25 = vadd.f32 %v1922_v3, %v544_v21  ;;  %v830_v30 = vmax.f32 %v678_v22, 0.0  ;;  %v681_v32 = vadd.f32 %v1582_v29, %v1922_v3  ;;  %v672_v34 = vpop.f32.mrb[3].mxu1 }
  0xe7   :  { %v1288_v26 = vpack.c.bf16 %v798_v18, %v798_v18  ;;  %v799_v28 = vmax.f32 %v553_v20, 0.0  ;;  %v828_v35 = vmax.f32 %v670_v27, 0.0  ;;  %v673_v37 = vadd.f32 %v1922_v3, %v672_v34 }
  0xe8   :  { %v1286_v31 = vpack.c.bf16 %v796_v23, %v796_v23  ;;  %v797_v33 = vmax.f32 %v545_v25, 0.0  ;;  %v1320_v38 = vpack.c.bf16 %v830_v30, %v830_v30  ;;  %v831_v39 = vmax.f32 %v681_v32, 0.0 }
  0xe9   :  { %1119 = vst.msk [vmem:[%s2249_s5 + $0x8] sm:$0xf] %vm1116_vm1, %v1288_v26  ;;  %v1289_v36 = vpack.c.bf16 %v799_v28, %v799_v28  ;;  %v1318_v41 = vpack.c.bf16 %v828_v35, %v828_v35  ;;  %v829_v42 = vmax.f32 %v673_v37, 0.0 }
  0xea   :  { %1117 = vst.msk [vmem:[%s2249_s5] sm:$0xf] %vm1116_vm1, %v1286_v31  ;;  %v1287_v40 = vpack.c.bf16 %v797_v33, %v797_v33  ;;  %1151 = vst.msk [vmem:[%s2249_s5 + $0x88] sm:$0xf] %vm1116_vm1, %v1320_v38  ;;  %v1321_v43 = vpack.c.bf16 %v831_v39, %v831_v39  ;;  %v1553_v44 = vpop.f32.mrb[4].mxu0 }
  0xeb   :  { %1120 = vst.msk [vmem:[%s2249_s5 + $0xc] sm:$0xf] %vm1116_vm1, %v1289_v36  ;;  %1149 = vst.msk [vmem:[%s2249_s5 + $0x80] sm:$0xf] %vm1116_vm1, %v1318_v41  ;;  %v1319_v45 = vpack.c.bf16 %v829_v42, %v829_v42  ;;  %v566_v46 = vadd.f32 %v1553_v44, %v1922_v3  ;;  %v557_v47 = vpop.f32.mrb[5].mxu0 }
  0xec   :  { %1118 = vst.msk [vmem:[%s2249_s5 + $0x4] sm:$0xf] %vm1116_vm1, %v1287_v40  ;;  %1152 = vst.msk [vmem:[%s2249_s5 + $0x8c] sm:$0xf] %vm1116_vm1, %v1321_v43  ;;  %v1585_v48 = vpop.f32.mrb[4].mxu1  ;;  %v558_v49 = vadd.f32 %v1922_v3, %v557_v47  ;;  %v1554_v50 = vpop.f32.mrb[6].mxu0 }
  0xed   :  { %1150 = vst.msk [vmem:[%s2249_s5 + $0x84] sm:$0xf] %vm1116_vm1, %v1319_v45  ;;  %v802_v51 = vmax.f32 %v566_v46, 0.0  ;;  %v694_v52 = vadd.f32 %v1585_v48, %v1922_v3  ;;  %v685_v53 = vpop.f32.mrb[5].mxu1  ;;  %v569_v54 = vadd.f32 %v1554_v50, %v1922_v3  ;;  %v560_v55 = vpop.f32.mrb[7].mxu0 }
  0xee   :  { %v800_v56 = vmax.f32 %v558_v49, 0.0  ;;  %v686_v57 = vadd.f32 %v1922_v3, %v685_v53  ;;  %v1586_v58 = vpop.f32.mrb[6].mxu1  ;;  %v561_v59 = vadd.f32 %v1922_v3, %v560_v55 }
  0xef   :  { %v1292_v60 = vpack.c.bf16 %v802_v51, %v802_v51  ;;  %v834_v61 = vmax.f32 %v694_v52, 0.0  ;;  %v803_v62 = vmax.f32 %v569_v54, 0.0  ;;  %v697_v63 = vadd.f32 %v1586_v58, %v1922_v3  ;;  %v688_v0 = vpop.f32.mrb[7].mxu1 }
  0xf0   :  { %v1290_v1 = vpack.c.bf16 %v800_v56, %v800_v56  ;;  %v832_v2 = vmax.f32 %v686_v57, 0.0  ;;  %v801_v4 = vmax.f32 %v561_v59, 0.0  ;;  %v689_v5 = vadd.f32 %v1922_v3, %v688_v0 }
  0xf1   :  { %1123 = vst.msk [vmem:[%s2249_s5 + $0x18] sm:$0xf] %vm1116_vm1, %v1292_v60  ;;  %v1324_v6 = vpack.c.bf16 %v834_v61, %v834_v61  ;;  %v1293_v7 = vpack.c.bf16 %v803_v62, %v803_v62  ;;  %v835_v8 = vmax.f32 %v697_v63, 0.0 }
  0xf2   :  { %1121 = vst.msk [vmem:[%s2249_s5 + $0x10] sm:$0xf] %vm1116_vm1, %v1290_v1  ;;  %v1322_v10 = vpack.c.bf16 %v832_v2, %v832_v2  ;;  %v1291_v11 = vpack.c.bf16 %v801_v4, %v801_v4  ;;  %v833_v12 = vmax.f32 %v689_v5, 0.0 }
  0xf3   :  { %1155 = vst.msk [vmem:[%s2249_s5 + $0x98] sm:$0xf] %vm1116_vm1, %v1324_v6  ;;  %1124 = vst.msk [vmem:[%s2249_s5 + $0x1c] sm:$0xf] %vm1116_vm1, %v1293_v7  ;;  %v1325_v13 = vpack.c.bf16 %v835_v8, %v835_v8  ;;  %v1557_v14 = vpop.f32.mrb[8].mxu0 }
  0xf4   :  { %1153 = vst.msk [vmem:[%s2249_s5 + $0x90] sm:$0xf] %vm1116_vm1, %v1322_v10  ;;  %1122 = vst.msk [vmem:[%s2249_s5 + $0x14] sm:$0xf] %vm1116_vm1, %v1291_v11  ;;  %v1323_v15 = vpack.c.bf16 %v833_v12, %v833_v12  ;;  %v582_v16 = vadd.f32 %v1557_v14, %v1922_v3  ;;  %v573_v9 = vpop.f32.mrb[9].mxu0 }
  0xf5   :  { %1156 = vst.msk [vmem:[%s2249_s5 + $0x9c] sm:$0xf] %vm1116_vm1, %v1325_v13  ;;  %v574_v17 = vadd.f32 %v1922_v3, %v573_v9  ;;  %v1558_v18 = vpop.f32.mrb[10].mxu0 }
  0xf6   :  { %1154 = vst.msk [vmem:[%s2249_s5 + $0x94] sm:$0xf] %vm1116_vm1, %v1323_v15  ;;  %v806_v19 = vmax.f32 %v582_v16, 0.0  ;;  %v1589_v20 = vpop.f32.mrb[8].mxu1  ;;  %v585_v21 = vadd.f32 %v1558_v18, %v1922_v3  ;;  %v576_v22 = vpop.f32.mrb[11].mxu0 }
  0xf7   :  { %v710_v23 = vadd.f32 %v1589_v20, %v1922_v3  ;;  %v804_v24 = vmax.f32 %v574_v17, 0.0  ;;  %v701_v25 = vpop.f32.mrb[9].mxu1  ;;  %v577_v26 = vadd.f32 %v1922_v3, %v576_v22 }
  0xf8   :  { %v1296_v27 = vpack.c.bf16 %v806_v19, %v806_v19  ;;  %v702_v28 = vadd.f32 %v1922_v3, %v701_v25  ;;  %v807_v29 = vmax.f32 %v585_v21, 0.0  ;;  %v1590_v30 = vpop.f32.mrb[10].mxu1 }
  0xf9   :  { %v838_v31 = vmax.f32 %v710_v23, 0.0  ;;  %v1294_v32 = vpack.c.bf16 %v804_v24, %v804_v24  ;;  %v713_v33 = vadd.f32 %v1590_v30, %v1922_v3  ;;  %v805_v34 = vmax.f32 %v577_v26, 0.0  ;;  %v704_v35 = vpop.f32.mrb[11].mxu1 }
  0xfa   :  { %1127 = vst.msk [vmem:[%s2249_s5 + $0x28] sm:$0xf] %vm1116_vm1, %v1296_v27  ;;  %v836_v36 = vmax.f32 %v702_v28, 0.0  ;;  %v1297_v37 = vpack.c.bf16 %v807_v29, %v807_v29  ;;  %v705_v38 = vadd.f32 %v1922_v3, %v704_v35 }
  0xfb   :  { %v1328_v39 = vpack.c.bf16 %v838_v31, %v838_v31  ;;  %1125 = vst.msk [vmem:[%s2249_s5 + $0x20] sm:$0xf] %vm1116_vm1, %v1294_v32  ;;  %v839_v40 = vmax.f32 %v713_v33, 0.0  ;;  %v1295_v41 = vpack.c.bf16 %v805_v34, %v805_v34 }
  0xfc   :  { %v1326_v42 = vpack.c.bf16 %v836_v36, %v836_v36  ;;  %1128 = vst.msk [vmem:[%s2249_s5 + $0x2c] sm:$0xf] %vm1116_vm1, %v1297_v37  ;;  %v837_v43 = vmax.f32 %v705_v38, 0.0  ;;  %v1561_v44 = vpop.f32.mrb[12].mxu0 }
  0xfd   :  { %1159 = vst.msk [vmem:[%s2249_s5 + $0xa8] sm:$0xf] %vm1116_vm1, %v1328_v39  ;;  %v1329_v45 = vpack.c.bf16 %v839_v40, %v839_v40  ;;  %1126 = vst.msk [vmem:[%s2249_s5 + $0x24] sm:$0xf] %vm1116_vm1, %v1295_v41  ;;  %v598_v46 = vadd.f32 %v1561_v44, %v1922_v3  ;;  %v589_v47 = vpop.f32.mrb[13].mxu0 }
  0xfe   :  { %1157 = vst.msk [vmem:[%s2249_s5 + $0xa0] sm:$0xf] %vm1116_vm1, %v1326_v42  ;;  %v1327_v48 = vpack.c.bf16 %v837_v43, %v837_v43  ;;  %v590_v49 = vadd.f32 %v1922_v3, %v589_v47  ;;  %v1562_v50 = vpop.f32.mrb[14].mxu0 }
  0xff   :  { %1160 = vst.msk [vmem:[%s2249_s5 + $0xac] sm:$0xf] %vm1116_vm1, %v1329_v45  ;;  %v810_v51 = vmax.f32 %v598_v46, 0.0  ;;  %v1593_v52 = vpop.f32.mrb[12].mxu1  ;;  %v601_v53 = vadd.f32 %v1562_v50, %v1922_v3  ;;  %v592_v54 = vpop.f32.mrb[15].mxu0 }
 0x100   :  { %1158 = vst.msk [vmem:[%s2249_s5 + $0xa4] sm:$0xf] %vm1116_vm1, %v1327_v48  ;;  %v726_v55 = vadd.f32 %v1593_v52, %v1922_v3  ;;  %v808_v56 = vmax.f32 %v590_v49, 0.0  ;;  %v717_v57 = vpop.f32.mrb[13].mxu1  ;;  %v593_v58 = vadd.f32 %v1922_v3, %v592_v54 }
 0x101   :  { %v1300_v59 = vpack.c.bf16 %v810_v51, %v810_v51  ;;  %v718_v60 = vadd.f32 %v1922_v3, %v717_v57  ;;  %v811_v61 = vmax.f32 %v601_v53, 0.0  ;;  %v1594_v62 = vpop.f32.mrb[14].mxu1 }
 0x102   :  { %v842_v63 = vmax.f32 %v726_v55, 0.0  ;;  %v1298_v0 = vpack.c.bf16 %v808_v56, %v808_v56  ;;  %v729_v1 = vadd.f32 %v1594_v62, %v1922_v3  ;;  %v809_v2 = vmax.f32 %v593_v58, 0.0  ;;  %v720_v4 = vpop.f32.mrb[15].mxu1 }
 0x103   :  { %1131 = vst.msk [vmem:[%s2249_s5 + $0x38] sm:$0xf] %vm1116_vm1, %v1300_v59  ;;  %v840_v5 = vmax.f32 %v718_v60, 0.0  ;;  %v1301_v6 = vpack.c.bf16 %v811_v61, %v811_v61  ;;  %v721_v7 = vadd.f32 %v1922_v3, %v720_v4 }
 0x104   :  { %v1332_v8 = vpack.c.bf16 %v842_v63, %v842_v63  ;;  %1129 = vst.msk [vmem:[%s2249_s5 + $0x30] sm:$0xf] %vm1116_vm1, %v1298_v0  ;;  %v843_v10 = vmax.f32 %v729_v1, 0.0  ;;  %v1299_v11 = vpack.c.bf16 %v809_v2, %v809_v2 }
 0x105   :  { %v1330_v12 = vpack.c.bf16 %v840_v5, %v840_v5  ;;  %1132 = vst.msk [vmem:[%s2249_s5 + $0x3c] sm:$0xf] %vm1116_vm1, %v1301_v6  ;;  %v841_v13 = vmax.f32 %v721_v7, 0.0  ;;  %v1565_v14 = vpop.f32.mrb[16].mxu0 }
 0x106   :  { %1163 = vst.msk [vmem:[%s2249_s5 + $0xb8] sm:$0xf] %vm1116_vm1, %v1332_v8  ;;  %v1333_v15 = vpack.c.bf16 %v843_v10, %v843_v10  ;;  %1130 = vst.msk [vmem:[%s2249_s5 + $0x34] sm:$0xf] %vm1116_vm1, %v1299_v11  ;;  %v614_v16 = vadd.f32 %v1565_v14, %v1922_v3  ;;  %v605_v9 = vpop.f32.mrb[17].mxu0 }
 0x107   :  { %1161 = vst.msk [vmem:[%s2249_s5 + $0xb0] sm:$0xf] %vm1116_vm1, %v1330_v12  ;;  %v1331_v17 = vpack.c.bf16 %v841_v13, %v841_v13  ;;  %v606_v18 = vadd.f32 %v1922_v3, %v605_v9  ;;  %v1566_v19 = vpop.f32.mrb[18].mxu0 }
 0x108   :  { %1164 = vst.msk [vmem:[%s2249_s5 + $0xbc] sm:$0xf] %vm1116_vm1, %v1333_v15  ;;  %v814_v20 = vmax.f32 %v614_v16, 0.0  ;;  %v1597_v21 = vpop.f32.mrb[16].mxu1  ;;  %v617_v22 = vadd.f32 %v1566_v19, %v1922_v3  ;;  %v608_v23 = vpop.f32.mrb[19].mxu0 }
 0x109   :  { %1162 = vst.msk [vmem:[%s2249_s5 + $0xb4] sm:$0xf] %vm1116_vm1, %v1331_v17  ;;  %v742_v24 = vadd.f32 %v1597_v21, %v1922_v3  ;;  %v812_v25 = vmax.f32 %v606_v18, 0.0  ;;  %v733_v26 = vpop.f32.mrb[17].mxu1  ;;  %v609_v27 = vadd.f32 %v1922_v3, %v608_v23 }
 0x10a   :  { %v1304_v28 = vpack.c.bf16 %v814_v20, %v814_v20  ;;  %v734_v29 = vadd.f32 %v1922_v3, %v733_v26  ;;  %v815_v30 = vmax.f32 %v617_v22, 0.0  ;;  %v1598_v31 = vpop.f32.mrb[18].mxu1 }
 0x10b   :  { %v846_v32 = vmax.f32 %v742_v24, 0.0  ;;  %v1302_v33 = vpack.c.bf16 %v812_v25, %v812_v25  ;;  %v745_v34 = vadd.f32 %v1598_v31, %v1922_v3  ;;  %v813_v35 = vmax.f32 %v609_v27, 0.0  ;;  %v736_v36 = vpop.f32.mrb[19].mxu1 }
 0x10c   :  { %1135 = vst.msk [vmem:[%s2249_s5 + $0x48] sm:$0xf] %vm1116_vm1, %v1304_v28  ;;  %v844_v37 = vmax.f32 %v734_v29, 0.0  ;;  %v1305_v38 = vpack.c.bf16 %v815_v30, %v815_v30  ;;  %v737_v39 = vadd.f32 %v1922_v3, %v736_v36 }
 0x10d   :  { %v1336_v40 = vpack.c.bf16 %v846_v32, %v846_v32  ;;  %1133 = vst.msk [vmem:[%s2249_s5 + $0x40] sm:$0xf] %vm1116_vm1, %v1302_v33  ;;  %v847_v41 = vmax.f32 %v745_v34, 0.0  ;;  %v1303_v42 = vpack.c.bf16 %v813_v35, %v813_v35 }
 0x10e   :  { %v1334_v43 = vpack.c.bf16 %v844_v37, %v844_v37  ;;  %1136 = vst.msk [vmem:[%s2249_s5 + $0x4c] sm:$0xf] %vm1116_vm1, %v1305_v38  ;;  %v845_v44 = vmax.f32 %v737_v39, 0.0  ;;  %v1569_v45 = vpop.f32.mrb[20].mxu0 }
 0x10f   :  { %1167 = vst.msk [vmem:[%s2249_s5 + $0xc8] sm:$0xf] %vm1116_vm1, %v1336_v40  ;;  %v1337_v46 = vpack.c.bf16 %v847_v41, %v847_v41  ;;  %1134 = vst.msk [vmem:[%s2249_s5 + $0x44] sm:$0xf] %vm1116_vm1, %v1303_v42  ;;  %v630_v47 = vadd.f32 %v1569_v45, %v1922_v3  ;;  %v621_v48 = vpop.f32.mrb[21].mxu0 }
 0x110   :  { %1165 = vst.msk [vmem:[%s2249_s5 + $0xc0] sm:$0xf] %vm1116_vm1, %v1334_v43  ;;  %v1335_v49 = vpack.c.bf16 %v845_v44, %v845_v44  ;;  %v622_v50 = vadd.f32 %v1922_v3, %v621_v48  ;;  %v1570_v51 = vpop.f32.mrb[22].mxu0 }
 0x111   :  { %1168 = vst.msk [vmem:[%s2249_s5 + $0xcc] sm:$0xf] %vm1116_vm1, %v1337_v46  ;;  %v818_v52 = vmax.f32 %v630_v47, 0.0  ;;  %v1601_v53 = vpop.f32.mrb[20].mxu1  ;;  %v633_v54 = vadd.f32 %v1570_v51, %v1922_v3  ;;  %v624_v55 = vpop.f32.mrb[23].mxu0 }
 0x112   :  { %1166 = vst.msk [vmem:[%s2249_s5 + $0xc4] sm:$0xf] %vm1116_vm1, %v1335_v49  ;;  %v758_v56 = vadd.f32 %v1601_v53, %v1922_v3  ;;  %v816_v57 = vmax.f32 %v622_v50, 0.0  ;;  %v749_v58 = vpop.f32.mrb[21].mxu1  ;;  %v625_v59 = vadd.f32 %v1922_v3, %v624_v55 }
 0x113   :  { %v1308_v60 = vpack.c.bf16 %v818_v52, %v818_v52  ;;  %v750_v61 = vadd.f32 %v1922_v3, %v749_v58  ;;  %v819_v62 = vmax.f32 %v633_v54, 0.0  ;;  %v1602_v63 = vpop.f32.mrb[22].mxu1 }
 0x114   :  { %v850_v0 = vmax.f32 %v758_v56, 0.0  ;;  %v1306_v1 = vpack.c.bf16 %v816_v57, %v816_v57  ;;  %v761_v2 = vadd.f32 %v1602_v63, %v1922_v3  ;;  %v817_v4 = vmax.f32 %v625_v59, 0.0  ;;  %v752_v5 = vpop.f32.mrb[23].mxu1 }
 0x115   :  { %1139 = vst.msk [vmem:[%s2249_s5 + $0x58] sm:$0xf] %vm1116_vm1, %v1308_v60  ;;  %v848_v6 = vmax.f32 %v750_v61, 0.0  ;;  %v1309_v7 = vpack.c.bf16 %v819_v62, %v819_v62  ;;  %v753_v8 = vadd.f32 %v1922_v3, %v752_v5 }
 0x116   :  { %v1340_v10 = vpack.c.bf16 %v850_v0, %v850_v0  ;;  %1137 = vst.msk [vmem:[%s2249_s5 + $0x50] sm:$0xf] %vm1116_vm1, %v1306_v1  ;;  %v851_v11 = vmax.f32 %v761_v2, 0.0  ;;  %v1307_v12 = vpack.c.bf16 %v817_v4, %v817_v4 }
 0x117   :  { %v1338_v13 = vpack.c.bf16 %v848_v6, %v848_v6  ;;  %1140 = vst.msk [vmem:[%s2249_s5 + $0x5c] sm:$0xf] %vm1116_vm1, %v1309_v7  ;;  %v849_v14 = vmax.f32 %v753_v8, 0.0  ;;  %v1573_v15 = vpop.f32.mrb[24].mxu0 }
 0x118   :  { %1171 = vst.msk [vmem:[%s2249_s5 + $0xd8] sm:$0xf] %vm1116_vm1, %v1340_v10  ;;  %v1341_v16 = vpack.c.bf16 %v851_v11, %v851_v11  ;;  %1138 = vst.msk [vmem:[%s2249_s5 + $0x54] sm:$0xf] %vm1116_vm1, %v1307_v12  ;;  %v646_v9 = vadd.f32 %v1573_v15, %v1922_v3  ;;  %v637_v17 = vpop.f32.mrb[25].mxu0 }
 0x119   :  { %1169 = vst.msk [vmem:[%s2249_s5 + $0xd0] sm:$0xf] %vm1116_vm1, %v1338_v13  ;;  %v1339_v18 = vpack.c.bf16 %v849_v14, %v849_v14  ;;  %v638_v19 = vadd.f32 %v1922_v3, %v637_v17  ;;  %v1574_v20 = vpop.f32.mrb[26].mxu0 }
 0x11a   :  { %1172 = vst.msk [vmem:[%s2249_s5 + $0xdc] sm:$0xf] %vm1116_vm1, %v1341_v16  ;;  %v822_v21 = vmax.f32 %v646_v9, 0.0  ;;  %v1605_v22 = vpop.f32.mrb[24].mxu1  ;;  %v649_v23 = vadd.f32 %v1574_v20, %v1922_v3  ;;  %v640_v24 = vpop.f32.mrb[27].mxu0 }
 0x11b   :  { %1170 = vst.msk [vmem:[%s2249_s5 + $0xd4] sm:$0xf] %vm1116_vm1, %v1339_v18  ;;  %v774_v25 = vadd.f32 %v1605_v22, %v1922_v3  ;;  %v820_v26 = vmax.f32 %v638_v19, 0.0  ;;  %v765_v27 = vpop.f32.mrb[25].mxu1  ;;  %v641_v28 = vadd.f32 %v1922_v3, %v640_v24 }
 0x11c   :  { %v1312_v29 = vpack.c.bf16 %v822_v21, %v822_v21  ;;  %v766_v30 = vadd.f32 %v1922_v3, %v765_v27  ;;  %v823_v31 = vmax.f32 %v649_v23, 0.0  ;;  %v1606_v32 = vpop.f32.mrb[26].mxu1 }
 0x11d   :  { %v854_v33 = vmax.f32 %v774_v25, 0.0  ;;  %v1310_v34 = vpack.c.bf16 %v820_v26, %v820_v26  ;;  %v777_v35 = vadd.f32 %v1606_v32, %v1922_v3  ;;  %v821_v36 = vmax.f32 %v641_v28, 0.0  ;;  %v768_v37 = vpop.f32.mrb[27].mxu1 }
 0x11e   :  { %1143 = vst.msk [vmem:[%s2249_s5 + $0x68] sm:$0xf] %vm1116_vm1, %v1312_v29  ;;  %v852_v38 = vmax.f32 %v766_v30, 0.0  ;;  %v1313_v39 = vpack.c.bf16 %v823_v31, %v823_v31  ;;  %v769_v40 = vadd.f32 %v1922_v3, %v768_v37 }
 0x11f   :  { %v1344_v41 = vpack.c.bf16 %v854_v33, %v854_v33  ;;  %1141 = vst.msk [vmem:[%s2249_s5 + $0x60] sm:$0xf] %vm1116_vm1, %v1310_v34  ;;  %v855_v42 = vmax.f32 %v777_v35, 0.0  ;;  %v1311_v43 = vpack.c.bf16 %v821_v36, %v821_v36 }
 0x120   :  { %v1342_v44 = vpack.c.bf16 %v852_v38, %v852_v38  ;;  %1144 = vst.msk [vmem:[%s2249_s5 + $0x6c] sm:$0xf] %vm1116_vm1, %v1313_v39  ;;  %v853_v45 = vmax.f32 %v769_v40, 0.0  ;;  %v1577_v46 = vpop.f32.mrb[28].mxu0 }
 0x121   :  { %1175 = vst.msk [vmem:[%s2249_s5 + $0xe8] sm:$0xf] %vm1116_vm1, %v1344_v41  ;;  %v1345_v47 = vpack.c.bf16 %v855_v42, %v855_v42  ;;  %1142 = vst.msk [vmem:[%s2249_s5 + $0x64] sm:$0xf] %vm1116_vm1, %v1311_v43  ;;  %v662_v48 = vadd.f32 %v1577_v46, %v1922_v3  ;;  %v653_v49 = vpop.f32.mrb[29].mxu0 }
 0x122   :  { %1173 = vst.msk [vmem:[%s2249_s5 + $0xe0] sm:$0xf] %vm1116_vm1, %v1342_v44  ;;  %v1343_v50 = vpack.c.bf16 %v853_v45, %v853_v45  ;;  %v654_v51 = vadd.f32 %v1922_v3, %v653_v49  ;;  %v1578_v52 = vpop.f32.mrb[30].mxu0 }
 0x123   :  { %1176 = vst.msk [vmem:[%s2249_s5 + $0xec] sm:$0xf] %vm1116_vm1, %v1345_v47  ;;  %v826_v53 = vmax.f32 %v662_v48, 0.0  ;;  %v1609_v54 = vpop.f32.mrb[28].mxu1  ;;  %v665_v55 = vadd.f32 %v1578_v52, %v1922_v3  ;;  %v656_v56 = vpop.f32.mrb[31].mxu0 }
 0x124   :  { %1174 = vst.msk [vmem:[%s2249_s5 + $0xe4] sm:$0xf] %vm1116_vm1, %v1343_v50  ;;  %v790_v57 = vadd.f32 %v1609_v54, %v1922_v3  ;;  %v824_v58 = vmax.f32 %v654_v51, 0.0  ;;  %v781_v59 = vpop.f32.mrb[29].mxu1  ;;  %v657_v60 = vadd.f32 %v1922_v3, %v656_v56 }
 0x125   :  { %v1316_v61 = vpack.c.bf16 %v826_v53, %v826_v53  ;;  %v782_v62 = vadd.f32 %v1922_v3, %v781_v59  ;;  %v827_v63 = vmax.f32 %v665_v55, 0.0  ;;  %v1610_v0 = vpop.f32.mrb[30].mxu1 }
 0x126   :  { %v858_v1 = vmax.f32 %v790_v57, 0.0  ;;  %v1314_v2 = vpack.c.bf16 %v824_v58, %v824_v58  ;;  %v793_v4 = vadd.f32 %v1610_v0, %v1922_v3  ;;  %v825_v5 = vmax.f32 %v657_v60, 0.0  ;;  %v784_v6 = vpop.f32.mrb[31].mxu1 }
 0x127   :  { %1147 = vst.msk [vmem:[%s2249_s5 + $0x78] sm:$0xf] %vm1116_vm1, %v1316_v61  ;;  %v856_v7 = vmax.f32 %v782_v62, 0.0  ;;  %v1317_v8 = vpack.c.bf16 %v827_v63, %v827_v63  ;;  %v785_v10 = vadd.f32 %v1922_v3, %v784_v6 }
 0x128   :  { %v1348_v11 = vpack.c.bf16 %v858_v1, %v858_v1  ;;  %1145 = vst.msk [vmem:[%s2249_s5 + $0x70] sm:$0xf] %vm1116_vm1, %v1314_v2  ;;  %v859_v12 = vmax.f32 %v793_v4, 0.0  ;;  %v1315_v13 = vpack.c.bf16 %v825_v5, %v825_v5 }
 0x129   :  { %v1346_v14 = vpack.c.bf16 %v856_v7, %v856_v7  ;;  %1148 = vst.msk [vmem:[%s2249_s5 + $0x7c] sm:$0xf] %vm1116_vm1, %v1317_v8  ;;  %v857_v15 = vmax.f32 %v785_v10, 0.0 }
 0x12a   :  { %1179 = vst.msk [vmem:[%s2249_s5 + $0xf8] sm:$0xf] %vm1116_vm1, %v1348_v11  ;;  %v1349_v3 = vpack.c.bf16 %v859_v12, %v859_v12  ;;  %1146 = vst.msk [vmem:[%s2249_s5 + $0x74] sm:$0xf] %vm1116_vm1, %v1315_v13 }
 0x12b   :  { %1177 = vst.msk [vmem:[%s2249_s5 + $0xf0] sm:$0xf] %vm1116_vm1, %v1346_v14  ;;  %v1347_v16 = vpack.c.bf16 %v857_v15, %v857_v15 }
 0x12c   :  { %1180 = vst.msk [vmem:[%s2249_s5 + $0xfc] sm:$0xf] %vm1116_vm1, %v1349_v3 }
 0x12d   :  { %1178 = vst.msk [vmem:[%s2249_s5 + $0xf4] sm:$0xf] %vm1116_vm1, %v1347_v16 }

// kernel: _lambda_.3
= control target key start
LH: loop header
LB: loop body
LE: loop exit
PB: predicated region body
PF: predicated region fallthrough
CT: control target
= control target key end

     0   :  { %s6623_s9 = smov 0   ;;  %s7714_s0 = inlined_call_operand.vmem [shape: bf16[2,326,32], index: 0, kind: input, shape index: {}]   ;;  %s7715_s1 = inlined_call_operand.vmem [shape: bf16[3,3,32,8], index: 1, kind: input, shape index: {}]   ;;  %s7716_s2 = inlined_call_operand.vmem [shape: bf16[2,288,8], index: 2, kind: output, shape index: {}]  }
   0x1 LB: > { %s5395_s10 = sadd.s32 4294967295, %s6606_s9   ;;  %p5399_p0 = scmp.ge.s32.totalorder %s6606_s9, 1  ;;  %s6606_s9 = sphi %s6623_s9, %s12_s9  }
   0x2   : > { %p112_p1 = scmp.lt.s32.totalorder %s6606_s9, 3 }
   0x4   : > { %p113_p2 = pnand %p5399_p0, %p112_p1 }
   0x5   : > { %v6412_v0 = vld [vmem:[%s7715_s1] sm:$0xff] (!%p113_p2)   ;;  %p134_p3 = scmp.lt.s32.totalorder (!%p113_p2), %s5395_s10, 1  ;;  %v6413_v1 = vld [vmem:[%s7715_s1 + $0x8] sm:$0xff] (!%p113_p2)   ;;  %v6418_v2 = vld [vmem:[%s7715_s1 + $0x10] sm:$0xff] (!%p113_p2)   ;;  %vm287_vm0 = vcmask (!%p113_p2), 261120   ;;  %vm1326_vm2 = vcmask (!%p113_p2), 1046528  }
   0x6   : > { %116 = sbr.rel (%p113_p2) target bundleno = 571 (0x23b), region = 28  ;;  %6038 = vmatprep.subr.bf16.mxu0 (!%p113_p2), %v6412_v0  ;;  %6398 = vmatprep.subr.bf16.mxu1 (!%p113_p2), %v6412_v0  ;;  %v6419_v3 = vld [vmem:[%s7715_s1 + $0x20] sm:$0xff] (!%p113_p2)   ;;  %v6428_v6 = vld [vmem:[%s7715_s1 + $0x18] sm:$0xff] (!%p113_p2)   ;;  %v6429_v8 = vld [vmem:[%s7715_s1 + $0x28] sm:$0xff] (!%p113_p2)   ;;  %vm691_vm1 = vsmask.f32 (!%p113_p2), 7424 }
   0x7   : > { %6039 = vmatpush3.bf16.msra.mxu0 (!%p113_p2), %v6412_v0  ;;  %6400 = vmatpush3.bf16.msra.mxu1 (!%p113_p2), %v6412_v0  ;;  %v6439_v26 = vld [vmem:[%s7715_s1 + $0x30] sm:$0xff] (!%p113_p2)   ;;  %v6445_v43 = vld [vmem:[%s7715_s1 + $0x40] sm:$0xff] (!%p113_p2)   ;;  %vm2373_vm3 = vsmask.f32 (!%p113_p2), 6400  ;;  %vm3030_vm4 = vcmask (!%p113_p2), 1045504   ;;  %vm519_vm5 = vcmask (!%p113_p2), 64512  }
   0x8   : > { %6040 = vmatprep.subr.bf16.mxu0 (!%p113_p2), %v6413_v1  ;;  %6399 = vmatprep.subr.bf16.mxu1 (!%p113_p2), %v6413_v1  ;;  %vm4077_vm6 = vsmask.f32 (!%p113_p2), 5376  ;;  %vm4734_vm7 = vcmask (!%p113_p2), 1044480   ;;  %vm5303_vm8 = vcmask (!%p113_p2), 60416  }
   0xb   : > { %6041 = vmatpush3.bf16.msra.mxu0 (!%p113_p2), %v6413_v1  ;;  %6401 = vmatpush3.bf16.msra.mxu1 (!%p113_p2), %v6413_v1 }
   0xc   : > { %6078 = vmatprep.subr.bf16.mxu1 (!%p113_p2), %v6418_v2  ;;  %6118 = vmatprep.subr.bf16.mxu0 (!%p113_p2), %v6419_v3 }
   0xd   : > { %s7718_s10 = smov (!%p134_p3, %s5395_s10), 1 }
   0xe   : > { %s6402_s17 = smul.u32 164, %s7718_s10 }
  0x10   : > { %s6649_s22 = scalar_lea.vmem %s7714_s0, %s6402_s17 }
  0x11   : > { %v6414_v4 = vld [vmem:[%s6649_s22] sm:$0xff]   ;;  %v6415_v5 = vld [vmem:[%s6649_s22 + $0x50] sm:$0xff]   ;;  %v6416_v7 = vld [vmem:[%s6649_s22 + $0x8] sm:$0xff]  }
  0x12   : > { %6042 = vmatprep.mubr.msk.bf16.mxu0 %vm287_vm0, %v6414_v4  ;;  %6062 = vmatprep.mubr.msk.bf16.mxu1 %vm287_vm0, %v6415_v5  ;;  %v6417_v9 = vld [vmem:[%s6649_s22 + $0x58] sm:$0xff]   ;;  %v6420_v10 = vld [vmem:[%s6649_s22 + $0x10] sm:$0xff]   ;;  %v6421_v11 = vld [vmem:[%s6649_s22 + $0x60] sm:$0xff]  }
  0x13   : > { %6043 = vmatmul.mubr.msk.bf16.vlgmr.msra.gmra.mrb[0].mxu0 %vm287_vm0, %v6416_v7  ;;  %6063 = vmatmul.mubr.msk.bf16.vlgmr.msra.gmra.mrb[0].mxu1 %vm287_vm0, %v6417_v9  ;;  %v6422_v12 = vld [vmem:[%s6649_s22 + $0x18] sm:$0xff]   ;;  %v6423_v13 = vld [vmem:[%s6649_s22 + $0x68] sm:$0xff]   ;;  %v6424_v14 = vld [vmem:[%s6649_s22 + $0x20] sm:$0xff]  }
  0x14   : > { %6119 = vmatpush3.bf16.msra.mxu0 %v6419_v3  ;;  %6079 = vmatpush3.bf16.msra.mxu1 %v6418_v2  ;;  %v6425_v15 = vld [vmem:[%s6649_s22 + $0x70] sm:$0xff]   ;;  %v6426_v16 = vld [vmem:[%s6649_s22 + $0x28] sm:$0xff]   ;;  %v6427_v17 = vld [vmem:[%s6649_s22 + $0x78] sm:$0xff]  }
  0x15   : > { %6046 = vmatprep.mubr.msk.bf16.mxu0 %vm287_vm0, %v6420_v10  ;;  %6066 = vmatprep.mubr.msk.bf16.mxu1 %vm287_vm0, %v6421_v11  ;;  %v6430_v18 = vld [vmem:[%s6649_s22 + $0x30] sm:$0xff]   ;;  %v6431_v19 = vld [vmem:[%s6649_s22 + $0x80] sm:$0xff]   ;;  %v6436_v21 = vld [vmem:[%s6649_s22 + $0x8] sm:$0xff]  }
  0x16   : > { %6080 = vmatprep.subr.bf16.mxu1 %v6428_v6  ;;  %6120 = vmatprep.subr.bf16.mxu0 %v6429_v8  ;;  %v6435_v20 = vld [vmem:[%s6649_s22] sm:$0xff]   ;;  %v700_v24 = vshll.u32 %v6436_v21, 16  ;;  %v6438_v25 = vld [vmem:[%s6649_s22 + $0x10] sm:$0xff]   ;;  %v6432_v28 = vld [vmem:[%s6649_s22 + $0x38] sm:$0xff]   ;;  %v704_v34 = vshrl.u32 %v6436_v21, 16 }
  0x17   : > { %v693_v22 = vshrl.u32 %v6435_v20, 16  ;;  %v695_v23 = vshll.u32 %v6435_v20, 16  ;;  %v6440_v30 = vld [vmem:[%s6649_s22 + $0x18] sm:$0xff]   ;;  %v6433_v32 = vld [vmem:[%s6649_s22 + $0x88] sm:$0xff]   ;;  %v6434_v33 = vld [vmem:[%s6649_s22 + $0x40] sm:$0xff]   ;;  %v708_v35 = vshll.u32 %v6438_v25, 16 }
  0x18   : > { %6121 = vmatpush3.bf16.msra.mxu0 %v6429_v8  ;;  %6081 = vmatpush3.bf16.msra.mxu1 %v6428_v6  ;;  %v702_v29 = vrot.slane %v700_v24, 1  ;;  %v6442_v36 = vld [vmem:[%s6649_s22 + $0x8] sm:$0xff]   ;;  %v6441_v37 = vld [vmem:[%s6649_s22] sm:$0xfe]   ;;  %v712_v39 = vshrl.u32 %v6438_v25, 16  ;;  %v716_v40 = vshll.u32 %v6440_v30, 16 }
  0x19   : > { %v697_v27 = vrot.slane %v695_v23, 1  ;;  %6158 = vmatprep.subr.bf16.mxu1 %v6439_v26  ;;  %v6443_v41 = vld [vmem:[%s6649_s22 + $0x20] sm:$0xff]   ;;  %v710_v42 = vrot.slane %v708_v35, 1  ;;  %v1327_v45 = vrot.slane %v6441_v37, 1  ;;  %v1328_v46 = vrot.slane %v6442_v36, 1  ;;  %6198 = vmatprep.subr.bf16.mxu0 %v6445_v43  ;;  %v6446_v49 = vld [vmem:[%s6649_s22 + $0x28] sm:$0xff]  }
  0x1a   : > { %v706_v44 = vor.u32 %v704_v34, %v702_v29  ;;  %v718_v48 = vrot.slane %v716_v40, 1  ;;  %v6437_v50 = vld [vmem:[%s6649_s22 + $0x48] sm:$0xff]   ;;  %v724_v51 = vshll.u32 %v6443_v41, 16  ;;  %v6444_v52 = vld [vmem:[%s6649_s22 + $0x10] sm:$0xff]   ;;  %v720_v55 = vshrl.u32 %v6440_v30, 16  ;;  %v6447_v56 = vld [vmem:[%s6649_s22 + $0x18] sm:$0xff]  }
  0x1b   : > { %6047 = vmatmul.mubr.msk.bf16.gmra.mrb[4].mxu0 %vm287_vm0, %v6422_v12  ;;  %6067 = vmatmul.mubr.msk.bf16.gmra.mrb[4].mxu1 %vm287_vm0, %v6423_v13  ;;  %v698_v31 = vor.u32 %v697_v27, %v693_v22  ;;  %v714_v47 = vor.u32 %v712_v39, %v710_v42  ;;  %v1329_v54 = vsel %vm1326_vm2, %v1327_v45, %v1328_v46  ;;  %v728_v58 = vshrl.u32 %v6443_v41, 16  ;;  %v6448_v62 = vld [vmem:[%s6649_s22 + $0x30] sm:$0xff]   ;;  %v6450_v3 = vld [vmem:[%s6649_s22 + $0x38] sm:$0xff]   ;;  %v6449_v4 = vld [vmem:[%s6649_s22 + $0x20] sm:$0xff]  }
  0x1c   : > { %6050 = vmatprep.mubr.msk.bf16.mxu0 %vm287_vm0, %v6424_v14  ;;  %6070 = vmatprep.mubr.msk.bf16.mxu1 %vm287_vm0, %v6425_v15  ;;  %v711_v53 = vsel %vm691_vm1, %v706_v44, %v710_v42  ;;  %v732_v59 = vshll.u32 %v6446_v49, 16  ;;  %v726_v60 = vrot.slane %v724_v51, 1  ;;  %v1330_v61 = vrot.slane %v6444_v52, 1  ;;  %v6451_v9 = vld [vmem:[%s6649_s22 + $0x28] sm:$0xff]   ;;  %v6458_v15 = vld [vmem:[%s7715_s1 + $0x38] sm:$0xff]   ;;  %v6453_v22 = vld [vmem:[%s6649_s22 + $0x30] sm:$0xff]  }
  0x1d   : > { %v703_v38 = vsel %vm691_vm1, %v698_v31, %v702_v29  ;;  %v719_v57 = vsel %vm691_vm1, %v714_v47, %v718_v48  ;;  %v722_v63 = vor.u32 %v720_v55, %v718_v48  ;;  %v1332_v0 = vrot.slane %v6447_v56, 1  ;;  %v6454_v23 = vld [vmem:[%s6649_s22 + $0x48] sm:$0xff]   ;;  %v6455_v30 = vld [vmem:[%s6649_s22 + $0x38] sm:$0xff]   ;;  %v6456_v36 = vld [vmem:[%s6649_s22 + $0x50] sm:$0xff]  }
  0x1e   : > { %v730_v1 = vor.u32 %v728_v58, %v726_v60  ;;  %v734_v2 = vrot.slane %v732_v59, 1  ;;  %v1331_v5 = vsel %vm1326_vm2, %v1328_v46, %v1330_v61  ;;  %v740_v6 = vshll.u32 %v6448_v62, 16  ;;  %v6463_v24 = vld [vmem:[%s7715_s1 + $0x48] sm:$0xff]   ;;  %v6459_v41 = vld [vmem:[%s6649_s22 + $0x58] sm:$0xff]   ;;  %v6457_v42 = vld [vmem:[%s6649_s22 + $0x40] sm:$0xff]  }
  0x1f   : > { %v727_v7 = vsel %vm691_vm1, %v722_v63, %v726_v60  ;;  %v736_v8 = vshrl.u32 %v6446_v49, 16  ;;  %v1333_v11 = vsel %vm1326_vm2, %v1330_v61, %v1332_v0  ;;  %v744_v12 = vshrl.u32 %v6448_v62, 16  ;;  %v6460_v48 = vld [vmem:[%s6649_s22 + $0x48] sm:$0xff]   ;;  %v6462_v60 = vld [vmem:[%s6649_s22 + $0x50] sm:$0xff]  }
  0x20   : > { %v735_v10 = vsel %vm691_vm1, %v730_v1, %v734_v2  ;;  %v748_v13 = vshll.u32 %v6450_v3, 16  ;;  %v1334_v14 = vrot.slane %v6449_v4, 1  ;;  %v752_v29 = vshrl.u32 %v6450_v3, 16  ;;  %v6464_v59 = vld [vmem:[%s6649_s22 + $0x68] sm:$0xff]  }
  0x21   : > { %v1338_v34 = vrot.slane %v6453_v22, 1  ;;  %v772_v44 = vshll.u32 %v6456_v36, 16  ;;  %v768_v47 = vshrl.u32 %v6454_v23, 16  ;;  %v780_v51 = vshll.u32 %v6459_v41, 16 }
  0x22   : > { %v750_v21 = vrot.slane %v748_v13, 1  ;;  %v1335_v25 = vsel %vm1326_vm2, %v1332_v0, %v1334_v14  ;;  %v1342_v52 = vrot.slane %v6457_v42, 1  ;;  %v1344_v56 = vrot.slane %v6460_v48, 1 }
  0x23   : > { %6051 = vmatmul.mubr.msk.bf16.gmra.mrb[8].mxu0 %vm287_vm0, %v6426_v16  ;;  %6071 = vmatmul.mubr.msk.bf16.gmra.mrb[8].mxu1 %vm287_vm0, %v6427_v17  ;;  %v742_v16 = vrot.slane %v740_v6, 1  ;;  %v6452_v17 = vld [vmem:[%s6649_s22 + $0x40] sm:$0xff]   ;;  %v782_v58 = vrot.slane %v780_v51, 1  ;;  %v784_v1 = vshrl.u32 %v6459_v41, 16  ;;  %v1346_v6 = vrot.slane %v6462_v60, 1 }
  0x24   : > { %6054 = vmatprep.mubr.msk.bf16.mxu0 %vm287_vm0, %v6430_v18  ;;  %6074 = vmatprep.mubr.msk.bf16.mxu1 %vm287_vm0, %v6431_v19  ;;  %v738_v18 = vor.u32 %v736_v8, %v734_v2  ;;  %v1336_v19 = vrot.slane %v6451_v9, 1  ;;  %v754_v37 = vor.u32 %v752_v29, %v750_v21  ;;  %v1345_v0 = vsel %vm1326_vm2, %v1342_v52, %v1344_v56  ;;  %v6465_v2 = vld [vmem:[%s6649_s22 + $0x58] sm:$0xff]   ;;  %v6466_v9 = vld [vmem:[%s6649_s22 + $0x70] sm:$0xff]   ;;  %v6475_v51 = vld [vmem:[%s6649_s22 + $0x80] sm:$0xff]  }
  0x25   : > { %v746_v20 = vor.u32 %v744_v12, %v742_v16  ;;  %v6474_v41 = vld [vmem:[%s6649_s22 + $0x90] ss:$0 sps:$4 sm:$0x11]   ;;  %v6483_v60 = vld [vmem:[%s6649_s22 + $0x8] sm:$0xfe]  }
  0x26   : > { %v743_v27 = vsel %vm691_vm1, %v738_v18, %v742_v16  ;;  %v804_v16 = vshll.u32 %v6466_v9, 16 }
  0x27   : > { %v751_v31 = vsel %vm691_vm1, %v746_v20, %v750_v21  ;;  %v800_v20 = vshrl.u32 %v6464_v59, 16  ;;  %v6469_v21 = vld [vmem:[%s6649_s22 + $0x68] sm:$0xff]  }
  0x2b   : > { %6055 = vmatmul.mubr.msk.bf16.gmra.mrb[12].mxu0 %vm287_vm0, %v6432_v28  ;;  %6075 = vmatmul.mubr.msk.bf16.gmra.mrb[12].mxu1 %vm287_vm0, %v6433_v32  ;;  %v1337_v28 = vsel %vm1326_vm2, %v1334_v14, %v1336_v19  ;;  %v760_v32 = vshrl.u32 %v6452_v17, 16  ;;  %v6468_v14 = vld [vmem:[%s6649_s22 + $0x78] sm:$0xff]  }
  0x2c   : > { %6058 = vmatprep.mubr.msk.bf16.mxu0 %vm287_vm0, %v6434_v33  ;;  %6082 = vmatprep.mubr.msk.bf16.mxu1 %vm287_vm0, %v703_v38  ;;  %v764_v33 = vshll.u32 %v6454_v23, 16  ;;  %v1340_v38 = vrot.slane %v6455_v30, 1  ;;  %v808_v23 = vshrl.u32 %v6466_v9, 16  ;;  %v1352_v30 = vrot.slane %v6469_v21, 1 }
  0x2e   : > { %v766_v40 = vrot.slane %v764_v33, 1  ;;  %v1341_v46 = vsel %vm1326_vm2, %v1338_v34, %v1340_v38  ;;  %v1343_v61 = vsel %vm1326_vm2, %v1340_v38, %v1342_v52  ;;  %v6472_v33 = vld [vmem:[%s6649_s22 + $0x88] sm:$0xff]   ;;  %v836_v52 = vshll.u32 %v6474_v41, 16 }
  0x30   : > { %v770_v55 = vor.u32 %v768_v47, %v766_v40 }
  0x33   : > { %6059 = vmatmul.mubr.msk.bf16.gmra.mrb[16].mxu0 %vm287_vm0, %v6437_v50  ;;  %6083 = vmatmul.mubr.msk.bf16.vlgmr.msra.gmra.mrb[16].mxu1 %vm287_vm0, %v711_v53  ;;  %v776_v50 = vshrl.u32 %v6456_v36, 16  ;;  %v774_v53 = vrot.slane %v772_v44, 1  ;;  %v828_v44 = vshll.u32 %v6472_v33, 16 }
  0x34   : > { %6122 = vmatprep.mubr.msk.bf16.mxu0 %vm287_vm0, %v1329_v54  ;;  %6159 = vmatpush3.bf16.msra.mxu1 %v6439_v26  ;;  %v756_v26 = vshll.u32 %v6452_v17, 16  ;;  %v6461_v54 = vld [vmem:[%s6649_s22 + $0x60] sm:$0xff]  }
  0x35   : > { %6086 = vmatprep.mubr.msk.bf16.mxu1 %vm287_vm0, %v719_v57  ;;  %6160 = vmatprep.subr.bf16.mxu1 %v6458_v15  ;;  %v778_v57 = vor.u32 %v776_v50, %v774_v53  ;;  %v788_v62 = vshll.u32 %v6461_v54, 16  ;;  %v775_v63 = vsel %vm691_vm1, %v770_v55, %v774_v53  ;;  %v792_v4 = vshrl.u32 %v6461_v54, 16  ;;  %v6467_v17 = vld [vmem:[%s6649_s22 + $0x60] sm:$0xff]   ;;  %v6476_v53 = vld [vmem:[%s6649_s22 + $0x88] sm:$0xff]  }
  0x36   : > { %v758_v35 = vrot.slane %v756_v26, 1  ;;  %v6790_v26 = vld [vmem:[%s7715_s1 + $0x60] sm:$0xff]   ;;  %v830_v50 = vrot.slane %v828_v44, 1  ;;  %v832_v55 = vshrl.u32 %v6472_v33, 16 }
  0x37   : > { %v783_v3 = vsel %vm691_vm1, %v778_v57, %v782_v58  ;;  %v790_v8 = vrot.slane %v788_v62, 1  ;;  %v6477_v62 = vld [vmem:[%s6649_s22 + $0x8] sm:$0xfe]  }
  0x38   : > { %6161 = vmatpush3.bf16.msra.mxu1 %v6458_v15  ;;  %v762_v39 = vor.u32 %v760_v32, %v758_v35  ;;  %v759_v45 = vsel %vm691_vm1, %v754_v37, %v758_v35  ;;  %v1347_v15 = vsel %vm1326_vm2, %v1344_v56, %v1346_v6  ;;  %v6471_v35 = vld [vmem:[%s6649_s22 + $0x70] sm:$0xff]  }
  0x39   : > { %v794_v12 = vor.u32 %v792_v4, %v790_v8  ;;  %v6484_v56 = vld [vmem:[%s6649_s22 + $0x10] sm:$0xff]  }
  0x3a   : > { %v767_v49 = vsel %vm691_vm1, %v762_v39, %v766_v40  ;;  %v816_v39 = vshrl.u32 %v6468_v14, 16  ;;  %v6473_v40 = vld [vmem:[%s6649_s22 + $0x78] sm:$0xff]   ;;  %v2386_v4 = vshll.u32 %v6484_v56, 16 }
  0x3b   : > { %6123 = vmatmul.mubr.msk.bf16.vlgmr.msra.gmra.mrb[20].mxu0 %vm287_vm0, %v1331_v5  ;;  %6087 = vmatmul.mubr.msk.bf16.gmra.mrb[20].mxu1 %vm287_vm0, %v727_v7  ;;  %v796_v5 = vshll.u32 %v6464_v59, 16  ;;  %v6771_v7 = vld [vmem:[%s7715_s1 + $0x50] sm:$0xff]   ;;  %v1356_v48 = vrot.slane %v6473_v40, 1  ;;  %v6485_v40 = vld [vmem:[%s6649_s22 + $0x28] sm:$0xff]  }
  0x3c   : > { %6199 = vmatpush3.bf16.msra.mxu0 %v6445_v43  ;;  %6090 = vmatprep.mubr.msk.bf16.mxu1 %vm287_vm0, %v735_v10  ;;  %v1339_v43 = vsel %vm1326_vm2, %v1336_v19, %v1338_v34  ;;  %v786_v10 = vor.u32 %v784_v1, %v782_v58  ;;  %v6478_v59 = vld [vmem:[%s6649_s22 + $0x10] sm:$0xff]   ;;  %v1360_v1 = vrot.slane %v6476_v53, 1 }
  0x3d   : > { %6126 = vmatprep.mubr.msk.bf16.mxu0 %vm287_vm0, %v1333_v11  ;;  %6200 = vmatprep.subr.bf16.mxu0 %v6463_v24  ;;  %v1348_v11 = vrot.slane %v6465_v2, 1  ;;  %v798_v13 = vrot.slane %v796_v5, 1  ;;  %v834_v2 = vor.u32 %v832_v55, %v830_v50  ;;  %v2375_v5 = vshrl.u32 %v6483_v60, 16 }
  0x3e   : > { %6238 = vmatprep.subr.bf16.mxu1 %v6771_v7  ;;  %v791_v18 = vsel %vm691_vm1, %v786_v10, %v790_v8  ;;  %v1850_v8 = vrot.slane %v6477_v62, 1  ;;  %v1851_v9 = vrot.slane %v6478_v59, 1  ;;  %v6480_v10 = vld [vmem:[%s6649_s22 + $0x18] sm:$0xff]   ;;  %v6492_v59 = vld [vmem:[%s6649_s22 + $0x40] sm:$0xff]  }
  0x3f   : > { %v1349_v19 = vsel %vm1326_vm2, %v1346_v6, %v1348_v11  ;;  %v799_v22 = vsel %vm691_vm1, %v794_v12, %v798_v13  ;;  %v802_v29 = vor.u32 %v800_v20, %v798_v13  ;;  %v2378_v6 = vshll.u32 %v6483_v60, 16  ;;  %v6486_v12 = vld [vmem:[%s6649_s22 + $0x18] sm:$0xff]  }
  0x40   : > { %6201 = vmatpush3.bf16.msra.mxu0 %v6463_v24  ;;  %v812_v24 = vshll.u32 %v6468_v14, 16  ;;  %v2388_v20 = vrot.slane %v2386_v4, 2  ;;  %v1852_v21 = vsel %vm1326_vm2, %v1850_v8, %v1851_v9 }
  0x41   : > { %6278 = vmatprep.subr.bf16.mxu0 %v6790_v26 }
  0x42   : > { %v814_v32 = vrot.slane %v812_v24, 1 }
  0x43   : > { %6127 = vmatmul.mubr.msk.bf16.gmra.mrb[24].mxu0 %vm287_vm0, %v1335_v25  ;;  %6091 = vmatmul.mubr.msk.bf16.gmra.mrb[24].mxu1 %vm287_vm0, %v743_v27  ;;  %v6470_v25 = vld [vmem:[%s6649_s22 + $0x80] sm:$0xff]   ;;  %v806_v27 = vrot.slane %v804_v16, 1 }
  0x44   : > { %6130 = vmatprep.mubr.msk.bf16.mxu0 %vm287_vm0, %v1337_v28  ;;  %6094 = vmatprep.mubr.msk.bf16.mxu1 %vm287_vm0, %v751_v31  ;;  %v1350_v28 = vrot.slane %v6467_v17, 1  ;;  %v820_v34 = vshll.u32 %v6470_v25, 16  ;;  %v818_v47 = vor.u32 %v816_v39, %v814_v32  ;;  %v6482_v16 = vld [vmem:[%s6649_s22 + $0x20] sm:$0xff]   ;;  %v2377_v17 = vrot.slane %v2375_v5, 1 }
  0x45   : > { %v810_v31 = vor.u32 %v808_v23, %v806_v27  ;;  %v807_v37 = vsel %vm691_vm1, %v802_v29, %v806_v27  ;;  %v2392_v23 = vshrl.u32 %v6486_v12, 16  ;;  %v2395_v27 = vshll.u32 %v6486_v12, 16 }
  0x46   : > { %v1351_v36 = vsel %vm1326_vm2, %v1348_v11, %v1350_v28  ;;  %v1353_v38 = vsel %vm1326_vm2, %v1350_v28, %v1352_v30  ;;  %v6479_v11 = vld [vmem:[%s6649_s22 + $0x90] ss:$0 sps:$4 sm:$0x11]  }
  0x47   : > { %v815_v42 = vsel %vm691_vm1, %v810_v31, %v814_v32  ;;  %v1362_v24 = vrot.slane %v6479_v11, 1  ;;  %v2394_v33 = vrot.slane %v2392_v23, 1  ;;  %v6494_v11 = vld [vmem:[%s6649_s22 + $0x48] sm:$0xff]  }
  0x4b   : > { %6131 = vmatmul.mubr.msk.bf16.gmra.mrb[28].mxu0 %vm287_vm0, %v1339_v43  ;;  %6095 = vmatmul.mubr.msk.bf16.gmra.mrb[28].mxu1 %vm287_vm0, %v759_v45  ;;  %v824_v43 = vshrl.u32 %v6470_v25, 16  ;;  %v822_v45 = vrot.slane %v820_v34, 1  ;;  %v1853_v25 = vrot.slane %v6480_v10, 1  ;;  %v6491_v34 = vld [vmem:[%s6649_s22 + $0x28] sm:$0xff]   ;;  %v1863_v10 = vrot.slane %v6492_v59, 1 }
  0x4c   : > { %6134 = vmatprep.mubr.msk.bf16.mxu0 %vm287_vm0, %v1341_v46  ;;  %6098 = vmatprep.mubr.msk.bf16.mxu1 %vm287_vm0, %v767_v49  ;;  %v1354_v46 = vrot.slane %v6471_v35, 1  ;;  %v1363_v35 = vsel %vm1326_vm2, %v1360_v1, %v1362_v24  ;;  %v1865_v24 = vrot.slane %v6494_v11, 1  ;;  %v6513_v11 = vld [vmem:[%s6649_s22 + $0x78] sm:$0xff]  }
  0x4d   : > { %v826_v49 = vor.u32 %v824_v43, %v822_v45  ;;  %v823_v57 = vsel %vm691_vm1, %v818_v47, %v822_v45  ;;  %v6500_v45 = vld [vmem:[%s7715_s1 + $0x58] sm:$0xff]  }
  0x4e   : > { %v1355_v54 = vsel %vm1326_vm2, %v1352_v30, %v1354_v46  ;;  %v1357_v58 = vsel %vm1326_vm2, %v1354_v46, %v1356_v48  ;;  %v1855_v30 = vrot.slane %v6482_v16, 1  ;;  %v2410_v46 = vshrl.u32 %v6491_v34, 16 }
  0x50   : > { %v1856_v41 = vsel %vm1326_vm2, %v1853_v25, %v1855_v30  ;;  %v2412_v55 = vrot.slane %v2410_v46, 1 }
  0x53   : > { %6135 = vmatmul.mubr.msk.bf16.gmra.mrb[32].mxu0 %vm287_vm0, %v1343_v61  ;;  %6099 = vmatmul.mubr.msk.bf16.gmra.mrb[32].mxu1 %vm287_vm0, %v775_v63  ;;  %v831_v61 = vsel %vm691_vm1, %v826_v49, %v830_v50  ;;  %v838_v63 = vrot.slane %v836_v52, 1  ;;  %v1857_v50 = vrot.slane %v6485_v40, 1 }
  0x54   : > { %6138 = vmatprep.mubr.msk.bf16.mxu0 %vm287_vm0, %v1345_v0  ;;  %6102 = vmatprep.mubr.msk.bf16.mxu1 %vm287_vm0, %v783_v3  ;;  %v1358_v0 = vrot.slane %v6475_v51, 1  ;;  %v2383_v3 = vshrl.u32 %v6484_v56, 16  ;;  %v6495_v56 = vld [vmem:[%s6649_s22 + $0x38] sm:$0xff]  }
  0x55   : > { %v839_v13 = vsel %vm691_vm1, %v834_v2, %v838_v63  ;;  %v2428_v2 = vshrl.u32 %v6495_v56, 16  ;;  %v2431_v4 = vshll.u32 %v6495_v56, 16 }
  0x56   : > { %v1359_v14 = vsel %vm1326_vm2, %v1356_v48, %v1358_v0  ;;  %v2413_v48 = vshll.u32 %v6491_v34, 16 }
  0x57   : > { %v2430_v12 = vrot.slane %v2428_v2, 1 }
  0x5b   : > { %6139 = vmatmul.mubr.msk.bf16.gmra.mrb[36].mxu0 %vm287_vm0, %v1347_v15  ;;  %6103 = vmatmul.mubr.msk.bf16.gmra.mrb[36].mxu1 %vm287_vm0, %v791_v18  ;;  %v1361_v15 = vsel %vm1326_vm2, %v1358_v0, %v1360_v1  ;;  %v2380_v18 = vrot.slane %v2378_v6, 2  ;;  %v6505_v1 = vld [vmem:[%s7715_s1 + $0x68] sm:$0xff]  }
  0x5c   : > { %6142 = vmatprep.mubr.msk.bf16.mxu0 %vm287_vm0, %v1349_v19  ;;  %6106 = vmatprep.mubr.msk.bf16.mxu1 %vm287_vm0, %v799_v22  ;;  %v2385_v19 = vrot.slane %v2383_v3, 1  ;;  %v6489_v22 = vld [vmem:[%s6649_s22 + $0x20] sm:$0xff]  }
  0x5d   : > { %v2381_v28 = vor.u32 %v2380_v18, %v2377_v17  ;;  %v2401_v31 = vshrl.u32 %v6489_v22, 16  ;;  %v2404_v32 = vshll.u32 %v6489_v22, 16  ;;  %v6496_v18 = vld [vmem:[%s6649_s22 + $0x50] sm:$0xff]  }
  0x5e   : > { %v2389_v29 = vor.u32 %v2388_v20, %v2385_v19 }
  0x5f   : > { %v2403_v43 = vrot.slane %v2401_v31, 1  ;;  %v2406_v44 = vrot.slane %v2404_v32, 2  ;;  %v1867_v31 = vrot.slane %v6496_v18, 1  ;;  %v6888_v32 = vld [vmem:[%s7715_s1 + $0x80] sm:$0xff]  }
  0x60   : > { %v2390_v39 = vsel %vm2373_vm3, %v2381_v28, %v2389_v29 }
  0x61   : > { %v2407_v53 = vor.u32 %v2406_v44, %v2403_v43  ;;  %v1868_v43 = vsel %vm1326_vm2, %v1865_v24, %v1867_v31  ;;  %v6501_v44 = vld [vmem:[%s6649_s22 + $0x60] sm:$0xff]  }
  0x63   : > { %6143 = vmatmul.mubr.msk.bf16.gmra.mrb[40].mxu0 %vm287_vm0, %v1351_v36  ;;  %6107 = vmatmul.mubr.msk.bf16.gmra.mrb[40].mxu1 %vm287_vm0, %v807_v37  ;;  %v2397_v36 = vrot.slane %v2395_v27, 2  ;;  %v6493_v37 = vld [vmem:[%s6649_s22 + $0x30] sm:$0xff]  }
  0x64   : > { %6146 = vmatprep.mubr.msk.bf16.mxu0 %vm287_vm0, %v1353_v38  ;;  %6110 = vmatprep.mubr.msk.bf16.mxu1 %vm287_vm0, %v815_v42  ;;  %v1854_v38 = vsel %vm1326_vm2, %v1851_v9, %v1853_v25  ;;  %v6488_v42 = vld [vmem:[%s6649_s22 + $0x30] sm:$0xff]   ;;  %v2419_v49 = vshrl.u32 %v6493_v37, 16  ;;  %v2422_v51 = vshll.u32 %v6493_v37, 16 }
  0x65   : > { %v2398_v47 = vor.u32 %v2397_v36, %v2394_v33  ;;  %v1859_v52 = vrot.slane %v6488_v42, 1  ;;  %v6498_v33 = vld [vmem:[%s6649_s22 + $0x58] sm:$0xff]  }
  0x66   : > { %v2421_v60 = vrot.slane %v2419_v49, 1  ;;  %v2424_v62 = vrot.slane %v2422_v51, 2  ;;  %v1869_v49 = vrot.slane %v6498_v33, 1  ;;  %v6517_v33 = vld [vmem:[%s6649_s22 + $0x88] sm:$0xff]  }
  0x67   : > { %v1860_v63 = vsel %vm1326_vm2, %v1857_v50, %v1859_v52  ;;  %v2408_v0 = vsel %vm2373_vm3, %v2398_v47, %v2407_v53 }
  0x68   : > { %v2425_v6 = vor.u32 %v2424_v62, %v2421_v60  ;;  %v1870_v59 = vsel %vm1326_vm2, %v1867_v31, %v1869_v49  ;;  %v6511_v62 = vld [vmem:[%s6649_s22 + $0x70] sm:$0xff]  }
  0x6b   : > { %6147 = vmatmul.mubr.msk.bf16.gmra.mrb[44].mxu0 %vm287_vm0, %v1355_v54  ;;  %6111 = vmatmul.mubr.msk.bf16.gmra.mrb[44].mxu1 %vm287_vm0, %v823_v57  ;;  %v6490_v54 = vld [vmem:[%s6649_s22 + $0x38] sm:$0xff]   ;;  %v2399_v57 = vsel %vm2373_vm3, %v2389_v29, %v2398_v47 }
  0x6c   : > { %6150 = vmatprep.mubr.msk.bf16.mxu0 %vm287_vm0, %v1357_v58  ;;  %6114 = vmatprep.mubr.msk.bf16.mxu1 %vm287_vm0, %v831_v61  ;;  %v2415_v58 = vrot.slane %v2413_v48, 2  ;;  %v1858_v61 = vsel %vm1326_vm2, %v1855_v30, %v1857_v50  ;;  %v1861_v5 = vrot.slane %v6490_v54, 1 }
  0x6e   : > { %v2416_v3 = vor.u32 %v2415_v58, %v2412_v55  ;;  %v1862_v16 = vsel %vm1326_vm2, %v1859_v52, %v1861_v5  ;;  %v1864_v22 = vsel %vm1326_vm2, %v1861_v5, %v1863_v10  ;;  %v1871_v52 = vrot.slane %v6501_v44, 1  ;;  %v6509_v55 = vld [vmem:[%s6649_s22 + $0x68] sm:$0xff]  }
  0x6f   : > { %v2491_v5 = vshrl.u32 %v6511_v62, 16 }
  0x70   : > { %v2426_v17 = vsel %vm2373_vm3, %v2416_v3, %v2425_v6 }
  0x73   : > { %6151 = vmatmul.mubr.msk.bf16.gmra.mrb[48].mxu0 %vm287_vm0, %v1359_v14  ;;  %6115 = vmatmul.mubr.msk.bf16.gmra.mrb[48].mxu1 %vm287_vm0, %v839_v13  ;;  %v6499_v13 = vld [vmem:[%s6649_s22 + $0x48] sm:$0xff]   ;;  %v2417_v14 = vsel %vm2373_vm3, %v2407_v53, %v2416_v3  ;;  %v2485_v3 = vshll.u32 %v6509_v55, 16 }
  0x74   : > { %6154 = vmatprep.mubr.msk.bf16.mxu0 %vm287_vm0, %v1361_v15  ;;  %6162 = vmatprep.mubr.msk.bf16.mxu1 %vm287_vm0, %v1852_v21  ;;  %v6873_v15 = vld [vmem:[%s7715_s1 + $0x70] sm:$0xff]   ;;  %v2446_v23 = vshrl.u32 %v6499_v13, 16  ;;  %v2449_v27 = vshll.u32 %v6499_v13, 16  ;;  %v6503_v53 = vld [vmem:[%s6649_s22 + $0x68] sm:$0xff]  }
  0x75   : > { %v6502_v21 = vld [vmem:[%s6649_s22 + $0x50] sm:$0xff]   ;;  %v2487_v13 = vrot.slane %v2485_v3, 2 }
  0x76   : > { %v2455_v29 = vshrl.u32 %v6502_v21, 16  ;;  %v2458_v30 = vshll.u32 %v6502_v21, 16  ;;  %v2448_v34 = vrot.slane %v2446_v23, 1  ;;  %v2451_v37 = vrot.slane %v2449_v27, 2 }
  0x77   : > { %v2500_v21 = vshrl.u32 %v6513_v11, 16  ;;  %v2503_v23 = vshll.u32 %v6513_v11, 16 }
  0x78   : > { %v2460_v42 = vrot.slane %v2458_v30, 2  ;;  %v2452_v46 = vor.u32 %v2451_v37, %v2448_v34  ;;  %v6512_v30 = vld [vmem:[%s6649_s22 + $0x88] sm:$0xff]  }
  0x79   : > { %v2502_v31 = vrot.slane %v2500_v21, 1  ;;  %v1881_v44 = vrot.slane %v6512_v30, 1  ;;  %v6527_v21 = vld [vmem:[%s6649_s22 + $0x28] sm:$0xff]   ;;  %v6542_v30 = vld [vmem:[%s7715_s1 + $0x78] sm:$0xff]  }
  0x7b   : > { %6155 = vmatmul.mubr.msk.bf16.gmra.mrb[52].mxu0 %vm287_vm0, %v1363_v35  ;;  %6163 = vmatmul.mubr.msk.bf16.vlgmr.msra.gmra.mrb[52].mxu1 %vm287_vm0, %v1854_v38  ;;  %v6504_v35 = vld [vmem:[%s6649_s22 + $0x58] sm:$0xff]   ;;  %v6507_v38 = vld [vmem:[%s6649_s22 + $0x60] sm:$0xff]  }
  0x7c   : > { %6202 = vmatprep.mubr.msk.bf16.mxu0 %vm287_vm0, %v2390_v39  ;;  %6239 = vmatpush3.bf16.msra.mxu1 %v6771_v7  ;;  %v6497_v7 = vld [vmem:[%s6649_s22 + $0x40] sm:$0xff]   ;;  %v1866_v39 = vsel %vm1326_vm2, %v1863_v10, %v1865_v24  ;;  %v2467_v47 = vshll.u32 %v6504_v35, 16  ;;  %v2473_v48 = vshrl.u32 %v6507_v38, 16  ;;  %v2476_v51 = vshll.u32 %v6507_v38, 16 }
  0x7d   : > { %6166 = vmatprep.mubr.msk.bf16.mxu1 %vm287_vm0, %v1856_v41  ;;  %6240 = vmatprep.subr.bf16.mxu1 %v6500_v45  ;;  %v2437_v8 = vshrl.u32 %v6497_v7, 16  ;;  %v2440_v9 = vshll.u32 %v6497_v7, 16  ;;  %v2457_v41 = vrot.slane %v2455_v29, 1  ;;  %v1872_v7 = vsel %vm1326_vm2, %v1869_v49, %v1871_v52 }
  0x7e   : > { %v2475_v58 = vrot.slane %v2473_v48, 1 }
  0x7f   : > { %v2439_v19 = vrot.slane %v2437_v8, 1  ;;  %v2442_v20 = vrot.slane %v2440_v9, 2  ;;  %v2461_v50 = vor.u32 %v2460_v42, %v2457_v41  ;;  %v6508_v9 = vld [vmem:[%s6649_s22 + $0x78] sm:$0xff]   ;;  %v6514_v42 = vld [vmem:[%s6649_s22 + $0x90] sm:$0xff]  }
  0x80   : > { %6241 = vmatpush3.bf16.msra.mxu1 %v6500_v45  ;;  %v2464_v45 = vshrl.u32 %v6504_v35, 16  ;;  %v2505_v35 = vrot.slane %v2503_v23, 2 }
  0x81   : > { %6318 = vmatprep.subr.bf16.mxu1 %v6873_v15  ;;  %v2443_v28 = vor.u32 %v2442_v20, %v2439_v19  ;;  %v2462_v60 = vsel %vm2373_vm3, %v2452_v46, %v2461_v50  ;;  %v6510_v20 = vld [vmem:[%s6649_s22 + $0x80] sm:$0xff]  }
  0x82   : > { %v2466_v54 = vrot.slane %v2464_v45, 1  ;;  %v1879_v29 = vrot.slane %v6510_v20, 1  ;;  %v2506_v45 = vor.u32 %v2505_v35, %v2502_v31 }
  0x83   : > { %6203 = vmatmul.mubr.msk.bf16.vlgmr.msra.gmra.mrb[56].mxu0 %vm287_vm0, %v2399_v57  ;;  %6167 = vmatmul.mubr.msk.bf16.gmra.mrb[56].mxu1 %vm287_vm0, %v1858_v61  ;;  %v2453_v56 = vsel %vm2373_vm3, %v2443_v28, %v2452_v46  ;;  %v2469_v57 = vrot.slane %v2467_v47, 2  ;;  %v2478_v61 = vrot.slane %v2476_v51, 2  ;;  %v2521_v46 = vshll.u32 %v6517_v33, 16  ;;  %v6516_v51 = vld [vmem:[%s6649_s22 + $0x98] ss:$0 sps:$4 sm:$0x11]  }
  0x84   : > { %6279 = vmatpush3.bf16.msra.mxu0 %v6790_v26  ;;  %6170 = vmatprep.mubr.msk.bf16.mxu1 %vm287_vm0, %v1860_v63  ;;  %v2433_v26 = vrot.slane %v2431_v4, 2  ;;  %v6506_v63 = vld [vmem:[%s6649_s22 + $0x70] sm:$0xff]  }
  0x85   : > { %6206 = vmatprep.mubr.msk.bf16.mxu0 %vm287_vm0, %v2408_v0  ;;  %6280 = vmatprep.subr.bf16.mxu0 %v6505_v1  ;;  %v2482_v0 = vshrl.u32 %v6509_v55, 16  ;;  %v2470_v2 = vor.u32 %v2469_v57, %v2466_v54  ;;  %v2479_v4 = vor.u32 %v2478_v61, %v2475_v58  ;;  %v1875_v8 = vrot.slane %v6506_v63, 1  ;;  %v6521_v55 = vld [vmem:[%s6649_s22 + $0x98] ss:$0 sps:$4 sm:$0x33]  }
  0x86   : > { %v2434_v25 = vor.u32 %v2433_v26, %v2430_v12  ;;  %v2523_v54 = vrot.slane %v2521_v46, 2 }
  0x87   : > { %v2484_v10 = vrot.slane %v2482_v0, 1  ;;  %v2471_v12 = vsel %vm2373_vm3, %v2461_v50, %v2470_v2  ;;  %v1883_v50 = vrot.slane %v6514_v42, 1  ;;  %v2536_v0 = vshrl.u32 %v6521_v55, 16  ;;  %v6534_v42 = vld [vmem:[%s6649_s22 + $0x40] sm:$0xff]  }
  0x88   : > { %6281 = vmatpush3.bf16.msra.mxu0 %v6505_v1  ;;  %v2435_v36 = vsel %vm2373_vm3, %v2425_v6, %v2434_v25  ;;  %v2444_v40 = vsel %vm2373_vm3, %v2434_v25, %v2443_v28  ;;  %v1873_v1 = vrot.slane %v6503_v53, 1  ;;  %v2494_v6 = vshll.u32 %v6511_v62, 16  ;;  %v6520_v62 = vld [vmem:[%s6649_s22 + $0x10] sm:$0xff]  }
  0x89   : > { %6358 = vmatprep.subr.bf16.mxu0 %v6888_v32  ;;  %v1877_v25 = vrot.slane %v6508_v9, 1  ;;  %v1884_v61 = vsel %vm1326_vm2, %v1881_v44, %v1883_v50  ;;  %v6522_v9 = vld [vmem:[%s6649_s22 + $0x18] sm:$0xff]  }
  0x8a   : > { %v1874_v26 = vsel %vm1326_vm2, %v1871_v52, %v1873_v1  ;;  %v2496_v18 = vrot.slane %v2494_v6, 2  ;;  %v1876_v19 = vsel %vm1326_vm2, %v1873_v1, %v1875_v8  ;;  %v2539_v1 = vshll.u32 %v6521_v55, 16 }
  0x8b   : > { %6207 = vmatmul.mubr.msk.bf16.gmra.mrb[60].mxu0 %vm287_vm0, %v2417_v14  ;;  %6171 = vmatmul.mubr.msk.bf16.gmra.mrb[60].mxu1 %vm287_vm0, %v1862_v16  ;;  %v6515_v14 = vld [vmem:[%s6649_s22 + $0x80] sm:$0xff]   ;;  %v2480_v16 = vsel %vm2373_vm3, %v2470_v2, %v2479_v4  ;;  %v1878_v37 = vsel %vm1326_vm2, %v1875_v8, %v1877_v25  ;;  %v1880_v41 = vsel %vm1326_vm2, %v1877_v25, %v1879_v29  ;;  %v2538_v6 = vrot.slane %v2536_v0, 1 }
  0x8c   : > { %6210 = vmatprep.mubr.msk.bf16.mxu0 %vm287_vm0, %v2426_v17  ;;  %6174 = vmatprep.mubr.msk.bf16.mxu1 %vm287_vm0, %v1864_v22  ;;  %v2493_v17 = vrot.slane %v2491_v5, 1  ;;  %v2488_v22 = vor.u32 %v2487_v13, %v2484_v10  ;;  %v2509_v24 = vshrl.u32 %v6515_v14, 16  ;;  %v2512_v28 = vshll.u32 %v6515_v14, 16  ;;  %v6526_v13 = vld [vmem:[%s6649_s22 + $0x18] sm:$0xff]  }
  0x8d   : > { %v2541_v8 = vrot.slane %v2539_v1, 2  ;;  %v6543_v1 = vld [vmem:[%s6649_s22 + $0x60] sm:$0xff]  }
  0x8e   : > { %v2497_v27 = vor.u32 %v2496_v18, %v2493_v17  ;;  %v2489_v34 = vsel %vm2373_vm3, %v2479_v4, %v2488_v22  ;;  %v3032_v4 = vrot.slane %v6520_v62, 2  ;;  %v3034_v17 = vrot.slane %v6522_v9, 2 }
  0x90   : > { %v2498_v38 = vsel %vm2373_vm3, %v2488_v22, %v2497_v27  ;;  %v2507_v53 = vsel %vm2373_vm3, %v2497_v27, %v2506_v45  ;;  %v6528_v22 = vld [vmem:[%s6649_s22 + $0x20] sm:$0xff]   ;;  %v3035_v25 = vsel %vm3030_vm4, %v3032_v4, %v3034_v17 }
  0x91   : > { %v3557_v31 = vrot.slane %v6528_v22, 2 }
  0x93   : > { %6211 = vmatmul.mubr.msk.bf16.gmra.mrb[64].mxu0 %vm287_vm0, %v2435_v36  ;;  %6175 = vmatmul.mubr.msk.bf16.gmra.mrb[64].mxu1 %vm287_vm0, %v1866_v39  ;;  %v2511_v36 = vrot.slane %v2509_v24, 1  ;;  %v2514_v39 = vrot.slane %v2512_v28, 2  ;;  %v6530_v24 = vld [vmem:[%s6649_s22 + $0x30] sm:$0xff]   ;;  %v6531_v28 = vld [vmem:[%s6649_s22 + $0x28] sm:$0xff]  }
  0x94   : > { %6214 = vmatprep.mubr.msk.bf16.mxu0 %vm287_vm0, %v2444_v40  ;;  %6178 = vmatprep.mubr.msk.bf16.mxu1 %vm287_vm0, %v1868_v43  ;;  %v6518_v40 = vld [vmem:[%s6649_s22 + $0x90] sm:$0xff]   ;;  %v2518_v43 = vshrl.u32 %v6517_v33, 16  ;;  %v3038_v33 = vrot.slane %v6527_v21, 2  ;;  %v3559_v35 = vrot.slane %v6531_v28, 2 }
  0x95   : > { %v2515_v47 = vor.u32 %v2514_v39, %v2511_v36  ;;  %v2527_v48 = vshrl.u32 %v6518_v40, 16  ;;  %v2530_v49 = vshll.u32 %v6518_v40, 16  ;;  %v6535_v40 = vld [vmem:[%s6649_s22 + $0x38] sm:$0xff]  }
  0x96   : > { %v2520_v52 = vrot.slane %v2518_v43, 1  ;;  %v6547_v43 = vld [vmem:[%s7715_s1 + $0x88] sm:$0xff]   ;;  %v3563_v46 = vrot.slane %v6535_v40, 2 }
  0x97   : > { %v2516_v57 = vsel %vm2373_vm3, %v2506_v45, %v2515_v47  ;;  %v2529_v58 = vrot.slane %v2527_v48, 1  ;;  %v6536_v48 = vld [vmem:[%s6649_s22 + $0x48] sm:$0xff]  }
  0x98   : > { %v2524_v63 = vor.u32 %v2523_v54, %v2520_v52  ;;  %v6538_v54 = vld [vmem:[%s6649_s22 + $0x50] sm:$0xff]  }
  0x9a   : > { %v2525_v5 = vsel %vm2373_vm3, %v2515_v47, %v2524_v63  ;;  %v3044_v47 = vrot.slane %v6534_v42, 2 }
  0x9b   : > { %6215 = vmatmul.mubr.msk.bf16.gmra.mrb[68].mxu0 %vm287_vm0, %v2453_v56  ;;  %6179 = vmatmul.mubr.msk.bf16.gmra.mrb[68].mxu1 %vm287_vm0, %v1870_v59  ;;  %v1882_v56 = vsel %vm1326_vm2, %v1879_v29, %v1881_v44  ;;  %v2532_v59 = vrot.slane %v2530_v49, 2 }
  0x9c   : > { %6218 = vmatprep.mubr.msk.bf16.mxu0 %vm287_vm0, %v2462_v60  ;;  %6182 = vmatprep.mubr.msk.bf16.mxu1 %vm287_vm0, %v1872_v7  ;;  %v6519_v60 = vld [vmem:[%s6649_s22 + $0x8] sm:$0xfc]   ;;  %v1885_v7 = vrot.slane %v6516_v51, 1 }
  0x9d   : > { %v2533_v2 = vor.u32 %v2532_v59, %v2529_v58  ;;  %v3031_v3 = vrot.slane %v6519_v60, 2  ;;  %v6539_v51 = vld [vmem:[%s6649_s22 + $0x48] sm:$0xff]   ;;  %v3048_v58 = vrot.slane %v6538_v54, 2  ;;  %v6540_v59 = vld [vmem:[%s6649_s22 + $0x58] sm:$0xff]  }
  0x9e   : > { %v1886_v10 = vsel %vm1326_vm2, %v1883_v50, %v1885_v7  ;;  %v6537_v50 = vld [vmem:[%s6649_s22 + $0x40] sm:$0xff]  }
  0x9f   : > { %v2534_v11 = vsel %vm2373_vm3, %v2524_v63, %v2533_v2  ;;  %v3033_v14 = vsel %vm3030_vm4, %v3031_v3, %v3032_v4  ;;  %v3565_v55 = vrot.slane %v6537_v50, 2  ;;  %v6544_v63 = vld [vmem:[%s6649_s22 + $0x58] sm:$0xff]   ;;  %v3050_v3 = vrot.slane %v6540_v59, 2 }
  0xa0   : > { %v3571_v4 = vrot.slane %v6544_v63, 2 }
  0xa1   : > { %v3566_v60 = vsel %vm3030_vm4, %v3563_v46, %v3565_v55  ;;  %v3051_v9 = vsel %vm3030_vm4, %v3048_v58, %v3050_v3 }
  0xa3   : > { %6219 = vmatmul.mubr.msk.bf16.gmra.mrb[72].mxu0 %vm287_vm0, %v2471_v12  ;;  %6183 = vmatmul.mubr.msk.bf16.gmra.mrb[72].mxu1 %vm287_vm0, %v1874_v26  ;;  %v6525_v12 = vld [vmem:[%s6649_s22 + $0x10] sm:$0xfc]   ;;  %v6524_v26 = vld [vmem:[%s6649_s22 + $0x20] sm:$0xff]  }
  0xa4   : > { %6222 = vmatprep.mubr.msk.bf16.mxu0 %vm287_vm0, %v2480_v16  ;;  %6186 = vmatprep.mubr.msk.bf16.mxu1 %vm287_vm0, %v1876_v19  ;;  %v2542_v16 = vor.u32 %v2541_v8, %v2538_v6  ;;  %v3554_v18 = vrot.slane %v6525_v12, 2  ;;  %v3555_v19 = vrot.slane %v6526_v13, 2  ;;  %v3036_v20 = vrot.slane %v6524_v26, 2  ;;  %v6546_v8 = vld [vmem:[%s6649_s22 + $0x60] sm:$0xff]   ;;  %v6549_v12 = vld [vmem:[%s6649_s22 + $0x68] sm:$0xff]  }
  0xa5   : > { %v3573_v26 = vrot.slane %v6546_v8, 2  ;;  %v6564_v8 = vld [vmem:[%s6649_s22 + $0x20] sm:$0xff]  }
  0xa6   : > { %v2543_v23 = vsel %vm2373_vm3, %v2533_v2, %v2542_v16  ;;  %v3556_v27 = vsel %vm3030_vm4, %v3554_v18, %v3555_v19  ;;  %v3037_v29 = vsel %vm3030_vm4, %v3034_v17, %v3036_v20  ;;  %v3558_v36 = vsel %vm3030_vm4, %v3555_v19, %v3557_v31 }
  0xa7   : > { %v3039_v39 = vsel %vm3030_vm4, %v3036_v20, %v3038_v33  ;;  %v3575_v17 = vrot.slane %v6549_v12, 2 }
  0xab   : > { %6223 = vmatmul.mubr.msk.bf16.gmra.mrb[76].mxu0 %vm287_vm0, %v2489_v34  ;;  %6187 = vmatmul.mubr.msk.bf16.gmra.mrb[76].mxu1 %vm287_vm0, %v1878_v37  ;;  %v3040_v34 = vrot.slane %v6530_v24, 2  ;;  %v6532_v37 = vld [vmem:[%s6649_s22 + $0x38] sm:$0xff]   ;;  %v3574_v24 = vsel %vm3030_vm4, %v3571_v4, %v3573_v26 }
  0xac   : > { %6226 = vmatprep.mubr.msk.bf16.mxu0 %vm287_vm0, %v2498_v38  ;;  %6190 = vmatprep.mubr.msk.bf16.mxu1 %vm287_vm0, %v1880_v41  ;;  %v6533_v38 = vld [vmem:[%s6649_s22 + $0x30] sm:$0xff]   ;;  %v3042_v45 = vrot.slane %v6532_v37, 2 }
  0xad   : > { %v3041_v41 = vsel %vm3030_vm4, %v3038_v33, %v3040_v34  ;;  %v3561_v44 = vrot.slane %v6533_v38, 2  ;;  %v7042_v33 = vld [vmem:[%s6649_s22 + $0x78] sm:$0xff]  }
  0xaf   : > { %v3562_v49 = vsel %vm3030_vm4, %v3559_v35, %v3561_v44  ;;  %v3564_v52 = vsel %vm3030_vm4, %v3561_v44, %v3563_v46  ;;  %v6555_v46 = vld [vmem:[%s6649_s22 + $0x80] sm:$0xff]  }
  0xb3   : > { %6227 = vmatmul.mubr.msk.bf16.gmra.mrb[80].mxu0 %vm287_vm0, %v2507_v53  ;;  %6191 = vmatmul.mubr.msk.bf16.gmra.mrb[80].mxu1 %vm287_vm0, %v1882_v56  ;;  %v3045_v53 = vsel %vm3030_vm4, %v3042_v45, %v3044_v47  ;;  %v3046_v56 = vrot.slane %v6536_v48, 2 }
  0xb4   : > { %6230 = vmatprep.mubr.msk.bf16.mxu0 %vm287_vm0, %v2516_v57  ;;  %6194 = vmatprep.mubr.msk.bf16.mxu1 %vm287_vm0, %v1884_v61  ;;  %v3567_v57 = vrot.slane %v6539_v51, 2  ;;  %v6541_v61 = vld [vmem:[%s6649_s22 + $0x50] sm:$0xff]   ;;  %v6554_v51 = vld [vmem:[%s6649_s22 + $0x88] sm:$0xff]  }
  0xb5   : > { %v3047_v62 = vsel %vm3030_vm4, %v3044_v47, %v3046_v56  ;;  %v3049_v0 = vsel %vm3030_vm4, %v3046_v56, %v3048_v58  ;;  %v3569_v2 = vrot.slane %v6541_v61, 2  ;;  %v6562_v56 = vld [vmem:[%s6649_s22 + $0x18] sm:$0xff]   ;;  %v3062_v58 = vrot.slane %v6554_v51, 2 }
  0xb6   : > { %v3568_v7 = vsel %vm3030_vm4, %v3565_v55, %v3567_v57  ;;  %v6561_v55 = vld [vmem:[%s6649_s22 + $0x10] sm:$0xfc]   ;;  %v4087_v63 = vshrl.u32 %v6562_v56, 16 }
  0xb7   : > { %v3570_v6 = vsel %vm3030_vm4, %v3567_v57, %v3569_v2  ;;  %v3581_v57 = vrot.slane %v6555_v46, 2  ;;  %v7124_v46 = vld [vmem:[%s6649_s22 + $0x18] sm:$0xff]  }
  0xbb   : > { %6231 = vmatmul.mubr.msk.bf16.gmra.mrb[84].mxu0 %vm287_vm0, %v2525_v5  ;;  %6195 = vmatmul.mubr.msk.bf16.gmra.mrb[84].mxu1 %vm287_vm0, %v1886_v10  ;;  %v3052_v5 = vrot.slane %v6543_v1, 2  ;;  %v3572_v10 = vsel %vm3030_vm4, %v3569_v2, %v3571_v4 }
  0xbc   : > { %6234 = vmatprep.mubr.msk.bf16.mxu0 %vm287_vm0, %v2534_v11  ;;  %6242 = vmatprep.mubr.msk.bf16.mxu1 %vm287_vm0, %v3033_v14  ;;  %v6545_v11 = vld [vmem:[%s6649_s22 + $0x68] sm:$0xff]   ;;  %v6548_v14 = vld [vmem:[%s6649_s22 + $0x70] sm:$0xff]  }
  0xbd   : > { %v3053_v13 = vsel %vm3030_vm4, %v3050_v3, %v3052_v5  ;;  %v3054_v16 = vrot.slane %v6545_v11, 2  ;;  %v3056_v19 = vrot.slane %v6548_v14, 2  ;;  %v6558_v14 = vld [vmem:[%s6649_s22 + $0x98] ss:$0 sps:$4 sm:$0x33]  }
  0xc3   : > { %6235 = vmatmul.mubr.msk.bf16.gmra.mrb[88].mxu0 %vm287_vm0, %v2543_v23  ;;  %6243 = vmatmul.mubr.msk.bf16.vlgmr.msra.gmra.mrb[88].mxu1 %vm287_vm0, %v3035_v25  ;;  %v6551_v25 = vld [vmem:[%s6649_s22 + $0x70] sm:$0xff]  }
  0xc4   : > { %6282 = vmatprep.mubr.msk.bf16.mxu0 %vm287_vm0, %v3556_v27  ;;  %6319 = vmatpush3.bf16.msra.mxu1 %v6873_v15  ;;  %v3560_v15 = vsel %vm3030_vm4, %v3557_v31, %v3559_v35  ;;  %v6550_v31 = vld [vmem:[%s6649_s22 + $0x78] sm:$0xff]   ;;  %v3057_v35 = vsel %vm3030_vm4, %v3054_v16, %v3056_v19  ;;  %v3577_v37 = vrot.slane %v6551_v25, 2  ;;  %v3066_v25 = vrot.slane %v6558_v14, 2 }
  0xc5   : > { %6246 = vmatprep.mubr.msk.bf16.mxu1 %vm287_vm0, %v3037_v29  ;;  %6320 = vmatprep.subr.bf16.mxu1 %v6542_v30  ;;  %v3055_v29 = vsel %vm3030_vm4, %v3052_v5, %v3054_v16  ;;  %v3058_v38 = vrot.slane %v6550_v31, 2 }
  0xc8   : > { %6321 = vmatpush3.bf16.msra.mxu1 %v6542_v30  ;;  %v3576_v30 = vsel %vm3030_vm4, %v3573_v26, %v3575_v17  ;;  %v7100_v26 = vld [vmem:[%s6649_s22 + $0x98] sm:$0xff]  }
  0xcb   : > { %6283 = vmatmul.mubr.msk.bf16.vlgmr.msra.gmra.mrb[92].mxu0 %vm287_vm0, %v3558_v36  ;;  %6247 = vmatmul.mubr.msk.bf16.gmra.mrb[92].mxu1 %vm287_vm0, %v3039_v39  ;;  %v7048_v36 = vld [vmem:[%s6649_s22 + $0x80] sm:$0xff]   ;;  %v3579_v39 = vrot.slane %v7042_v33, 2 }
  0xcc   : > { %6359 = vmatpush3.bf16.msra.mxu0 %v6888_v32  ;;  %6250 = vmatprep.mubr.msk.bf16.mxu1 %vm287_vm0, %v3041_v41  ;;  %v3043_v32 = vsel %vm3030_vm4, %v3040_v34, %v3042_v45  ;;  %v3060_v41 = vrot.slane %v7048_v36, 2  ;;  %v3578_v45 = vsel %vm3030_vm4, %v3575_v17, %v3577_v37  ;;  %v6563_v36 = vld [vmem:[%s6649_s22 + $0xa0] ss:$0 sps:$4 sm:$0x33]  }
  0xcd   : > { %6286 = vmatprep.mubr.msk.bf16.mxu0 %vm287_vm0, %v3560_v15  ;;  %6360 = vmatprep.subr.bf16.mxu0 %v6547_v43  ;;  %v3580_v50 = vsel %vm3030_vm4, %v3577_v37, %v3579_v39  ;;  %v3582_v5 = vsel %vm3030_vm4, %v3579_v39, %v3581_v57 }
  0xce   : > { %v3061_v54 = vsel %vm3030_vm4, %v3058_v38, %v3060_v41  ;;  %v3063_v11 = vsel %vm3030_vm4, %v3060_v41, %v3062_v58 }
  0xd0   : > { %6361 = vmatpush3.bf16.msra.mxu0 %v6547_v43 }
  0xd3   : > { %6287 = vmatmul.mubr.msk.bf16.gmra.mrb[96].mxu0 %vm287_vm0, %v3562_v49  ;;  %6251 = vmatmul.mubr.msk.bf16.gmra.mrb[96].mxu1 %vm287_vm0, %v3043_v32  ;;  %v3059_v49 = vsel %vm3030_vm4, %v3056_v19, %v3058_v38  ;;  %v7068_v32 = vld [vmem:[%s6649_s22 + $0x90] sm:$0xff]   ;;  %v4089_v19 = vrot.slane %v4087_v63, 2 }
  0xd4   : > { %6290 = vmatprep.mubr.msk.bf16.mxu0 %vm287_vm0, %v3564_v52  ;;  %6254 = vmatprep.mubr.msk.bf16.mxu1 %vm287_vm0, %v3045_v53  ;;  %v7071_v52 = vld [vmem:[%s6649_s22 + $0x88] sm:$0xff]   ;;  %v3064_v59 = vrot.slane %v7068_v32, 2  ;;  %v3589_v32 = vrot.slane %v6563_v36, 2 }
  0xd6   : > { %v3065_v12 = vsel %vm3030_vm4, %v3062_v58, %v3064_v59 }
  0xdb   : > { %6291 = vmatmul.mubr.msk.bf16.gmra.mrb[100].mxu0 %vm287_vm0, %v3566_v60  ;;  %6255 = vmatmul.mubr.msk.bf16.gmra.mrb[100].mxu1 %vm287_vm0, %v3047_v62  ;;  %v3583_v60 = vrot.slane %v7071_v52, 2  ;;  %v4079_v62 = vshrl.u32 %v6561_v55, 16  ;;  %v6570_v52 = vld [vmem:[%s6649_s22 + $0x38] sm:$0xff]  }
  0xdc   : > { %6294 = vmatprep.mubr.msk.bf16.mxu0 %vm287_vm0, %v3568_v7  ;;  %6258 = vmatprep.mubr.msk.bf16.mxu1 %vm287_vm0, %v3049_v0  ;;  %v4082_v7 = vshll.u32 %v6561_v55, 16  ;;  %v4090_v0 = vshll.u32 %v6562_v56, 16  ;;  %v4736_v55 = vrot.slane %v7124_v46, 3 }
  0xdd   : > { %v4081_v17 = vrot.slane %v4079_v62, 2 }
  0xe3   : > { %6295 = vmatmul.mubr.msk.bf16.gmra.mrb[104].mxu0 %vm287_vm0, %v3570_v6  ;;  %6259 = vmatmul.mubr.msk.bf16.gmra.mrb[104].mxu1 %vm287_vm0, %v3051_v9  ;;  %v6559_v6 = vld [vmem:[%s6649_s22 + $0x90] sm:$0xff]  }
  0xe4   : > { %6298 = vmatprep.mubr.msk.bf16.mxu0 %vm287_vm0, %v3572_v10  ;;  %6262 = vmatprep.mubr.msk.bf16.mxu1 %vm287_vm0, %v3053_v13  ;;  %v3584_v13 = vsel %vm3030_vm4, %v3581_v57, %v3583_v60 }
  0xe6   : > { %v6044_v18 = vpop.f32.mrb[0].mxu0  ;;  %v6064_v20 = vpop.f32.mrb[0].mxu1 }
  0xe7   : > { %522 = vst.msk [vmem:[#allocation2 + $0x10] sm:$0xff] %vm519_vm5, %v6044_v18  ;;  %v376_v21 = vpop.f32.mrb[1].mxu0  ;;  %542 = vst.msk [vmem:[#allocation2 + $0xb0] sm:$0xff] %vm519_vm5, %v6064_v20  ;;  %v456_v22 = vpop.f32.mrb[1].mxu1  ;;  %v4084_v18 = vrot.slane %v4082_v7, 3  ;;  %v4092_v20 = vrot.slane %v4090_v0, 3 }
  0xe8   : > { %520 = vst.msk [vmem:[#allocation2] sm:$0xff] %vm519_vm5, %v376_v21  ;;  %v6045_v23 = vpop.f32.mrb[2].mxu0  ;;  %540 = vst.msk [vmem:[#allocation2 + $0xa0] sm:$0xff] %vm519_vm5, %v456_v22  ;;  %v6065_v27 = vpop.f32.mrb[2].mxu1  ;;  %v6565_v21 = vld [vmem:[%s6649_s22 + $0x28] sm:$0xff]   ;;  %v3585_v22 = vrot.slane %v6559_v6, 2 }
  0xe9   : > { %523 = vst.msk [vmem:[#allocation2 + $0x18] sm:$0xff] %vm519_vm5, %v6045_v23  ;;  %v379_v28 = vpop.f32.mrb[3].mxu0  ;;  %543 = vst.msk [vmem:[#allocation2 + $0xb8] sm:$0xff] %vm519_vm5, %v6065_v27  ;;  %v459_v34 = vpop.f32.mrb[3].mxu1  ;;  %v4096_v23 = vshrl.u32 %v6564_v8, 16  ;;  %v3587_v27 = vrot.slane %v7100_v26, 2 }
  0xea   : > { %521 = vst.msk [vmem:[#allocation2 + $0x8] sm:$0xff] %vm519_vm5, %v379_v28  ;;  %541 = vst.msk [vmem:[#allocation2 + $0xa8] sm:$0xff] %vm519_vm5, %v459_v34  ;;  %v4105_v31 = vshrl.u32 %v6565_v21, 16  ;;  %v4108_v33 = vshll.u32 %v6565_v21, 16  ;;  %v3586_v39 = vsel %vm3030_vm4, %v3583_v60, %v3585_v22  ;;  %v4123_v60 = vshrl.u32 %v6570_v52, 16  ;;  %v6569_v0 = vld [vmem:[%s6649_s22 + $0x20] sm:$0xff]  }
  0xeb   : > { %6299 = vmatmul.mubr.msk.bf16.gmra.mrb[108].mxu0 %vm287_vm0, %v3574_v24  ;;  %6263 = vmatmul.mubr.msk.bf16.gmra.mrb[108].mxu1 %vm287_vm0, %v3055_v29  ;;  %v4099_v24 = vshll.u32 %v6564_v8, 16  ;;  %v4085_v29 = vor.u32 %v4084_v18, %v4081_v17  ;;  %v7145_v8 = vld [vmem:[%s6649_s22 + $0x28] sm:$0xff]  }
  0xec   : > { %6302 = vmatprep.mubr.msk.bf16.mxu0 %vm287_vm0, %v3576_v30  ;;  %6266 = vmatprep.mubr.msk.bf16.mxu1 %vm287_vm0, %v3057_v35  ;;  %v4093_v30 = vor.u32 %v4092_v20, %v4089_v19  ;;  %v4110_v51 = vrot.slane %v4108_v33, 3  ;;  %v6574_v17 = vld [vmem:[%s6649_s22 + $0x48] sm:$0xff]  }
  0xed   : > { %v4101_v41 = vrot.slane %v4099_v24, 3  ;;  %v4144_v33 = vshll.u32 %v6574_v17, 16 }
  0xee   : > { %v6048_v40 = vpop.f32.mrb[4].mxu0  ;;  %v6068_v15 = vpop.f32.mrb[4].mxu1  ;;  %v1085_v7 = vld [vmem:[#allocation2 + $0x10] sm:$0xff] }
  0xef   : > { %526 = vst.msk [vmem:[#allocation2 + $0x30] sm:$0xff] %vm519_vm5, %v6048_v40  ;;  %v392_v42 = vpop.f32.mrb[5].mxu0  ;;  %546 = vst.msk [vmem:[#allocation2 + $0xd0] sm:$0xff] %vm519_vm5, %v6068_v15  ;;  %v472_v43 = vpop.f32.mrb[5].mxu1  ;;  %v4098_v40 = vrot.slane %v4096_v23, 2 }
  0xf0   : > { %524 = vst.msk [vmem:[#allocation2 + $0x20] sm:$0xff] %vm519_vm5, %v392_v42  ;;  %v6049_v44 = vpop.f32.mrb[6].mxu0  ;;  %544 = vst.msk [vmem:[#allocation2 + $0xc0] sm:$0xff] %vm519_vm5, %v472_v43  ;;  %v6069_v47 = vpop.f32.mrb[6].mxu1  ;;  %v3067_v43 = vsel %vm3030_vm4, %v3064_v59, %v3066_v25  ;;  %v4738_v25 = vrot.slane %v6569_v0, 3 }
  0xf1   : > { %527 = vst.msk [vmem:[#allocation2 + $0x38] sm:$0xff] %vm519_vm5, %v6049_v44  ;;  %v395_v48 = vpop.f32.mrb[7].mxu0  ;;  %547 = vst.msk [vmem:[#allocation2 + $0xd8] sm:$0xff] %vm519_vm5, %v6069_v47  ;;  %v475_v53 = vpop.f32.mrb[7].mxu1  ;;  %v3588_v44 = vsel %vm3030_vm4, %v3585_v22, %v3587_v27  ;;  %v6568_v47 = vld [vmem:[%s6649_s22 + $0x30] sm:$0xff]   ;;  %v1084_v20 = vld [vmem:[#allocation2 + $0x8] sm:$0xff] }
  0xf2   : > { %525 = vst.msk [vmem:[#allocation2 + $0x28] sm:$0xff] %vm519_vm5, %v395_v48  ;;  %545 = vst.msk [vmem:[#allocation2 + $0xc8] sm:$0xff] %vm519_vm5, %v475_v53  ;;  %v4102_v53 = vor.u32 %v4101_v41, %v4098_v40  ;;  %v4114_v56 = vshrl.u32 %v6568_v47, 16  ;;  %v4117_v57 = vshll.u32 %v6568_v47, 16  ;;  %v4125_v22 = vrot.slane %v4123_v60, 2  ;;  %v7167_v40 = vld [vmem:[%s6649_s22 + $0x30] sm:$0xff]  }
  0xf3   : > { %6303 = vmatmul.mubr.msk.bf16.gmra.mrb[112].mxu0 %vm287_vm0, %v3578_v45  ;;  %6267 = vmatmul.mubr.msk.bf16.gmra.mrb[112].mxu1 %vm287_vm0, %v3059_v49  ;;  %v6566_v45 = vld [vmem:[%s6649_s22 + $0x10] sm:$0xf8]   ;;  %v4094_v49 = vsel %vm4077_vm6, %v4085_v29, %v4093_v30 }
  0xf4   : > { %6306 = vmatprep.mubr.msk.bf16.mxu0 %vm287_vm0, %v3580_v50  ;;  %6270 = vmatprep.mubr.msk.bf16.mxu1 %vm287_vm0, %v3061_v54  ;;  %v4107_v50 = vrot.slane %v4105_v31, 2  ;;  %v4735_v54 = vrot.slane %v6566_v45, 3  ;;  %v4103_v6 = vsel %vm4077_vm6, %v4093_v30, %v4102_v53  ;;  %v4116_v26 = vrot.slane %v4114_v56, 2  ;;  %v6576_v41 = vld [vmem:[%s6649_s22 + $0x50] sm:$0xff]  }
  0xf5   : > { %v4141_v31 = vshrl.u32 %v6574_v17, 16 }
  0xf6   : > { %v6052_v61 = vpop.f32.mrb[8].mxu0  ;;  %v6072_v1 = vpop.f32.mrb[8].mxu1  ;;  %v7137_v59 = vor.u32 %v4110_v51, %v4107_v50  ;;  %v4737_v14 = vsel %vm4734_vm7, %v4735_v54, %v4736_v55 }
  0xf7   : > { %530 = vst.msk [vmem:[#allocation2 + $0x50] sm:$0xff] %vm519_vm5, %v6052_v61  ;;  %v408_v2 = vpop.f32.mrb[9].mxu0  ;;  %550 = vst.msk [vmem:[#allocation2 + $0xf0] sm:$0xff] %vm519_vm5, %v6072_v1  ;;  %v488_v3 = vpop.f32.mrb[9].mxu1  ;;  %v4126_v61 = vshll.u32 %v6570_v52, 16  ;;  %v4143_v54 = vrot.slane %v4141_v31, 2 }
  0xf8   : > { %528 = vst.msk [vmem:[#allocation2 + $0x40] sm:$0xff] %vm519_vm5, %v408_v2  ;;  %v6053_v4 = vpop.f32.mrb[10].mxu0  ;;  %548 = vst.msk [vmem:[#allocation2 + $0xe0] sm:$0xff] %vm519_vm5, %v488_v3  ;;  %v6073_v9 = vpop.f32.mrb[10].mxu1  ;;  %v1083_v3 = vld [vmem:[#allocation2] sm:$0xff]  ;;  %v4112_v21 = vsel %vm4077_vm6, %v4102_v53, %v7137_v59  ;;  %v1090_v52 = vld [vmem:[#allocation2 + $0x38] sm:$0xff] }
  0xf9   : > { %531 = vst.msk [vmem:[#allocation2 + $0x58] sm:$0xff] %vm519_vm5, %v6053_v4  ;;  %v411_v10 = vpop.f32.mrb[11].mxu0  ;;  %551 = vst.msk [vmem:[#allocation2 + $0xf8] sm:$0xff] %vm519_vm5, %v6073_v9  ;;  %v491_v16 = vpop.f32.mrb[11].mxu1  ;;  %v6572_v9 = vld [vmem:[%s6649_s22 + $0x40] sm:$0xff]   ;;  %v4128_v23 = vrot.slane %v4126_v61, 3 }
  0xfa   : > { %529 = vst.msk [vmem:[#allocation2 + $0x48] sm:$0xff] %vm519_vm5, %v411_v10  ;;  %549 = vst.msk [vmem:[#allocation2 + $0xe8] sm:$0xff] %vm519_vm5, %v491_v16  ;;  %v4119_v16 = vrot.slane %v4117_v57, 3  ;;  %v4135_v29 = vshll.u32 %v6572_v9, 16  ;;  %v1088_v61 = vld [vmem:[#allocation2 + $0x28] sm:$0xff] }
  0xfb   : > { %6307 = vmatmul.mubr.msk.bf16.gmra.mrb[116].mxu0 %vm287_vm0, %v3582_v5  ;;  %6271 = vmatmul.mubr.msk.bf16.gmra.mrb[116].mxu1 %vm287_vm0, %v3063_v11  ;;  %v3590_v5 = vsel %vm3030_vm4, %v3587_v27, %v3589_v32  ;;  %v4740_v27 = vrot.slane %v7145_v8, 3 }
  0xfc   : > { %6310 = vmatprep.mubr.msk.bf16.mxu0 %vm287_vm0, %v3584_v13  ;;  %6274 = vmatprep.mubr.msk.bf16.mxu1 %vm287_vm0, %v3065_v12  ;;  %v1086_v12 = vld [vmem:[#allocation2 + $0x18] sm:$0xff]  ;;  %v4120_v30 = vor.u32 %v4119_v16, %v4116_v26  ;;  %v4137_v47 = vrot.slane %v4135_v29, 3  ;;  %v6580_v29 = vld [vmem:[%s6649_s22 + $0x60] sm:$0xff]  }
  0xfd   : > { %v4741_v45 = vsel %vm4734_vm7, %v4738_v25, %v4740_v27 }
  0xfe   : > { %v6056_v28 = vpop.f32.mrb[12].mxu0  ;;  %v6076_v34 = vpop.f32.mrb[12].mxu1  ;;  %v4121_v53 = vsel %vm4077_vm6, %v7137_v59, %v4120_v30  ;;  %v4150_v59 = vshrl.u32 %v6576_v41, 16  ;;  %v1093_v16 = vld [vmem:[#allocation2 + $0x50] sm:$0xff] }
  0xff   : > { %534 = vst.msk [vmem:[#allocation2 + $0x70] sm:$0xff] %vm519_vm5, %v6056_v28  ;;  %v424_v35 = vpop.f32.mrb[13].mxu0  ;;  %554 = vst.msk [vmem:[#allocation2 + $0x110] sm:$0xff] %vm519_vm5, %v6076_v34  ;;  %v504_v37 = vpop.f32.mrb[13].mxu1  ;;  %v4132_v28 = vshrl.u32 %v6572_v9, 16 }
 0x100   : > { %532 = vst.msk [vmem:[#allocation2 + $0x60] sm:$0xff] %vm519_vm5, %v424_v35  ;;  %v6057_v38 = vpop.f32.mrb[14].mxu0  ;;  %552 = vst.msk [vmem:[#allocation2 + $0x100] sm:$0xff] %vm519_vm5, %v504_v37  ;;  %v6077_v15 = vpop.f32.mrb[14].mxu1  ;;  %v7163_v35 = vor.u32 %v4128_v23, %v4125_v22  ;;  %v1089_v37 = vld [vmem:[#allocation2 + $0x30] sm:$0xff]  ;;  %v1091_v22 = vld [vmem:[#allocation2 + $0x40] sm:$0xff] }
 0x101   : > { %535 = vst.msk [vmem:[#allocation2 + $0x78] sm:$0xff] %vm519_vm5, %v6057_v38  ;;  %v427_v42 = vpop.f32.mrb[15].mxu0  ;;  %555 = vst.msk [vmem:[#allocation2 + $0x118] sm:$0xff] %vm519_vm5, %v6077_v15  ;;  %v507_v48 = vpop.f32.mrb[15].mxu1  ;;  %v4134_v46 = vrot.slane %v4132_v28, 2  ;;  %v7204_v28 = vld [vmem:[%s6649_s22 + $0x48] sm:$0xff]  }
 0x102   : > { %533 = vst.msk [vmem:[#allocation2 + $0x68] sm:$0xff] %vm519_vm5, %v427_v42  ;;  %553 = vst.msk [vmem:[#allocation2 + $0x108] sm:$0xff] %vm519_vm5, %v507_v48  ;;  %v7174_v48 = vld [vmem:[%s6649_s22 + $0x38] sm:$0xff]  }
 0x103   : > { %6311 = vmatmul.mubr.msk.bf16.gmra.mrb[120].mxu0 %vm287_vm0, %v3586_v39  ;;  %6275 = vmatmul.mubr.msk.bf16.gmra.mrb[120].mxu1 %vm287_vm0, %v3067_v43  ;;  %v4739_v39 = vsel %vm4734_vm7, %v4736_v55, %v4738_v25  ;;  %v1087_v43 = vld [vmem:[#allocation2 + $0x20] sm:$0xff]  ;;  %v4146_v55 = vrot.slane %v4144_v33, 3  ;;  %v4138_v9 = vor.u32 %v4137_v47, %v4134_v46 }
 0x104   : > { %6314 = vmatprep.mubr.msk.bf16.mxu0 %vm287_vm0, %v3588_v44  ;;  %6322 = vmatprep.mubr.msk.bf16.mxu1 %vm287_vm0, %v4094_v49 }
 0x106   : > { %v6060_v58 = vpop.f32.mrb[16].mxu0  ;;  %v6084_v62 = vpop.f32.mrb[16].mxu1 }
 0x107   : > { %538 = vst.msk [vmem:[#allocation2 + $0x90] sm:$0xff] %vm519_vm5, %v6060_v58  ;;  %v440_v63 = vpop.f32.mrb[17].mxu0  ;;  %v1121_v1 = vadd.f32 %v6084_v62, %v1085_v7  ;;  %v940_v2 = vpop.f32.mrb[17].mxu1  ;;  %v4130_v62 = vsel %vm4077_vm6, %v4120_v30, %v7163_v35  ;;  %v6578_v7 = vld [vmem:[%s6649_s22 + $0x58] sm:$0xff]  }
 0x108   : > { %536 = vst.msk [vmem:[#allocation2 + $0x80] sm:$0xff] %vm519_vm5, %v440_v63  ;;  %v6061_v4 = vpop.f32.mrb[18].mxu0  ;;  %v1119_v10 = vadd.f32 %v1083_v3, %v940_v2  ;;  %v6085_v11 = vpop.f32.mrb[18].mxu1 }
 0x109   : > { %539 = vst.msk [vmem:[#allocation2 + $0x98] sm:$0xff] %vm519_vm5, %v6061_v4  ;;  %v443_v13 = vpop.f32.mrb[19].mxu0  ;;  %1157 = vst.msk [vmem:[#allocation2 + $0x10] sm:$0xff] %vm519_vm5, %v1121_v1  ;;  %v1122_v18 = vadd.f32 %v6085_v11, %v1086_v12  ;;  %v943_v19 = vpop.f32.mrb[19].mxu1  ;;  %v4742_v4 = vrot.slane %v7167_v40, 3  ;;  %v4744_v11 = vrot.slane %v7174_v48, 3 }
 0x10a   : > { %537 = vst.msk [vmem:[#allocation2 + $0x88] sm:$0xff] %vm519_vm5, %v443_v13  ;;  %1155 = vst.msk [vmem:[#allocation2] sm:$0xff] %vm519_vm5, %v1119_v10  ;;  %v1120_v24 = vadd.f32 %v1084_v20, %v943_v19  ;;  %v7192_v10 = vor.u32 %v4146_v55, %v4143_v54  ;;  %v4159_v13 = vshrl.u32 %v6578_v7, 16  ;;  %v7198_v19 = vld [vmem:[%s6649_s22 + $0x40] sm:$0xff]   ;;  %v4748_v54 = vrot.slane %v7204_v28, 3 }
 0x10b   : > { %6315 = vmatmul.mubr.msk.bf16.gmra.mrb[124].mxu0 %vm287_vm0, %v3590_v5  ;;  %1158 = vst.msk [vmem:[#allocation2 + $0x18] sm:$0xff] %vm519_vm5, %v1122_v18  ;;  %6323 = vmatmul.mubr.msk.bf16.vlgmr.msra.gmra.mrb[124].mxu1 %vm287_vm0, %v4103_v6  ;;  %v4153_v5 = vshll.u32 %v6576_v41, 16  ;;  %v4152_v18 = vrot.slane %v4150_v59, 2  ;;  %v4745_v8 = vsel %vm4734_vm7, %v4742_v4, %v4744_v11  ;;  %v4746_v47 = vrot.slane %v7198_v19, 3 }
 0x10c   : > { %6362 = vmatprep.mubr.msk.bf16.mxu0 %vm287_vm0, %v4737_v14  ;;  %1156 = vst.msk [vmem:[#allocation2 + $0x8] sm:$0xff] %vm519_vm5, %v1120_v24  ;;  %6326 = vmatprep.mubr.msk.bf16.mxu1 %vm287_vm0, %v4112_v21  ;;  %v4162_v14 = vshll.u32 %v6578_v7, 16  ;;  %v4743_v24 = vsel %vm4734_vm7, %v4740_v27, %v4742_v4  ;;  %v6582_v27 = vld [vmem:[%s6649_s22 + $0x68] sm:$0xff]  }
 0x10d   : > { %v4155_v25 = vrot.slane %v4153_v5, 3  ;;  %v4177_v55 = vshrl.u32 %v6582_v27, 16  ;;  %v4747_v7 = vsel %vm4734_vm7, %v4744_v11, %v4746_v47  ;;  %v1098_v11 = vld [vmem:[#allocation2 + $0x78] sm:$0xff] }
 0x10e   : > { %v6124_v34 = vpop.f32.mrb[20].mxu0  ;;  %v6088_v36 = vpop.f32.mrb[20].mxu1 }
 0x10f   : > { %v1464_v38 = vpop.f32.mrb[21].mxu0  ;;  %v1125_v15 = vadd.f32 %v6088_v36, %v1089_v37  ;;  %v956_v42 = vpop.f32.mrb[21].mxu1  ;;  %v4139_v37 = vsel %vm4077_vm6, %v7163_v35, %v4138_v9 }
 0x110   : > { %v6125_v44 = vpop.f32.mrb[22].mxu0  ;;  %v1609_v49 = vld [vmem:[#allocation2 + $0x10] sm:$0xff]  ;;  %v1123_v50 = vadd.f32 %v1087_v43, %v956_v42  ;;  %v6089_v51 = vpop.f32.mrb[22].mxu1  ;;  %v1092_v42 = vld [vmem:[#allocation2 + $0x48] sm:$0xff]  ;;  %v4161_v43 = vrot.slane %v4159_v13, 2 }
 0x111   : > { %v1467_v32 = vpop.f32.mrb[23].mxu0  ;;  %1161 = vst.msk [vmem:[#allocation2 + $0x30] sm:$0xff] %vm519_vm5, %v1125_v15  ;;  %v1645_v56 = vadd.f32 %v6124_v34, %v1609_v49  ;;  %v1607_v57 = vld [vmem:[#allocation2] sm:$0xff]  ;;  %v1126_v58 = vadd.f32 %v6089_v51, %v1090_v52  ;;  %v959_v60 = vpop.f32.mrb[23].mxu1  ;;  %v1094_v34 = vld [vmem:[#allocation2 + $0x58] sm:$0xff]  ;;  %v4156_v51 = vor.u32 %v4155_v25, %v4152_v18  ;;  %v4168_v52 = vshrl.u32 %v6580_v29, 16 }
 0x112   : > { %1159 = vst.msk [vmem:[#allocation2 + $0x20] sm:$0xff] %vm519_vm5, %v1123_v50  ;;  %v1643_v63 = vadd.f32 %v1607_v57, %v1464_v38  ;;  %v1610_v0 = vld [vmem:[#allocation2 + $0x18] sm:$0xff]  ;;  %v1124_v1 = vadd.f32 %v1088_v61, %v959_v60  ;;  %v4148_v38 = vsel %vm4077_vm6, %v4138_v9, %v7192_v10  ;;  %v1097_v61 = vld [vmem:[#allocation2 + $0x70] sm:$0xff] }
 0x113   : > { %6363 = vmatmul.mubr.msk.bf16.vlgmr.msra.gmra.mrb[128].mxu0 %vm287_vm0, %v4739_v39  ;;  %1681 = vst.msk [vmem:[#allocation2 + $0x10] sm:$0xff] %vm519_vm5, %v1645_v56  ;;  %1162 = vst.msk [vmem:[#allocation2 + $0x38] sm:$0xff] %vm519_vm5, %v1126_v58  ;;  %v1646_v2 = vadd.f32 %v6125_v44, %v1610_v0  ;;  %v1608_v3 = vld [vmem:[#allocation2 + $0x8] sm:$0xff]  ;;  %6327 = vmatmul.mubr.msk.bf16.gmra.mrb[128].mxu1 %vm287_vm0, %v4121_v53  ;;  %v4164_v44 = vrot.slane %v4162_v14, 3  ;;  %v4180_v56 = vshll.u32 %v6582_v27, 16  ;;  %v7238_v0 = vld [vmem:[%s6649_s22 + $0x58] sm:$0xff]  }
 0x114   : > { %6366 = vmatprep.mubr.msk.bf16.mxu0 %vm287_vm0, %v4741_v45  ;;  %1679 = vst.msk [vmem:[#allocation2] sm:$0xff] %vm519_vm5, %v1643_v63  ;;  %1160 = vst.msk [vmem:[#allocation2 + $0x28] sm:$0xff] %vm519_vm5, %v1124_v1  ;;  %v1644_v6 = vadd.f32 %v1608_v3, %v1467_v32  ;;  %6330 = vmatprep.mubr.msk.bf16.mxu1 %vm287_vm0, %v4130_v62  ;;  %v4171_v32 = vshll.u32 %v6580_v29, 16  ;;  %v7235_v63 = vld [vmem:[%s6649_s22 + $0x50] sm:$0xff]   ;;  %v4157_v4 = vsel %vm4077_vm6, %v7192_v10, %v4156_v51 }
 0x115   : > { %1682 = vst.msk [vmem:[#allocation2 + $0x18] sm:$0xff] %vm519_vm5, %v1646_v2  ;;  %v7228_v58 = vor.u32 %v4164_v44, %v4161_v43  ;;  %v1095_v2 = vld [vmem:[#allocation2 + $0x60] sm:$0xff]  ;;  %v4170_v5 = vrot.slane %v4168_v52, 2  ;;  %v7243_v9 = vld [vmem:[%s6649_s22 + $0x70] sm:$0xff]   ;;  %v7279_v52 = vld [vmem:[%s6649_s22 + $0x68] sm:$0xff]  }
 0x116   : > { %v6128_v12 = vpop.f32.mrb[24].mxu0  ;;  %1680 = vst.msk [vmem:[#allocation2 + $0x8] sm:$0xff] %vm519_vm5, %v1644_v6  ;;  %v6092_v26 = vpop.f32.mrb[24].mxu1  ;;  %v4173_v6 = vrot.slane %v4171_v32, 3  ;;  %v4189_v27 = vshll.u32 %v7243_v9, 16  ;;  %v7270_v44 = vld [vmem:[%s6649_s22 + $0x60] sm:$0xff]  }
 0x117   : > { %v1480_v17 = vpop.f32.mrb[25].mxu0  ;;  %v1129_v20 = vadd.f32 %v6092_v26, %v1093_v16  ;;  %v972_v21 = vpop.f32.mrb[25].mxu1  ;;  %v4749_v26 = vsel %vm4734_vm7, %v4746_v47, %v4748_v54  ;;  %v4179_v16 = vrot.slane %v4177_v55, 2  ;;  %v6588_v32 = vld [vmem:[%s6649_s22 + $0x80] sm:$0xff]  }
 0x118   : > { %v6129_v23 = vpop.f32.mrb[26].mxu0  ;;  %v1613_v30 = vld [vmem:[#allocation2 + $0x30] sm:$0xff]  ;;  %v1127_v31 = vadd.f32 %v1091_v22, %v972_v21  ;;  %v6093_v33 = vpop.f32.mrb[26].mxu1  ;;  %v1096_v21 = vld [vmem:[#allocation2 + $0x68] sm:$0xff]  ;;  %v4166_v22 = vsel %vm4077_vm6, %v4156_v51, %v7228_v58 }
 0x119   : > { %v1483_v36 = vpop.f32.mrb[27].mxu0  ;;  %1165 = vst.msk [vmem:[#allocation2 + $0x50] sm:$0xff] %vm519_vm5, %v1129_v20  ;;  %v1649_v39 = vadd.f32 %v6128_v12, %v1613_v30  ;;  %v1611_v40 = vld [vmem:[#allocation2 + $0x20] sm:$0xff]  ;;  %v1130_v41 = vadd.f32 %v6093_v33, %v1094_v34  ;;  %v975_v15 = vpop.f32.mrb[27].mxu1  ;;  %v4750_v33 = vrot.slane %v7235_v63, 3  ;;  %v4752_v34 = vrot.slane %v7238_v0, 3 }
 0x11a   : > { %1163 = vst.msk [vmem:[#allocation2 + $0x40] sm:$0xff] %vm519_vm5, %v1127_v31  ;;  %v1647_v35 = vadd.f32 %v1611_v40, %v1480_v17  ;;  %v1614_v45 = vld [vmem:[#allocation2 + $0x38] sm:$0xff]  ;;  %v1128_v46 = vadd.f32 %v1092_v42, %v975_v15  ;;  %v4182_v17 = vrot.slane %v4180_v56, 3  ;;  %v1101_v42 = vld [vmem:[#allocation2 + $0x90] sm:$0xff] }
 0x11b   : > { %6367 = vmatmul.mubr.msk.bf16.gmra.mrb[132].mxu0 %vm287_vm0, %v4743_v24  ;;  %1685 = vst.msk [vmem:[#allocation2 + $0x30] sm:$0xff] %vm519_vm5, %v1649_v39  ;;  %1166 = vst.msk [vmem:[#allocation2 + $0x58] sm:$0xff] %vm519_vm5, %v1130_v41  ;;  %v1650_v49 = vadd.f32 %v6129_v23, %v1614_v45  ;;  %v1612_v50 = vld [vmem:[#allocation2 + $0x28] sm:$0xff]  ;;  %6331 = vmatmul.mubr.msk.bf16.gmra.mrb[132].mxu1 %vm287_vm0, %v4139_v37  ;;  %v6586_v23 = vld [vmem:[%s6649_s22 + $0x78] sm:$0xff]  }
 0x11c   : > { %6370 = vmatprep.mubr.msk.bf16.mxu0 %vm287_vm0, %v4745_v8  ;;  %1683 = vst.msk [vmem:[#allocation2 + $0x20] sm:$0xff] %vm519_vm5, %v1647_v35  ;;  %1164 = vst.msk [vmem:[#allocation2 + $0x48] sm:$0xff] %vm519_vm5, %v1128_v46  ;;  %v1648_v53 = vadd.f32 %v1612_v50, %v1483_v36  ;;  %6334 = vmatprep.mubr.msk.bf16.mxu1 %vm287_vm0, %v4148_v38  ;;  %v4186_v36 = vshrl.u32 %v7243_v9, 16  ;;  %v4174_v38 = vor.u32 %v4173_v6, %v4170_v5  ;;  %v1099_v46 = vld [vmem:[#allocation2 + $0x80] sm:$0xff] }
 0x11d   : > { %1686 = vst.msk [vmem:[#allocation2 + $0x38] sm:$0xff] %vm519_vm5, %v1650_v49  ;;  %v7264_v8 = vor.u32 %v4182_v17, %v4179_v16  ;;  %v4195_v40 = vshrl.u32 %v6586_v23, 16  ;;  %v4198_v41 = vshll.u32 %v6586_v23, 16  ;;  %v4751_v49 = vsel %vm4734_vm7, %v4748_v54, %v4750_v33 }
 0x11e   : > { %v6132_v57 = vpop.f32.mrb[28].mxu0  ;;  %1684 = vst.msk [vmem:[#allocation2 + $0x28] sm:$0xff] %vm519_vm5, %v1648_v53  ;;  %v6096_v60 = vpop.f32.mrb[28].mxu1  ;;  %v4753_v50 = vsel %vm4734_vm7, %v4750_v33, %v4752_v34  ;;  %v4188_v51 = vrot.slane %v4186_v36, 2  ;;  %v4191_v54 = vrot.slane %v4189_v27, 3  ;;  %v7314_v27 = vld [vmem:[%s6649_s22 + $0x78] sm:$0xff]  }
 0x11f   : > { %v1496_v62 = vpop.f32.mrb[29].mxu0  ;;  %v1133_v1 = vadd.f32 %v6096_v60, %v1097_v61  ;;  %v988_v59 = vpop.f32.mrb[29].mxu1  ;;  %v4175_v61 = vsel %vm4077_vm6, %v7228_v58, %v4174_v38  ;;  %v4184_v28 = vsel %vm4077_vm6, %v4174_v38, %v7264_v8  ;;  %v4754_v58 = vrot.slane %v7270_v44, 3 }
 0x120   : > { %v6133_v3 = vpop.f32.mrb[30].mxu0  ;;  %v1617_v12 = vld [vmem:[#allocation2 + $0x50] sm:$0xff]  ;;  %v1131_v48 = vadd.f32 %v1095_v2, %v988_v59  ;;  %v6097_v13 = vpop.f32.mrb[30].mxu1  ;;  %v1100_v2 = vld [vmem:[#allocation2 + $0x88] sm:$0xff]  ;;  %v4192_v16 = vor.u32 %v4191_v54, %v4188_v51 }
 0x121   : > { %v1499_v14 = vpop.f32.mrb[31].mxu0  ;;  %1169 = vst.msk [vmem:[#allocation2 + $0x70] sm:$0xff] %vm519_vm5, %v1133_v1  ;;  %v1653_v18 = vadd.f32 %v6132_v57, %v1617_v12  ;;  %v1615_v10 = vld [vmem:[#allocation2 + $0x40] sm:$0xff]  ;;  %v1134_v19 = vadd.f32 %v6097_v13, %v1098_v11  ;;  %v991_v20 = vpop.f32.mrb[31].mxu1  ;;  %v1102_v57 = vld [vmem:[#allocation2 + $0x98] sm:$0xff]  ;;  %v4756_v13 = vrot.slane %v7279_v52, 3  ;;  %v4755_v23 = vsel %vm4734_vm7, %v4752_v34, %v4754_v58 }
 0x122   : > { %1167 = vst.msk [vmem:[#allocation2 + $0x60] sm:$0xff] %vm519_vm5, %v1131_v48  ;;  %v1651_v24 = vadd.f32 %v1615_v10, %v1496_v62  ;;  %v1618_v25 = vld [vmem:[#allocation2 + $0x58] sm:$0xff]  ;;  %v1132_v29 = vadd.f32 %v1096_v21, %v991_v20  ;;  %v6590_v62 = vld [vmem:[%s6649_s22 + $0x88] sm:$0xff]   ;;  %v4204_v11 = vshrl.u32 %v6588_v32, 16  ;;  %v1105_v21 = vld [vmem:[#allocation2 + $0xb0] sm:$0xff] }
 0x123   : > { %6371 = vmatmul.mubr.msk.bf16.gmra.mrb[136].mxu0 %vm287_vm0, %v4747_v7  ;;  %1689 = vst.msk [vmem:[#allocation2 + $0x50] sm:$0xff] %vm519_vm5, %v1653_v18  ;;  %1170 = vst.msk [vmem:[#allocation2 + $0x78] sm:$0xff] %vm519_vm5, %v1134_v19  ;;  %v1654_v30 = vadd.f32 %v6133_v3, %v1618_v25  ;;  %v1616_v31 = vld [vmem:[#allocation2 + $0x48] sm:$0xff]  ;;  %6335 = vmatmul.mubr.msk.bf16.gmra.mrb[136].mxu1 %vm287_vm0, %v4157_v4  ;;  %v4197_v3 = vrot.slane %v4195_v40, 2  ;;  %v4200_v4 = vrot.slane %v4198_v41, 3  ;;  %v4213_v17 = vshrl.u32 %v6590_v62, 16 }
 0x124   : > { %6374 = vmatprep.mubr.msk.bf16.mxu0 %vm287_vm0, %v4749_v26  ;;  %1687 = vst.msk [vmem:[#allocation2 + $0x40] sm:$0xff] %vm519_vm5, %v1651_v24  ;;  %1168 = vst.msk [vmem:[#allocation2 + $0x68] sm:$0xff] %vm519_vm5, %v1132_v29  ;;  %v1652_v37 = vadd.f32 %v1616_v31, %v1499_v14  ;;  %6338 = vmatprep.mubr.msk.bf16.mxu1 %vm287_vm0, %v4166_v22  ;;  %v4207_v14 = vshll.u32 %v6588_v32, 16  ;;  %v4216_v18 = vshll.u32 %v6590_v62, 16  ;;  %v7307_v24 = vld [vmem:[%s6649_s22 + $0x70] sm:$0xff]   ;;  %v1103_v31 = vld [vmem:[#allocation2 + $0xa0] sm:$0xff] }
 0x125   : > { %1690 = vst.msk [vmem:[#allocation2 + $0x58] sm:$0xff] %vm519_vm5, %v1654_v30  ;;  %v7300_v19 = vor.u32 %v4200_v4, %v4197_v3  ;;  %v6592_v25 = vld [vmem:[%s6649_s22 + $0x90] sm:$0xff]   ;;  %v4757_v36 = vsel %vm4734_vm7, %v4754_v58, %v4756_v13  ;;  %v1106_v34 = vld [vmem:[#allocation2 + $0xb8] sm:$0xff]  ;;  %v4760_v62 = vrot.slane %v7314_v27, 3 }
 0x126   : > { %v6136_v39 = vpop.f32.mrb[32].mxu0  ;;  %1688 = vst.msk [vmem:[#allocation2 + $0x48] sm:$0xff] %vm519_vm5, %v1652_v37  ;;  %v6100_v15 = vpop.f32.mrb[32].mxu1  ;;  %v4206_v37 = vrot.slane %v4204_v11, 2  ;;  %v4209_v38 = vrot.slane %v4207_v14, 3 }
 0x127   : > { %v1512_v43 = vpop.f32.mrb[33].mxu0  ;;  %v1137_v35 = vadd.f32 %v6100_v15, %v1101_v42  ;;  %v1004_v45 = vpop.f32.mrb[33].mxu1  ;;  %v4193_v15 = vsel %vm4077_vm6, %v7264_v8, %v4192_v16  ;;  %v4215_v42 = vrot.slane %v4213_v17, 2  ;;  %v4222_v8 = vshrl.u32 %v6592_v25, 16 }
 0x128   : > { %v6137_v47 = vpop.f32.mrb[34].mxu0  ;;  %v1621_v53 = vld [vmem:[#allocation2 + $0x70] sm:$0xff]  ;;  %v1135_v55 = vadd.f32 %v1099_v46, %v1004_v45  ;;  %v6101_v56 = vpop.f32.mrb[34].mxu1  ;;  %v6596_v14 = vld [vmem:[%s6649_s22 + $0xa0] ss:$0 sps:$4 sm:$0x77]  }
 0x129   : > { %v1515_v60 = vpop.f32.mrb[35].mxu0  ;;  %1173 = vst.msk [vmem:[#allocation2 + $0x90] sm:$0xff] %vm519_vm5, %v1137_v35  ;;  %v1657_v7 = vadd.f32 %v6136_v39, %v1621_v53  ;;  %v1619_v63 = vld [vmem:[#allocation2 + $0x60] sm:$0xff]  ;;  %v1138_v1 = vadd.f32 %v6101_v56, %v1102_v57  ;;  %v1007_v59 = vpop.f32.mrb[35].mxu1  ;;  %v4224_v4 = vrot.slane %v4222_v8, 2  ;;  %v7377_v8 = vld [vmem:[%s6649_s22 + $0x98] sm:$0xff]  }
 0x12a   : > { %1171 = vst.msk [vmem:[#allocation2 + $0x80] sm:$0xff] %vm519_vm5, %v1135_v55  ;;  %v1655_v5 = vadd.f32 %v1619_v63, %v1512_v43  ;;  %v1622_v6 = vld [vmem:[#allocation2 + $0x78] sm:$0xff]  ;;  %v1136_v9 = vadd.f32 %v1100_v2, %v1007_v59  ;;  %v4218_v43 = vrot.slane %v4216_v18, 3  ;;  %v4225_v55 = vshll.u32 %v6592_v25, 16  ;;  %v1109_v2 = vld [vmem:[#allocation2 + $0xd0] sm:$0xff] }
 0x12b   : > { %6375 = vmatmul.mubr.msk.bf16.gmra.mrb[140].mxu0 %vm287_vm0, %v4751_v49  ;;  %1693 = vst.msk [vmem:[#allocation2 + $0x70] sm:$0xff] %vm519_vm5, %v1657_v7  ;;  %1174 = vst.msk [vmem:[#allocation2 + $0x98] sm:$0xff] %vm519_vm5, %v1138_v1  ;;  %v1658_v12 = vadd.f32 %v6137_v47, %v1622_v6  ;;  %v1620_v48 = vld [vmem:[#allocation2 + $0x68] sm:$0xff]  ;;  %6339 = vmatmul.mubr.msk.bf16.gmra.mrb[140].mxu1 %vm287_vm0, %v4175_v61  ;;  %v4202_v49 = vsel %vm4077_vm6, %v4192_v16, %v7300_v19  ;;  %v7338_v6 = vld [vmem:[%s6649_s22 + $0x80] sm:$0xff]  }
 0x12c   : > { %6378 = vmatprep.mubr.msk.bf16.mxu0 %vm287_vm0, %v4753_v50  ;;  %1691 = vst.msk [vmem:[#allocation2 + $0x60] sm:$0xff] %vm519_vm5, %v1655_v5  ;;  %1172 = vst.msk [vmem:[#allocation2 + $0x88] sm:$0xff] %vm519_vm5, %v1136_v9  ;;  %v1656_v26 = vadd.f32 %v1620_v48, %v1515_v60  ;;  %6342 = vmatprep.mubr.msk.bf16.mxu1 %vm287_vm0, %v4184_v28  ;;  %v1104_v47 = vld [vmem:[#allocation2 + $0xa8] sm:$0xff]  ;;  %v6594_v50 = vld [vmem:[%s6649_s22 + $0x98] sm:$0xff]   ;;  %v4758_v60 = vrot.slane %v7307_v24, 3  ;;  %v4210_v28 = vor.u32 %v4209_v38, %v4206_v37 }
 0x12d   : > { %1694 = vst.msk [vmem:[#allocation2 + $0x78] sm:$0xff] %vm519_vm5, %v1658_v12  ;;  %v7332_v54 = vor.u32 %v4218_v43, %v4215_v42  ;;  %v4231_v63 = vshrl.u32 %v6594_v50, 16  ;;  %v4234_v1 = vshll.u32 %v6594_v50, 16  ;;  %v4227_v5 = vrot.slane %v4225_v55, 3  ;;  %v1107_v12 = vld [vmem:[#allocation2 + $0xc0] sm:$0xff]  ;;  %v1110_v18 = vld [vmem:[#allocation2 + $0xd8] sm:$0xff] }
 0x12e   : > { %v6140_v10 = vpop.f32.mrb[36].mxu0  ;;  %1692 = vst.msk [vmem:[#allocation2 + $0x68] sm:$0xff] %vm519_vm5, %v1656_v26  ;;  %v6104_v20 = vpop.f32.mrb[36].mxu1  ;;  %v4759_v11 = vsel %vm4734_vm7, %v4756_v13, %v4758_v60 }
 0x12f   : > { %v1528_v22 = vpop.f32.mrb[37].mxu0  ;;  %v1141_v29 = vadd.f32 %v6104_v20, %v1105_v21  ;;  %v1020_v30 = vpop.f32.mrb[37].mxu1  ;;  %v4211_v20 = vsel %vm4077_vm6, %v7300_v19, %v4210_v28  ;;  %v4220_v21 = vsel %vm4077_vm6, %v4210_v28, %v7332_v54 }
 0x130   : > { %v6141_v33 = vpop.f32.mrb[38].mxu0  ;;  %v1625_v39 = vld [vmem:[#allocation2 + $0x90] sm:$0xff]  ;;  %v1139_v0 = vadd.f32 %v1103_v31, %v1020_v30  ;;  %v6105_v40 = vpop.f32.mrb[38].mxu1  ;;  %v4233_v30 = vrot.slane %v4231_v63, 2  ;;  %v4236_v31 = vrot.slane %v4234_v1, 3 }
 0x131   : > { %v1531_v41 = vpop.f32.mrb[39].mxu0  ;;  %1177 = vst.msk [vmem:[#allocation2 + $0xb0] sm:$0xff] %vm519_vm5, %v1141_v29  ;;  %v1661_v44 = vadd.f32 %v6140_v10, %v1625_v39  ;;  %v1623_v35 = vld [vmem:[#allocation2 + $0x80] sm:$0xff]  ;;  %v1142_v45 = vadd.f32 %v6105_v40, %v1106_v34  ;;  %v1023_v46 = vpop.f32.mrb[39].mxu1  ;;  %v1108_v29 = vld [vmem:[#allocation2 + $0xc8] sm:$0xff]  ;;  %v4228_v39 = vor.u32 %v4227_v5, %v4224_v4 }
 0x132   : > { %1175 = vst.msk [vmem:[#allocation2 + $0xa0] sm:$0xff] %vm519_vm5, %v1139_v0  ;;  %v1659_v51 = vadd.f32 %v1623_v35, %v1528_v22  ;;  %v1626_v32 = vld [vmem:[#allocation2 + $0x98] sm:$0xff]  ;;  %v1140_v53 = vadd.f32 %v1104_v47, %v1023_v46  ;;  %v4761_v22 = vsel %vm4734_vm7, %v4758_v60, %v4760_v62  ;;  %v4762_v0 = vrot.slane %v7338_v6, 3  ;;  %v1113_v35 = vld [vmem:[#allocation2 + $0xf0] sm:$0xff] }
 0x133   : > { %6379 = vmatmul.mubr.msk.bf16.gmra.mrb[144].mxu0 %vm287_vm0, %v4755_v23  ;;  %1697 = vst.msk [vmem:[#allocation2 + $0x90] sm:$0xff] %vm519_vm5, %v1661_v44  ;;  %1178 = vst.msk [vmem:[#allocation2 + $0xb8] sm:$0xff] %vm519_vm5, %v1142_v45  ;;  %v1662_v56 = vadd.f32 %v6141_v33, %v1626_v32  ;;  %v1624_v57 = vld [vmem:[#allocation2 + $0x88] sm:$0xff]  ;;  %6343 = vmatmul.mubr.msk.bf16.gmra.mrb[144].mxu1 %vm287_vm0, %v4193_v15  ;;  %v4243_v15 = vshll.u32 %v6596_v14, 16  ;;  %v7367_v43 = vor.u32 %v4236_v31, %v4233_v30  ;;  %v1114_v60 = vld [vmem:[#allocation2 + $0xf8] sm:$0xff] }
 0x134   : > { %6382 = vmatprep.mubr.msk.bf16.mxu0 %vm287_vm0, %v4757_v36  ;;  %1695 = vst.msk [vmem:[#allocation2 + $0x80] sm:$0xff] %vm519_vm5, %v1659_v51  ;;  %1176 = vst.msk [vmem:[#allocation2 + $0xa8] sm:$0xff] %vm519_vm5, %v1140_v53  ;;  %v1660_v61 = vadd.f32 %v1624_v57, %v1531_v41  ;;  %6346 = vmatprep.mubr.msk.bf16.mxu1 %vm287_vm0, %v4202_v49  ;;  %v7352_v23 = vld [vmem:[%s6649_s22 + $0x88] sm:$0xff]   ;;  %v4240_v41 = vshrl.u32 %v6596_v14, 16  ;;  %v1111_v49 = vld [vmem:[#allocation2 + $0xe0] sm:$0xff]  ;;  %v4229_v51 = vsel %vm4077_vm6, %v7332_v54, %v4228_v39 }
 0x135   : > { %1698 = vst.msk [vmem:[#allocation2 + $0x98] sm:$0xff] %vm519_vm5, %v1662_v56  ;;  %v4764_v34 = vrot.slane %v7352_v23, 3  ;;  %v4763_v32 = vsel %vm4734_vm7, %v4760_v62, %v4762_v0  ;;  %v6597_v53 = vld [vmem:[%s6649_s22 + $0x90] sm:$0xff]   ;;  %v4245_v63 = vrot.slane %v4243_v15, 3  ;;  %v4238_v62 = vsel %vm4077_vm6, %v4228_v39, %v7367_v43 }
 0x136   : > { %v6144_v7 = vpop.f32.mrb[40].mxu0  ;;  %1696 = vst.msk [vmem:[#allocation2 + $0x88] sm:$0xff] %vm519_vm5, %v1660_v61  ;;  %v6108_v59 = vpop.f32.mrb[40].mxu1  ;;  %v6599_v23 = vld [vmem:[%s6649_s22 + $0xa0] ss:$0 sps:$4 sm:$0x77]  }
 0x137   : > { %v1544_v3 = vpop.f32.mrb[41].mxu0  ;;  %v1145_v9 = vadd.f32 %v6108_v59, %v1109_v2  ;;  %v1036_v58 = vpop.f32.mrb[41].mxu1  ;;  %v4765_v28 = vsel %vm4734_vm7, %v4762_v0, %v4764_v34  ;;  %v1112_v2 = vld [vmem:[#allocation2 + $0xe8] sm:$0xff]  ;;  %v4770_v15 = vrot.slane %v6599_v23, 3  ;;  %s6403_s22 = smul.u32 144, %s7718_s10 }
 0x138   : > { %v6145_v48 = vpop.f32.mrb[42].mxu0  ;;  %v1629_v26 = vld [vmem:[#allocation2 + $0xb0] sm:$0xff]  ;;  %v1143_v16 = vadd.f32 %v1107_v12, %v1036_v58  ;;  %v6109_v17 = vpop.f32.mrb[42].mxu1  ;;  %v4766_v58 = vrot.slane %v6597_v53, 3 }
 0x139   : > { %v1547_v10 = vpop.f32.mrb[43].mxu0  ;;  %1181 = vst.msk [vmem:[#allocation2 + $0xd0] sm:$0xff] %vm519_vm5, %v1145_v9  ;;  %v1665_v52 = vadd.f32 %v6144_v7, %v1629_v26  ;;  %v1627_v13 = vld [vmem:[#allocation2 + $0xa0] sm:$0xff]  ;;  %v1146_v24 = vadd.f32 %v6109_v17, %v1110_v18  ;;  %v1039_v25 = vpop.f32.mrb[43].mxu1  ;;  %v4242_v7 = vrot.slane %v4240_v41, 2  ;;  %s7578_s27 = scalar_lea.vmem %s7716_s2, %s6403_s22 }
 0x13a   : > { %1179 = vst.msk [vmem:[#allocation2 + $0xc0] sm:$0xff] %vm519_vm5, %v1143_v16  ;;  %v1663_v19 = vadd.f32 %v1627_v13, %v1544_v3  ;;  %v1630_v33 = vld [vmem:[#allocation2 + $0xb8] sm:$0xff]  ;;  %v1144_v36 = vadd.f32 %v1108_v29, %v1039_v25  ;;  %v1117_v16 = vld [vmem:[#allocation2 + $0x110] sm:$0xff] }
 0x13b   : > { %6383 = vmatmul.mubr.msk.bf16.gmra.mrb[148].mxu0 %vm287_vm0, %v4759_v11  ;;  %1701 = vst.msk [vmem:[#allocation2 + $0xb0] sm:$0xff] %vm519_vm5, %v1665_v52  ;;  %1182 = vst.msk [vmem:[#allocation2 + $0xd8] sm:$0xff] %vm519_vm5, %v1146_v24  ;;  %v1666_v37 = vadd.f32 %v6145_v48, %v1630_v33  ;;  %v1628_v38 = vld [vmem:[#allocation2 + $0xa8] sm:$0xff]  ;;  %6347 = vmatmul.mubr.msk.bf16.gmra.mrb[148].mxu1 %vm287_vm0, %v4211_v20  ;;  %v4246_v48 = vor.u32 %v4245_v63, %v4242_v7  ;;  %v4768_v11 = vrot.slane %v7377_v8, 3  ;;  %v1115_v20 = vld [vmem:[#allocation2 + $0x100] sm:$0xff] }
 0x13c   : > { %6386 = vmatprep.mubr.msk.bf16.mxu0 %vm287_vm0, %v4761_v22  ;;  %1699 = vst.msk [vmem:[#allocation2 + $0xa0] sm:$0xff] %vm519_vm5, %v1663_v19  ;;  %1180 = vst.msk [vmem:[#allocation2 + $0xc8] sm:$0xff] %vm519_vm5, %v1144_v36  ;;  %v1664_v40 = vadd.f32 %v1628_v38, %v1547_v10  ;;  %6350 = vmatprep.mubr.msk.bf16.mxu1 %vm287_vm0, %v4220_v21  ;;  %v4767_v22 = vsel %vm4734_vm7, %v4764_v34, %v4766_v58  ;;  %v1118_v25 = vld [vmem:[#allocation2 + $0x118] sm:$0xff]  ;;  %v1116_v38 = vld [vmem:[#allocation2 + $0x108] sm:$0xff] }
 0x13d   : > { %1702 = vst.msk [vmem:[#allocation2 + $0xb8] sm:$0xff] %vm519_vm5, %v1666_v37  ;;  %v4247_v30 = vsel %vm4077_vm6, %v7367_v43, %v4246_v48  ;;  %v4769_v31 = vsel %vm4734_vm7, %v4766_v58, %v4768_v11  ;;  %v2131_v7 = vld [vmem:[#allocation2 + $0x8] sm:$0xff]  ;;  %v2134_v58 = vld [vmem:[#allocation2 + $0x20] sm:$0xff] }
 0x13e   : > { %v6148_v42 = vpop.f32.mrb[44].mxu0  ;;  %1700 = vst.msk [vmem:[#allocation2 + $0xa8] sm:$0xff] %vm519_vm5, %v1664_v40  ;;  %v6112_v44 = vpop.f32.mrb[44].mxu1 }
 0x13f   : > { %v1560_v45 = vpop.f32.mrb[45].mxu0  ;;  %v1149_v46 = vadd.f32 %v6112_v44, %v1113_v35  ;;  %v1052_v47 = vpop.f32.mrb[45].mxu1  ;;  %v2132_v35 = vld [vmem:[#allocation2 + $0x10] sm:$0xff] }
 0x140   : > { %v6149_v50 = vpop.f32.mrb[46].mxu0  ;;  %v1633_v55 = vld [vmem:[#allocation2 + $0xd0] sm:$0xff]  ;;  %v1147_v56 = vadd.f32 %v1111_v49, %v1052_v47  ;;  %v6113_v57 = vpop.f32.mrb[46].mxu1  ;;  %v2130_v49 = vld [vmem:[#allocation2] sm:$0xff] }
 0x141   : > { %v1563_v61 = vpop.f32.mrb[47].mxu0  ;;  %1185 = vst.msk [vmem:[#allocation2 + $0xf0] sm:$0xff] %vm519_vm5, %v1149_v46  ;;  %v1669_v1 = vadd.f32 %v6148_v42, %v1633_v55  ;;  %v1631_v54 = vld [vmem:[#allocation2 + $0xc0] sm:$0xff]  ;;  %v1150_v59 = vadd.f32 %v6113_v57, %v1114_v60  ;;  %v1055_v27 = vpop.f32.mrb[47].mxu1  ;;  %v2133_v55 = vld [vmem:[#allocation2 + $0x18] sm:$0xff] }
 0x142   : > { %1183 = vst.msk [vmem:[#allocation2 + $0xe0] sm:$0xff] %vm519_vm5, %v1147_v56  ;;  %v1667_v3 = vadd.f32 %v1631_v54, %v1560_v45  ;;  %v1634_v4 = vld [vmem:[#allocation2 + $0xd8] sm:$0xff]  ;;  %v1148_v5 = vadd.f32 %v1112_v2, %v1055_v27 }
 0x143   : > { %6387 = vmatmul.mubr.msk.bf16.gmra.mrb[152].mxu0 %vm287_vm0, %v4763_v32  ;;  %1705 = vst.msk [vmem:[#allocation2 + $0xd0] sm:$0xff] %vm519_vm5, %v1669_v1  ;;  %1186 = vst.msk [vmem:[#allocation2 + $0xf8] sm:$0xff] %vm519_vm5, %v1150_v59  ;;  %v1670_v6 = vadd.f32 %v6149_v50, %v1634_v4  ;;  %v1632_v9 = vld [vmem:[#allocation2 + $0xc8] sm:$0xff]  ;;  %6351 = vmatmul.mubr.msk.bf16.gmra.mrb[152].mxu1 %vm287_vm0, %v4229_v51  ;;  %v4771_v51 = vsel %vm4734_vm7, %v4768_v11, %v4770_v15  ;;  %v2136_v4 = vld [vmem:[#allocation2 + $0x30] sm:$0xff] }
 0x144   : > { %6390 = vmatprep.mubr.msk.bf16.mxu0 %vm287_vm0, %v4765_v28  ;;  %1703 = vst.msk [vmem:[#allocation2 + $0xc0] sm:$0xff] %vm519_vm5, %v1667_v3  ;;  %1184 = vst.msk [vmem:[#allocation2 + $0xe8] sm:$0xff] %vm519_vm5, %v1148_v5  ;;  %v1668_v12 = vadd.f32 %v1632_v9, %v1563_v61  ;;  %6354 = vmatprep.mubr.msk.bf16.mxu1 %vm287_vm0, %v4238_v62 }
 0x145   : > { %1706 = vst.msk [vmem:[#allocation2 + $0xd8] sm:$0xff] %vm519_vm5, %v1670_v6 }
 0x146   : > { %v6152_v14 = vpop.f32.mrb[48].mxu0  ;;  %1704 = vst.msk [vmem:[#allocation2 + $0xc8] sm:$0xff] %vm519_vm5, %v1668_v12  ;;  %v6116_v26 = vpop.f32.mrb[48].mxu1 }
 0x147   : > { %v1576_v17 = vpop.f32.mrb[49].mxu0  ;;  %v1153_v18 = vadd.f32 %v6116_v26, %v1117_v16  ;;  %v1068_v10 = vpop.f32.mrb[49].mxu1  ;;  %v2137_v26 = vld [vmem:[#allocation2 + $0x38] sm:$0xff] }
 0x148   : > { %v6153_v21 = vpop.f32.mrb[50].mxu0  ;;  %v1637_v52 = vld [vmem:[#allocation2 + $0xf0] sm:$0xff]  ;;  %v1151_v13 = vadd.f32 %v1115_v20, %v1068_v10  ;;  %v6117_v24 = vpop.f32.mrb[50].mxu1 }
 0x149   : > { %v1579_v29 = vpop.f32.mrb[51].mxu0  ;;  %1189 = vst.msk [vmem:[#allocation2 + $0x110] sm:$0xff] %vm519_vm5, %v1153_v18  ;;  %v1673_v19 = vadd.f32 %v6152_v14, %v1637_v52  ;;  %v1635_v33 = vld [vmem:[#allocation2 + $0xe0] sm:$0xff]  ;;  %v1154_v36 = vadd.f32 %v6117_v24, %v1118_v25  ;;  %v1071_v37 = vpop.f32.mrb[51].mxu1 }
 0x14a   : > { %1187 = vst.msk [vmem:[#allocation2 + $0x100] sm:$0xff] %vm519_vm5, %v1151_v13  ;;  %v1671_v39 = vadd.f32 %v1635_v33, %v1576_v17  ;;  %v1638_v0 = vld [vmem:[#allocation2 + $0xf8] sm:$0xff]  ;;  %v1152_v40 = vadd.f32 %v1116_v38, %v1071_v37  ;;  %v2138_v37 = vld [vmem:[#allocation2 + $0x40] sm:$0xff] }
 0x14b   : > { %6391 = vmatmul.mubr.msk.bf16.gmra.mrb[156].mxu0 %vm287_vm0, %v4767_v22  ;;  %1709 = vst.msk [vmem:[#allocation2 + $0xf0] sm:$0xff] %vm519_vm5, %v1673_v19  ;;  %1190 = vst.msk [vmem:[#allocation2 + $0x118] sm:$0xff] %vm519_vm5, %v1154_v36  ;;  %v1674_v34 = vadd.f32 %v6153_v21, %v1638_v0  ;;  %v1636_v41 = vld [vmem:[#allocation2 + $0xe8] sm:$0xff]  ;;  %6355 = vmatmul.mubr.msk.bf16.gmra.mrb[156].mxu1 %vm287_vm0, %v4247_v30 }
 0x14c   : > { %6394 = vmatprep.mubr.msk.bf16.mxu0 %vm287_vm0, %v4769_v31  ;;  %1707 = vst.msk [vmem:[#allocation2 + $0xe0] sm:$0xff] %vm519_vm5, %v1671_v39  ;;  %1188 = vst.msk [vmem:[#allocation2 + $0x108] sm:$0xff] %vm519_vm5, %v1152_v40  ;;  %v1672_v42 = vadd.f32 %v1636_v41, %v1579_v29  ;;  %v2135_v21 = vld [vmem:[#allocation2 + $0x28] sm:$0xff]  ;;  %v2140_v31 = vld [vmem:[#allocation2 + $0x50] sm:$0xff] }
 0x14d   : > { %1710 = vst.msk [vmem:[#allocation2 + $0xf8] sm:$0xff] %vm519_vm5, %v1674_v34  ;;  %v2141_v34 = vld [vmem:[#allocation2 + $0x58] sm:$0xff] }
 0x14e   : > { %v6156_v43 = vpop.f32.mrb[52].mxu0  ;;  %1708 = vst.msk [vmem:[#allocation2 + $0xe8] sm:$0xff] %vm519_vm5, %v1672_v42  ;;  %v6164_v44 = vpop.f32.mrb[52].mxu1 }
 0x14f   : > { %v1592_v45 = vpop.f32.mrb[53].mxu0  ;;  %v2168_v46 = vadd.f32 %v6164_v44, %v2132_v35  ;;  %v1987_v47 = vpop.f32.mrb[53].mxu1  ;;  %v2139_v35 = vld [vmem:[#allocation2 + $0x48] sm:$0xff] }
 0x150   : > { %v6157_v50 = vpop.f32.mrb[54].mxu0  ;;  %v1641_v32 = vld [vmem:[#allocation2 + $0x110] sm:$0xff]  ;;  %v2166_v53 = vadd.f32 %v2130_v49, %v1987_v47  ;;  %v6165_v8 = vpop.f32.mrb[54].mxu1 }
 0x151   : > { %v1595_v56 = vpop.f32.mrb[55].mxu0  ;;  %v1677_v57 = vadd.f32 %v6156_v43, %v1641_v32  ;;  %2204 = vst.msk [vmem:[#allocation2 + $0x10] sm:$0xff] %vm519_vm5, %v2168_v46  ;;  %v1639_v60 = vld [vmem:[#allocation2 + $0x100] sm:$0xff]  ;;  %v2169_v61 = vadd.f32 %v6165_v8, %v2133_v55  ;;  %v1990_v28 = vpop.f32.mrb[55].mxu1  ;;  %v2144_v8 = vld [vmem:[#allocation2 + $0x70] sm:$0xff] }
 0x152   : > { %v1675_v63 = vadd.f32 %v1639_v60, %v1592_v45  ;;  %2202 = vst.msk [vmem:[#allocation2] sm:$0xff] %vm519_vm5, %v2166_v53  ;;  %v1642_v1 = vld [vmem:[#allocation2 + $0x118] sm:$0xff]  ;;  %v2167_v54 = vadd.f32 %v2131_v7, %v1990_v28  ;;  %v2142_v60 = vld [vmem:[#allocation2 + $0x60] sm:$0xff] }
 0x153   : > { %6395 = vmatmul.mubr.msk.bf16.gmra.mrb[160].mxu0 %vm287_vm0, %v4771_v51  ;;  %1713 = vst.msk [vmem:[#allocation2 + $0x110] sm:$0xff] %vm519_vm5, %v1677_v57  ;;  %v1678_v59 = vadd.f32 %v6157_v50, %v1642_v1  ;;  %2205 = vst.msk [vmem:[#allocation2 + $0x18] sm:$0xff] %vm519_vm5, %v2169_v61  ;;  %v1640_v27 = vld [vmem:[#allocation2 + $0x108] sm:$0xff]  ;;  %v2145_v1 = vld [vmem:[#allocation2 + $0x78] sm:$0xff] }
 0x154   : > { %1711 = vst.msk [vmem:[#allocation2 + $0x100] sm:$0xff] %vm519_vm5, %v1675_v63  ;;  %v1676_v2 = vadd.f32 %v1640_v27, %v1595_v56  ;;  %2203 = vst.msk [vmem:[#allocation2 + $0x8] sm:$0xff] %vm519_vm5, %v2167_v54 }
 0x155   : > { %1714 = vst.msk [vmem:[#allocation2 + $0x118] sm:$0xff] %vm519_vm5, %v1678_v59 }
 0x156   : > { %v6204_v62 = vpop.f32.mrb[56].mxu0  ;;  %1712 = vst.msk [vmem:[#allocation2 + $0x108] sm:$0xff] %vm519_vm5, %v1676_v2  ;;  %v6168_v3 = vpop.f32.mrb[56].mxu1 }
 0x157   : > { %v2644_v5 = vpop.f32.mrb[57].mxu0  ;;  %v2172_v6 = vadd.f32 %v6168_v3, %v2136_v4  ;;  %v2003_v9 = vpop.f32.mrb[57].mxu1  ;;  %v2143_v3 = vld [vmem:[#allocation2 + $0x68] sm:$0xff] }
 0x158   : > { %v6205_v12 = vpop.f32.mrb[58].mxu0  ;;  %v2789_v48 = vld [vmem:[#allocation2 + $0x10] sm:$0xff]  ;;  %v2170_v11 = vadd.f32 %v2134_v58, %v2003_v9  ;;  %v6169_v14 = vpop.f32.mrb[58].mxu1 }
 0x159   : > { %v2647_v16 = vpop.f32.mrb[59].mxu0  ;;  %2208 = vst.msk [vmem:[#allocation2 + $0x30] sm:$0xff] %vm519_vm5, %v2172_v6  ;;  %v2825_v17 = vadd.f32 %v6204_v62, %v2789_v48  ;;  %v2787_v18 = vld [vmem:[#allocation2] sm:$0xff]  ;;  %v2173_v10 = vadd.f32 %v6169_v14, %v2137_v26  ;;  %v2006_v20 = vpop.f32.mrb[59].mxu1  ;;  %v2148_v14 = vld [vmem:[#allocation2 + $0x90] sm:$0xff] }
 0x15a   : > { %2206 = vst.msk [vmem:[#allocation2 + $0x20] sm:$0xff] %vm519_vm5, %v2170_v11  ;;  %v2823_v22 = vadd.f32 %v2787_v18, %v2644_v5  ;;  %v2790_v23 = vld [vmem:[#allocation2 + $0x18] sm:$0xff]  ;;  %v2171_v52 = vadd.f32 %v2135_v21, %v2006_v20  ;;  %v2146_v18 = vld [vmem:[#allocation2 + $0x80] sm:$0xff] }
 0x15b   : > { %2861 = vst.msk [vmem:[#allocation2 + $0x10] sm:$0xff] %vm519_vm5, %v2825_v17  ;;  %2209 = vst.msk [vmem:[#allocation2 + $0x38] sm:$0xff] %vm519_vm5, %v2173_v10  ;;  %v2826_v13 = vadd.f32 %v6205_v12, %v2790_v23  ;;  %v2788_v24 = vld [vmem:[#allocation2 + $0x8] sm:$0xff]  ;;  %v2149_v23 = vld [vmem:[#allocation2 + $0x98] sm:$0xff] }
 0x15c   : > { %2859 = vst.msk [vmem:[#allocation2] sm:$0xff] %vm519_vm5, %v2823_v22  ;;  %2207 = vst.msk [vmem:[#allocation2 + $0x28] sm:$0xff] %vm519_vm5, %v2171_v52  ;;  %v2824_v25 = vadd.f32 %v2788_v24, %v2647_v16 }
 0x15d   : > { %2862 = vst.msk [vmem:[#allocation2 + $0x18] sm:$0xff] %vm519_vm5, %v2826_v13 }
 0x15e   : > { %v6208_v29 = vpop.f32.mrb[60].mxu0  ;;  %2860 = vst.msk [vmem:[#allocation2 + $0x8] sm:$0xff] %vm519_vm5, %v2824_v25  ;;  %v6172_v30 = vpop.f32.mrb[60].mxu1 }
 0x15f   : > { %v2660_v19 = vpop.f32.mrb[61].mxu0  ;;  %v2176_v33 = vadd.f32 %v6172_v30, %v2140_v31  ;;  %v2019_v36 = vpop.f32.mrb[61].mxu1  ;;  %v2147_v30 = vld [vmem:[#allocation2 + $0x88] sm:$0xff] }
 0x160   : > { %v6209_v38 = vpop.f32.mrb[62].mxu0  ;;  %v2793_v39 = vld [vmem:[#allocation2 + $0x30] sm:$0xff]  ;;  %v2174_v0 = vadd.f32 %v2138_v37, %v2019_v36  ;;  %v6173_v40 = vpop.f32.mrb[62].mxu1 }
 0x161   : > { %v2663_v41 = vpop.f32.mrb[63].mxu0  ;;  %2212 = vst.msk [vmem:[#allocation2 + $0x50] sm:$0xff] %vm519_vm5, %v2176_v33  ;;  %v2829_v15 = vadd.f32 %v6208_v29, %v2793_v39  ;;  %v2791_v42 = vld [vmem:[#allocation2 + $0x20] sm:$0xff]  ;;  %v2177_v43 = vadd.f32 %v6173_v40, %v2141_v34  ;;  %v2022_v44 = vpop.f32.mrb[63].mxu1  ;;  %v2152_v40 = vld [vmem:[#allocation2 + $0xb0] sm:$0xff] }
 0x162   : > { %2210 = vst.msk [vmem:[#allocation2 + $0x40] sm:$0xff] %vm519_vm5, %v2174_v0  ;;  %v2827_v45 = vadd.f32 %v2791_v42, %v2660_v19  ;;  %v2794_v46 = vld [vmem:[#allocation2 + $0x38] sm:$0xff]  ;;  %v2175_v47 = vadd.f32 %v2139_v35, %v2022_v44  ;;  %v2150_v42 = vld [vmem:[#allocation2 + $0xa0] sm:$0xff] }
 0x163   : > { %2865 = vst.msk [vmem:[#allocation2 + $0x30] sm:$0xff] %vm519_vm5, %v2829_v15  ;;  %2213 = vst.msk [vmem:[#allocation2 + $0x58] sm:$0xff] %vm519_vm5, %v2177_v43  ;;  %v2830_v49 = vadd.f32 %v6209_v38, %v2794_v46  ;;  %v2792_v50 = vld [vmem:[#allocation2 + $0x28] sm:$0xff]  ;;  %v2153_v46 = vld [vmem:[#allocation2 + $0xb8] sm:$0xff] }
 0x164   : > { %2863 = vst.msk [vmem:[#allocation2 + $0x20] sm:$0xff] %vm519_vm5, %v2827_v45  ;;  %2211 = vst.msk [vmem:[#allocation2 + $0x48] sm:$0xff] %vm519_vm5, %v2175_v47  ;;  %v2828_v51 = vadd.f32 %v2792_v50, %v2663_v41 }
 0x165   : > { %2866 = vst.msk [vmem:[#allocation2 + $0x38] sm:$0xff] %vm519_vm5, %v2830_v49 }
 0x166   : > { %v6212_v32 = vpop.f32.mrb[64].mxu0  ;;  %2864 = vst.msk [vmem:[#allocation2 + $0x28] sm:$0xff] %vm519_vm5, %v2828_v51  ;;  %v6176_v53 = vpop.f32.mrb[64].mxu1 }
 0x167   : > { %v2676_v55 = vpop.f32.mrb[65].mxu0  ;;  %v2180_v56 = vadd.f32 %v6176_v53, %v2144_v8  ;;  %v2035_v57 = vpop.f32.mrb[65].mxu1  ;;  %v2151_v53 = vld [vmem:[#allocation2 + $0xa8] sm:$0xff] }
 0x168   : > { %v6213_v61 = vpop.f32.mrb[66].mxu0  ;;  %v2797_v28 = vld [vmem:[#allocation2 + $0x50] sm:$0xff]  ;;  %v2178_v7 = vadd.f32 %v2142_v60, %v2035_v57  ;;  %v6177_v63 = vpop.f32.mrb[66].mxu1 }
 0x169   : > { %v2679_v54 = vpop.f32.mrb[67].mxu0  ;;  %2216 = vst.msk [vmem:[#allocation2 + $0x70] sm:$0xff] %vm519_vm5, %v2180_v56  ;;  %v2833_v59 = vadd.f32 %v6212_v32, %v2797_v28  ;;  %v2795_v27 = vld [vmem:[#allocation2 + $0x40] sm:$0xff]  ;;  %v2181_v2 = vadd.f32 %v6177_v63, %v2145_v1  ;;  %v2038_v62 = vpop.f32.mrb[67].mxu1  ;;  %v2156_v63 = vld [vmem:[#allocation2 + $0xd0] sm:$0xff] }
 0x16a   : > { %2214 = vst.msk [vmem:[#allocation2 + $0x60] sm:$0xff] %vm519_vm5, %v2178_v7  ;;  %v2831_v4 = vadd.f32 %v2795_v27, %v2676_v55  ;;  %v2798_v5 = vld [vmem:[#allocation2 + $0x58] sm:$0xff]  ;;  %v2179_v6 = vadd.f32 %v2143_v3, %v2038_v62  ;;  %v2154_v27 = vld [vmem:[#allocation2 + $0xc0] sm:$0xff] }
 0x16b   : > { %2869 = vst.msk [vmem:[#allocation2 + $0x50] sm:$0xff] %vm519_vm5, %v2833_v59  ;;  %2217 = vst.msk [vmem:[#allocation2 + $0x78] sm:$0xff] %vm519_vm5, %v2181_v2  ;;  %v2834_v9 = vadd.f32 %v6213_v61, %v2798_v5  ;;  %v2796_v58 = vld [vmem:[#allocation2 + $0x48] sm:$0xff]  ;;  %v2157_v5 = vld [vmem:[#allocation2 + $0xd8] sm:$0xff] }
 0x16c   : > { %2867 = vst.msk [vmem:[#allocation2 + $0x40] sm:$0xff] %vm519_vm5, %v2831_v4  ;;  %2215 = vst.msk [vmem:[#allocation2 + $0x68] sm:$0xff] %vm519_vm5, %v2179_v6  ;;  %v2832_v12 = vadd.f32 %v2796_v58, %v2679_v54 }
 0x16d   : > { %2870 = vst.msk [vmem:[#allocation2 + $0x58] sm:$0xff] %vm519_vm5, %v2834_v9 }
 0x16e   : > { %v6216_v48 = vpop.f32.mrb[68].mxu0  ;;  %2868 = vst.msk [vmem:[#allocation2 + $0x48] sm:$0xff] %vm519_vm5, %v2832_v12  ;;  %v6180_v11 = vpop.f32.mrb[68].mxu1 }
 0x16f   : > { %v2692_v26 = vpop.f32.mrb[69].mxu0  ;;  %v2184_v16 = vadd.f32 %v6180_v11, %v2148_v14  ;;  %v2051_v17 = vpop.f32.mrb[69].mxu1  ;;  %v2155_v11 = vld [vmem:[#allocation2 + $0xc8] sm:$0xff] }
 0x170   : > { %v6217_v10 = vpop.f32.mrb[70].mxu0  ;;  %v2801_v20 = vld [vmem:[#allocation2 + $0x70] sm:$0xff]  ;;  %v2182_v21 = vadd.f32 %v2146_v18, %v2051_v17  ;;  %v6181_v22 = vpop.f32.mrb[70].mxu1 }
 0x171   : > { %v2695_v52 = vpop.f32.mrb[71].mxu0  ;;  %2220 = vst.msk [vmem:[#allocation2 + $0x90] sm:$0xff] %vm519_vm5, %v2184_v16  ;;  %v2837_v13 = vadd.f32 %v6216_v48, %v2801_v20  ;;  %v2799_v24 = vld [vmem:[#allocation2 + $0x60] sm:$0xff]  ;;  %v2185_v25 = vadd.f32 %v6181_v22, %v2149_v23  ;;  %v2054_v29 = vpop.f32.mrb[71].mxu1  ;;  %v2160_v22 = vld [vmem:[#allocation2 + $0xf0] sm:$0xff] }
 0x172   : > { %2218 = vst.msk [vmem:[#allocation2 + $0x80] sm:$0xff] %vm519_vm5, %v2182_v21  ;;  %v2835_v31 = vadd.f32 %v2799_v24, %v2692_v26  ;;  %v2802_v19 = vld [vmem:[#allocation2 + $0x78] sm:$0xff]  ;;  %v2183_v33 = vadd.f32 %v2147_v30, %v2054_v29  ;;  %v2158_v24 = vld [vmem:[#allocation2 + $0xe0] sm:$0xff] }
 0x173   : > { %2873 = vst.msk [vmem:[#allocation2 + $0x70] sm:$0xff] %vm519_vm5, %v2837_v13  ;;  %2221 = vst.msk [vmem:[#allocation2 + $0x98] sm:$0xff] %vm519_vm5, %v2185_v25  ;;  %v2838_v36 = vadd.f32 %v6217_v10, %v2802_v19  ;;  %v2800_v37 = vld [vmem:[#allocation2 + $0x68] sm:$0xff]  ;;  %v2161_v19 = vld [vmem:[#allocation2 + $0xf8] sm:$0xff] }
 0x174   : > { %2871 = vst.msk [vmem:[#allocation2 + $0x60] sm:$0xff] %vm519_vm5, %v2835_v31  ;;  %2219 = vst.msk [vmem:[#allocation2 + $0x88] sm:$0xff] %vm519_vm5, %v2183_v33  ;;  %v2836_v38 = vadd.f32 %v2800_v37, %v2695_v52 }
 0x175   : > { %2874 = vst.msk [vmem:[#allocation2 + $0x78] sm:$0xff] %vm519_vm5, %v2838_v36 }
 0x176   : > { %v6220_v39 = vpop.f32.mrb[72].mxu0  ;;  %2872 = vst.msk [vmem:[#allocation2 + $0x68] sm:$0xff] %vm519_vm5, %v2836_v38  ;;  %v6184_v0 = vpop.f32.mrb[72].mxu1 }
 0x177   : > { %v2708_v34 = vpop.f32.mrb[73].mxu0  ;;  %v2188_v41 = vadd.f32 %v6184_v0, %v2152_v40  ;;  %v2067_v15 = vpop.f32.mrb[73].mxu1  ;;  %v2159_v0 = vld [vmem:[#allocation2 + $0xe8] sm:$0xff] }
 0x178   : > { %v6221_v43 = vpop.f32.mrb[74].mxu0  ;;  %v2805_v44 = vld [vmem:[#allocation2 + $0x90] sm:$0xff]  ;;  %v2186_v35 = vadd.f32 %v2150_v42, %v2067_v15  ;;  %v6185_v45 = vpop.f32.mrb[74].mxu1 }
 0x179   : > { %v2711_v47 = vpop.f32.mrb[75].mxu0  ;;  %2224 = vst.msk [vmem:[#allocation2 + $0xb0] sm:$0xff] %vm519_vm5, %v2188_v41  ;;  %v2841_v49 = vadd.f32 %v6220_v39, %v2805_v44  ;;  %v2803_v50 = vld [vmem:[#allocation2 + $0x80] sm:$0xff]  ;;  %v2189_v51 = vadd.f32 %v6185_v45, %v2153_v46  ;;  %v2070_v32 = vpop.f32.mrb[75].mxu1  ;;  %v2164_v45 = vld [vmem:[#allocation2 + $0x110] sm:$0xff] }
 0x17a   : > { %2222 = vst.msk [vmem:[#allocation2 + $0xa0] sm:$0xff] %vm519_vm5, %v2186_v35  ;;  %v2839_v8 = vadd.f32 %v2803_v50, %v2708_v34  ;;  %v2806_v55 = vld [vmem:[#allocation2 + $0x98] sm:$0xff]  ;;  %v2187_v56 = vadd.f32 %v2151_v53, %v2070_v32  ;;  %v2162_v50 = vld [vmem:[#allocation2 + $0x100] sm:$0xff] }
 0x17b   : > { %2877 = vst.msk [vmem:[#allocation2 + $0x90] sm:$0xff] %vm519_vm5, %v2841_v49  ;;  %2225 = vst.msk [vmem:[#allocation2 + $0xb8] sm:$0xff] %vm519_vm5, %v2189_v51  ;;  %v2842_v57 = vadd.f32 %v6221_v43, %v2806_v55  ;;  %v2804_v60 = vld [vmem:[#allocation2 + $0x88] sm:$0xff]  ;;  %v2165_v55 = vld [vmem:[#allocation2 + $0x118] sm:$0xff] }
 0x17c   : > { %2875 = vst.msk [vmem:[#allocation2 + $0x80] sm:$0xff] %vm519_vm5, %v2839_v8  ;;  %2223 = vst.msk [vmem:[#allocation2 + $0xa8] sm:$0xff] %vm519_vm5, %v2187_v56  ;;  %v2840_v61 = vadd.f32 %v2804_v60, %v2711_v47 }
 0x17d   : > { %2878 = vst.msk [vmem:[#allocation2 + $0x98] sm:$0xff] %vm519_vm5, %v2842_v57 }
 0x17e   : > { %v6224_v28 = vpop.f32.mrb[76].mxu0  ;;  %2876 = vst.msk [vmem:[#allocation2 + $0x88] sm:$0xff] %vm519_vm5, %v2840_v61  ;;  %v6188_v7 = vpop.f32.mrb[76].mxu1 }
 0x17f   : > { %v2724_v1 = vpop.f32.mrb[77].mxu0  ;;  %v2192_v54 = vadd.f32 %v6188_v7, %v2156_v63  ;;  %v2083_v59 = vpop.f32.mrb[77].mxu1  ;;  %v2163_v7 = vld [vmem:[#allocation2 + $0x108] sm:$0xff] }
 0x180   : > { %v6225_v2 = vpop.f32.mrb[78].mxu0  ;;  %v2809_v62 = vld [vmem:[#allocation2 + $0xb0] sm:$0xff]  ;;  %v2190_v3 = vadd.f32 %v2154_v27, %v2083_v59  ;;  %v6189_v4 = vpop.f32.mrb[78].mxu1 }
 0x181   : > { %v2727_v6 = vpop.f32.mrb[79].mxu0  ;;  %2228 = vst.msk [vmem:[#allocation2 + $0xd0] sm:$0xff] %vm519_vm5, %v2192_v54  ;;  %v2845_v9 = vadd.f32 %v6224_v28, %v2809_v62  ;;  %v2807_v58 = vld [vmem:[#allocation2 + $0xa0] sm:$0xff]  ;;  %v2193_v12 = vadd.f32 %v6189_v4, %v2157_v5  ;;  %v2086_v48 = vpop.f32.mrb[79].mxu1  ;;  %v3313_v4 = vld [vmem:[#allocation2 + $0x10] sm:$0xff] }
 0x182   : > { %2226 = vst.msk [vmem:[#allocation2 + $0xc0] sm:$0xff] %vm519_vm5, %v2190_v3  ;;  %v2843_v14 = vadd.f32 %v2807_v58, %v2724_v1  ;;  %v2810_v26 = vld [vmem:[#allocation2 + $0xb8] sm:$0xff]  ;;  %v2191_v16 = vadd.f32 %v2155_v11, %v2086_v48  ;;  %v3311_v58 = vld [vmem:[#allocation2] sm:$0xff] }
 0x183   : > { %2881 = vst.msk [vmem:[#allocation2 + $0xb0] sm:$0xff] %vm519_vm5, %v2845_v9  ;;  %2229 = vst.msk [vmem:[#allocation2 + $0xd8] sm:$0xff] %vm519_vm5, %v2193_v12  ;;  %v2846_v17 = vadd.f32 %v6225_v2, %v2810_v26  ;;  %v2808_v18 = vld [vmem:[#allocation2 + $0xa8] sm:$0xff]  ;;  %v3314_v26 = vld [vmem:[#allocation2 + $0x18] sm:$0xff] }
 0x184   : > { %2879 = vst.msk [vmem:[#allocation2 + $0xa0] sm:$0xff] %vm519_vm5, %v2843_v14  ;;  %2227 = vst.msk [vmem:[#allocation2 + $0xc8] sm:$0xff] %vm519_vm5, %v2191_v16  ;;  %v2844_v10 = vadd.f32 %v2808_v18, %v2727_v6 }
 0x185   : > { %2882 = vst.msk [vmem:[#allocation2 + $0xb8] sm:$0xff] %vm519_vm5, %v2846_v17 }
 0x186   : > { %v6228_v20 = vpop.f32.mrb[80].mxu0  ;;  %2880 = vst.msk [vmem:[#allocation2 + $0xa8] sm:$0xff] %vm519_vm5, %v2844_v10  ;;  %v6192_v21 = vpop.f32.mrb[80].mxu1 }
 0x187   : > { %v2740_v23 = vpop.f32.mrb[81].mxu0  ;;  %v2196_v52 = vadd.f32 %v6192_v21, %v2160_v22  ;;  %v2099_v13 = vpop.f32.mrb[81].mxu1  ;;  %v3312_v21 = vld [vmem:[#allocation2 + $0x8] sm:$0xff] }
 0x188   : > { %v6229_v25 = vpop.f32.mrb[82].mxu0  ;;  %v2813_v29 = vld [vmem:[#allocation2 + $0xd0] sm:$0xff]  ;;  %v2194_v30 = vadd.f32 %v2158_v24, %v2099_v13  ;;  %v6193_v31 = vpop.f32.mrb[82].mxu1 }
 0x189   : > { %v2743_v33 = vpop.f32.mrb[83].mxu0  ;;  %2232 = vst.msk [vmem:[#allocation2 + $0xf0] sm:$0xff] %vm519_vm5, %v2196_v52  ;;  %v2849_v36 = vadd.f32 %v6228_v20, %v2813_v29  ;;  %v2811_v37 = vld [vmem:[#allocation2 + $0xc0] sm:$0xff]  ;;  %v2197_v38 = vadd.f32 %v6193_v31, %v2161_v19  ;;  %v2102_v39 = vpop.f32.mrb[83].mxu1  ;;  %v3317_v31 = vld [vmem:[#allocation2 + $0x30] sm:$0xff] }
 0x18a   : > { %2230 = vst.msk [vmem:[#allocation2 + $0xe0] sm:$0xff] %vm519_vm5, %v2194_v30  ;;  %v2847_v40 = vadd.f32 %v2811_v37, %v2740_v23  ;;  %v2814_v34 = vld [vmem:[#allocation2 + $0xd8] sm:$0xff]  ;;  %v2195_v41 = vadd.f32 %v2159_v0, %v2102_v39  ;;  %v3315_v37 = vld [vmem:[#allocation2 + $0x20] sm:$0xff] }
 0x18b   : > { %2885 = vst.msk [vmem:[#allocation2 + $0xd0] sm:$0xff] %vm519_vm5, %v2849_v36  ;;  %2233 = vst.msk [vmem:[#allocation2 + $0xf8] sm:$0xff] %vm519_vm5, %v2197_v38  ;;  %v2850_v15 = vadd.f32 %v6229_v25, %v2814_v34  ;;  %v2812_v42 = vld [vmem:[#allocation2 + $0xc8] sm:$0xff]  ;;  %v3318_v34 = vld [vmem:[#allocation2 + $0x38] sm:$0xff] }
 0x18c   : > { %2883 = vst.msk [vmem:[#allocation2 + $0xc0] sm:$0xff] %vm519_vm5, %v2847_v40  ;;  %2231 = vst.msk [vmem:[#allocation2 + $0xe8] sm:$0xff] %vm519_vm5, %v2195_v41  ;;  %v2848_v43 = vadd.f32 %v2812_v42, %v2743_v33 }
 0x18d   : > { %2886 = vst.msk [vmem:[#allocation2 + $0xd8] sm:$0xff] %vm519_vm5, %v2850_v15 }
 0x18e   : > { %v6232_v44 = vpop.f32.mrb[84].mxu0  ;;  %2884 = vst.msk [vmem:[#allocation2 + $0xc8] sm:$0xff] %vm519_vm5, %v2848_v43  ;;  %v6196_v35 = vpop.f32.mrb[84].mxu1 }
 0x18f   : > { %v2756_v46 = vpop.f32.mrb[85].mxu0  ;;  %v2200_v47 = vadd.f32 %v6196_v35, %v2164_v45  ;;  %v2115_v49 = vpop.f32.mrb[85].mxu1  ;;  %v3316_v35 = vld [vmem:[#allocation2 + $0x28] sm:$0xff] }
 0x190   : > { %v6233_v51 = vpop.f32.mrb[86].mxu0  ;;  %v2817_v32 = vld [vmem:[#allocation2 + $0xf0] sm:$0xff]  ;;  %v2198_v53 = vadd.f32 %v2162_v50, %v2115_v49  ;;  %v6197_v8 = vpop.f32.mrb[86].mxu1 }
 0x191   : > { %v2759_v56 = vpop.f32.mrb[87].mxu0  ;;  %2236 = vst.msk [vmem:[#allocation2 + $0x110] sm:$0xff] %vm519_vm5, %v2200_v47  ;;  %v2853_v57 = vadd.f32 %v6232_v44, %v2817_v32  ;;  %v2815_v60 = vld [vmem:[#allocation2 + $0xe0] sm:$0xff]  ;;  %v2201_v61 = vadd.f32 %v6197_v8, %v2165_v55  ;;  %v2118_v28 = vpop.f32.mrb[87].mxu1  ;;  %v3321_v8 = vld [vmem:[#allocation2 + $0x50] sm:$0xff] }
 0x192   : > { %2234 = vst.msk [vmem:[#allocation2 + $0x100] sm:$0xff] %vm519_vm5, %v2198_v53  ;;  %v2851_v63 = vadd.f32 %v2815_v60, %v2756_v46  ;;  %v2818_v1 = vld [vmem:[#allocation2 + $0xf8] sm:$0xff]  ;;  %v2199_v54 = vadd.f32 %v2163_v7, %v2118_v28  ;;  %v3319_v60 = vld [vmem:[#allocation2 + $0x40] sm:$0xff] }
 0x193   : > { %2889 = vst.msk [vmem:[#allocation2 + $0xf0] sm:$0xff] %vm519_vm5, %v2853_v57  ;;  %2237 = vst.msk [vmem:[#allocation2 + $0x118] sm:$0xff] %vm519_vm5, %v2201_v61  ;;  %v2854_v59 = vadd.f32 %v6233_v51, %v2818_v1  ;;  %v2816_v27 = vld [vmem:[#allocation2 + $0xe8] sm:$0xff]  ;;  %v3322_v1 = vld [vmem:[#allocation2 + $0x58] sm:$0xff] }
 0x194   : > { %2887 = vst.msk [vmem:[#allocation2 + $0xe0] sm:$0xff] %vm519_vm5, %v2851_v63  ;;  %2235 = vst.msk [vmem:[#allocation2 + $0x108] sm:$0xff] %vm519_vm5, %v2199_v54  ;;  %v2852_v2 = vadd.f32 %v2816_v27, %v2759_v56 }
 0x195   : > { %2890 = vst.msk [vmem:[#allocation2 + $0xf8] sm:$0xff] %vm519_vm5, %v2854_v59 }
 0x196   : > { %v6236_v62 = vpop.f32.mrb[88].mxu0  ;;  %2888 = vst.msk [vmem:[#allocation2 + $0xe8] sm:$0xff] %vm519_vm5, %v2852_v2  ;;  %v6244_v3 = vpop.f32.mrb[88].mxu1 }
 0x197   : > { %v2772_v5 = vpop.f32.mrb[89].mxu0  ;;  %v3349_v6 = vadd.f32 %v6244_v3, %v3313_v4  ;;  %v3168_v9 = vpop.f32.mrb[89].mxu1  ;;  %v3320_v3 = vld [vmem:[#allocation2 + $0x48] sm:$0xff] }
 0x198   : > { %v6237_v12 = vpop.f32.mrb[90].mxu0  ;;  %v2821_v48 = vld [vmem:[#allocation2 + $0x110] sm:$0xff]  ;;  %v3347_v11 = vadd.f32 %v3311_v58, %v3168_v9  ;;  %v6245_v14 = vpop.f32.mrb[90].mxu1 }
 0x199   : > { %v2775_v16 = vpop.f32.mrb[91].mxu0  ;;  %v2857_v17 = vadd.f32 %v6236_v62, %v2821_v48  ;;  %3385 = vst.msk [vmem:[#allocation2 + $0x10] sm:$0xff] %vm519_vm5, %v3349_v6  ;;  %v2819_v18 = vld [vmem:[#allocation2 + $0x100] sm:$0xff]  ;;  %v3350_v10 = vadd.f32 %v6245_v14, %v3314_v26  ;;  %v3171_v20 = vpop.f32.mrb[91].mxu1  ;;  %v3325_v14 = vld [vmem:[#allocation2 + $0x70] sm:$0xff] }
 0x19a   : > { %v2855_v22 = vadd.f32 %v2819_v18, %v2772_v5  ;;  %3383 = vst.msk [vmem:[#allocation2] sm:$0xff] %vm519_vm5, %v3347_v11  ;;  %v2822_v23 = vld [vmem:[#allocation2 + $0x118] sm:$0xff]  ;;  %v3348_v52 = vadd.f32 %v3312_v21, %v3171_v20  ;;  %v3323_v18 = vld [vmem:[#allocation2 + $0x60] sm:$0xff] }
 0x19b   : > { %2893 = vst.msk [vmem:[#allocation2 + $0x110] sm:$0xff] %vm519_vm5, %v2857_v17  ;;  %v2858_v13 = vadd.f32 %v6237_v12, %v2822_v23  ;;  %3386 = vst.msk [vmem:[#allocation2 + $0x18] sm:$0xff] %vm519_vm5, %v3350_v10  ;;  %v2820_v24 = vld [vmem:[#allocation2 + $0x108] sm:$0xff]  ;;  %v3326_v23 = vld [vmem:[#allocation2 + $0x78] sm:$0xff] }
 0x19c   : > { %2891 = vst.msk [vmem:[#allocation2 + $0x100] sm:$0xff] %vm519_vm5, %v2855_v22  ;;  %v2856_v25 = vadd.f32 %v2820_v24, %v2775_v16  ;;  %3384 = vst.msk [vmem:[#allocation2 + $0x8] sm:$0xff] %vm519_vm5, %v3348_v52 }
 0x19d   : > { %2894 = vst.msk [vmem:[#allocation2 + $0x118] sm:$0xff] %vm519_vm5, %v2858_v13 }
 0x19e   : > { %v6284_v29 = vpop.f32.mrb[92].mxu0  ;;  %2892 = vst.msk [vmem:[#allocation2 + $0x108] sm:$0xff] %vm519_vm5, %v2856_v25  ;;  %v6248_v30 = vpop.f32.mrb[92].mxu1 }
 0x19f   : > { %v3691_v19 = vpop.f32.mrb[93].mxu0  ;;  %v3353_v33 = vadd.f32 %v6248_v30, %v3317_v31  ;;  %v3184_v36 = vpop.f32.mrb[93].mxu1  ;;  %v3324_v30 = vld [vmem:[#allocation2 + $0x68] sm:$0xff] }
 0x1a0   : > { %v6285_v38 = vpop.f32.mrb[94].mxu0  ;;  %v3836_v39 = vld [vmem:[#allocation2 + $0x10] sm:$0xff]  ;;  %v3351_v0 = vadd.f32 %v3315_v37, %v3184_v36  ;;  %v6249_v40 = vpop.f32.mrb[94].mxu1 }
 0x1a1   : > { %v3694_v41 = vpop.f32.mrb[95].mxu0  ;;  %3389 = vst.msk [vmem:[#allocation2 + $0x30] sm:$0xff] %vm519_vm5, %v3353_v33  ;;  %v3872_v15 = vadd.f32 %v6284_v29, %v3836_v39  ;;  %v3834_v42 = vld [vmem:[#allocation2] sm:$0xff]  ;;  %v3354_v43 = vadd.f32 %v6249_v40, %v3318_v34  ;;  %v3187_v44 = vpop.f32.mrb[95].mxu1  ;;  %v3329_v40 = vld [vmem:[#allocation2 + $0x90] sm:$0xff] }
 0x1a2   : > { %3387 = vst.msk [vmem:[#allocation2 + $0x20] sm:$0xff] %vm519_vm5, %v3351_v0  ;;  %v3870_v45 = vadd.f32 %v3834_v42, %v3691_v19  ;;  %v3837_v46 = vld [vmem:[#allocation2 + $0x18] sm:$0xff]  ;;  %v3352_v47 = vadd.f32 %v3316_v35, %v3187_v44  ;;  %v3327_v42 = vld [vmem:[#allocation2 + $0x80] sm:$0xff] }
 0x1a3   : > { %3908 = vst.msk [vmem:[#allocation2 + $0x10] sm:$0xff] %vm519_vm5, %v3872_v15  ;;  %3390 = vst.msk [vmem:[#allocation2 + $0x38] sm:$0xff] %vm519_vm5, %v3354_v43  ;;  %v3873_v49 = vadd.f32 %v6285_v38, %v3837_v46  ;;  %v3835_v50 = vld [vmem:[#allocation2 + $0x8] sm:$0xff]  ;;  %v3330_v46 = vld [vmem:[#allocation2 + $0x98] sm:$0xff] }
 0x1a4   : > { %3906 = vst.msk [vmem:[#allocation2] sm:$0xff] %vm519_vm5, %v3870_v45  ;;  %3388 = vst.msk [vmem:[#allocation2 + $0x28] sm:$0xff] %vm519_vm5, %v3352_v47  ;;  %v3871_v51 = vadd.f32 %v3835_v50, %v3694_v41 }
 0x1a5   : > { %3909 = vst.msk [vmem:[#allocation2 + $0x18] sm:$0xff] %vm519_vm5, %v3873_v49 }
 0x1a6   : > { %v6288_v32 = vpop.f32.mrb[96].mxu0  ;;  %3907 = vst.msk [vmem:[#allocation2 + $0x8] sm:$0xff] %vm519_vm5, %v3871_v51  ;;  %v6252_v53 = vpop.f32.mrb[96].mxu1 }
 0x1a7   : > { %v3707_v55 = vpop.f32.mrb[97].mxu0  ;;  %v3357_v56 = vadd.f32 %v6252_v53, %v3321_v8  ;;  %v3200_v57 = vpop.f32.mrb[97].mxu1  ;;  %v3328_v53 = vld [vmem:[#allocation2 + $0x88] sm:$0xff] }
 0x1a8   : > { %v6289_v61 = vpop.f32.mrb[98].mxu0  ;;  %v3840_v28 = vld [vmem:[#allocation2 + $0x30] sm:$0xff]  ;;  %v3355_v7 = vadd.f32 %v3319_v60, %v3200_v57  ;;  %v6253_v63 = vpop.f32.mrb[98].mxu1 }
 0x1a9   : > { %v3710_v54 = vpop.f32.mrb[99].mxu0  ;;  %3393 = vst.msk [vmem:[#allocation2 + $0x50] sm:$0xff] %vm519_vm5, %v3357_v56  ;;  %v3876_v59 = vadd.f32 %v6288_v32, %v3840_v28  ;;  %v3838_v27 = vld [vmem:[#allocation2 + $0x20] sm:$0xff]  ;;  %v3358_v2 = vadd.f32 %v6253_v63, %v3322_v1  ;;  %v3203_v62 = vpop.f32.mrb[99].mxu1  ;;  %v3333_v63 = vld [vmem:[#allocation2 + $0xb0] sm:$0xff] }
 0x1aa   : > { %3391 = vst.msk [vmem:[#allocation2 + $0x40] sm:$0xff] %vm519_vm5, %v3355_v7  ;;  %v3874_v4 = vadd.f32 %v3838_v27, %v3707_v55  ;;  %v3841_v5 = vld [vmem:[#allocation2 + $0x38] sm:$0xff]  ;;  %v3356_v6 = vadd.f32 %v3320_v3, %v3203_v62  ;;  %v3331_v27 = vld [vmem:[#allocation2 + $0xa0] sm:$0xff] }
 0x1ab   : > { %3912 = vst.msk [vmem:[#allocation2 + $0x30] sm:$0xff] %vm519_vm5, %v3876_v59  ;;  %3394 = vst.msk [vmem:[#allocation2 + $0x58] sm:$0xff] %vm519_vm5, %v3358_v2  ;;  %v3877_v9 = vadd.f32 %v6289_v61, %v3841_v5  ;;  %v3839_v58 = vld [vmem:[#allocation2 + $0x28] sm:$0xff]  ;;  %v3334_v5 = vld [vmem:[#allocation2 + $0xb8] sm:$0xff] }
 0x1ac   : > { %3910 = vst.msk [vmem:[#allocation2 + $0x20] sm:$0xff] %vm519_vm5, %v3874_v4  ;;  %3392 = vst.msk [vmem:[#allocation2 + $0x48] sm:$0xff] %vm519_vm5, %v3356_v6  ;;  %v3875_v12 = vadd.f32 %v3839_v58, %v3710_v54 }
 0x1ad   : > { %3913 = vst.msk [vmem:[#allocation2 + $0x38] sm:$0xff] %vm519_vm5, %v3877_v9 }
 0x1ae   : > { %v6292_v48 = vpop.f32.mrb[100].mxu0  ;;  %3911 = vst.msk [vmem:[#allocation2 + $0x28] sm:$0xff] %vm519_vm5, %v3875_v12  ;;  %v6256_v11 = vpop.f32.mrb[100].mxu1 }
 0x1af   : > { %v3723_v26 = vpop.f32.mrb[101].mxu0  ;;  %v3361_v16 = vadd.f32 %v6256_v11, %v3325_v14  ;;  %v3216_v17 = vpop.f32.mrb[101].mxu1  ;;  %v3332_v11 = vld [vmem:[#allocation2 + $0xa8] sm:$0xff] }
 0x1b0   : > { %v6293_v10 = vpop.f32.mrb[102].mxu0  ;;  %v3844_v20 = vld [vmem:[#allocation2 + $0x50] sm:$0xff]  ;;  %v3359_v21 = vadd.f32 %v3323_v18, %v3216_v17  ;;  %v6257_v22 = vpop.f32.mrb[102].mxu1 }
 0x1b1   : > { %v3726_v52 = vpop.f32.mrb[103].mxu0  ;;  %3397 = vst.msk [vmem:[#allocation2 + $0x70] sm:$0xff] %vm519_vm5, %v3361_v16  ;;  %v3880_v13 = vadd.f32 %v6292_v48, %v3844_v20  ;;  %v3842_v24 = vld [vmem:[#allocation2 + $0x40] sm:$0xff]  ;;  %v3362_v25 = vadd.f32 %v6257_v22, %v3326_v23  ;;  %v3219_v29 = vpop.f32.mrb[103].mxu1  ;;  %v3337_v22 = vld [vmem:[#allocation2 + $0xd0] sm:$0xff] }
 0x1b2   : > { %3395 = vst.msk [vmem:[#allocation2 + $0x60] sm:$0xff] %vm519_vm5, %v3359_v21  ;;  %v3878_v31 = vadd.f32 %v3842_v24, %v3723_v26  ;;  %v3845_v19 = vld [vmem:[#allocation2 + $0x58] sm:$0xff]  ;;  %v3360_v33 = vadd.f32 %v3324_v30, %v3219_v29  ;;  %v3335_v24 = vld [vmem:[#allocation2 + $0xc0] sm:$0xff] }
 0x1b3   : > { %3916 = vst.msk [vmem:[#allocation2 + $0x50] sm:$0xff] %vm519_vm5, %v3880_v13  ;;  %3398 = vst.msk [vmem:[#allocation2 + $0x78] sm:$0xff] %vm519_vm5, %v3362_v25  ;;  %v3881_v36 = vadd.f32 %v6293_v10, %v3845_v19  ;;  %v3843_v37 = vld [vmem:[#allocation2 + $0x48] sm:$0xff]  ;;  %v3338_v19 = vld [vmem:[#allocation2 + $0xd8] sm:$0xff] }
 0x1b4   : > { %3914 = vst.msk [vmem:[#allocation2 + $0x40] sm:$0xff] %vm519_vm5, %v3878_v31  ;;  %3396 = vst.msk [vmem:[#allocation2 + $0x68] sm:$0xff] %vm519_vm5, %v3360_v33  ;;  %v3879_v38 = vadd.f32 %v3843_v37, %v3726_v52 }
 0x1b5   : > { %3917 = vst.msk [vmem:[#allocation2 + $0x58] sm:$0xff] %vm519_vm5, %v3881_v36 }
 0x1b6   : > { %v6296_v39 = vpop.f32.mrb[104].mxu0  ;;  %3915 = vst.msk [vmem:[#allocation2 + $0x48] sm:$0xff] %vm519_vm5, %v3879_v38  ;;  %v6260_v0 = vpop.f32.mrb[104].mxu1 }
 0x1b7   : > { %v3739_v34 = vpop.f32.mrb[105].mxu0  ;;  %v3365_v41 = vadd.f32 %v6260_v0, %v3329_v40  ;;  %v3232_v15 = vpop.f32.mrb[105].mxu1  ;;  %v3336_v0 = vld [vmem:[#allocation2 + $0xc8] sm:$0xff] }
 0x1b8   : > { %v6297_v43 = vpop.f32.mrb[106].mxu0  ;;  %v3848_v44 = vld [vmem:[#allocation2 + $0x70] sm:$0xff]  ;;  %v3363_v35 = vadd.f32 %v3327_v42, %v3232_v15  ;;  %v6261_v45 = vpop.f32.mrb[106].mxu1 }
 0x1b9   : > { %v3742_v47 = vpop.f32.mrb[107].mxu0  ;;  %3401 = vst.msk [vmem:[#allocation2 + $0x90] sm:$0xff] %vm519_vm5, %v3365_v41  ;;  %v3884_v49 = vadd.f32 %v6296_v39, %v3848_v44  ;;  %v3846_v50 = vld [vmem:[#allocation2 + $0x60] sm:$0xff]  ;;  %v3366_v51 = vadd.f32 %v6261_v45, %v3330_v46  ;;  %v3235_v32 = vpop.f32.mrb[107].mxu1  ;;  %v3341_v45 = vld [vmem:[#allocation2 + $0xf0] sm:$0xff] }
 0x1ba   : > { %3399 = vst.msk [vmem:[#allocation2 + $0x80] sm:$0xff] %vm519_vm5, %v3363_v35  ;;  %v3882_v8 = vadd.f32 %v3846_v50, %v3739_v34  ;;  %v3849_v55 = vld [vmem:[#allocation2 + $0x78] sm:$0xff]  ;;  %v3364_v56 = vadd.f32 %v3328_v53, %v3235_v32  ;;  %v3339_v50 = vld [vmem:[#allocation2 + $0xe0] sm:$0xff] }
 0x1bb   : > { %3920 = vst.msk [vmem:[#allocation2 + $0x70] sm:$0xff] %vm519_vm5, %v3884_v49  ;;  %3402 = vst.msk [vmem:[#allocation2 + $0x98] sm:$0xff] %vm519_vm5, %v3366_v51  ;;  %v3885_v57 = vadd.f32 %v6297_v43, %v3849_v55  ;;  %v3847_v60 = vld [vmem:[#allocation2 + $0x68] sm:$0xff]  ;;  %v3342_v55 = vld [vmem:[#allocation2 + $0xf8] sm:$0xff] }
 0x1bc   : > { %3918 = vst.msk [vmem:[#allocation2 + $0x60] sm:$0xff] %vm519_vm5, %v3882_v8  ;;  %3400 = vst.msk [vmem:[#allocation2 + $0x88] sm:$0xff] %vm519_vm5, %v3364_v56  ;;  %v3883_v61 = vadd.f32 %v3847_v60, %v3742_v47 }
 0x1bd   : > { %3921 = vst.msk [vmem:[#allocation2 + $0x78] sm:$0xff] %vm519_vm5, %v3885_v57 }
 0x1be   : > { %v6300_v28 = vpop.f32.mrb[108].mxu0  ;;  %3919 = vst.msk [vmem:[#allocation2 + $0x68] sm:$0xff] %vm519_vm5, %v3883_v61  ;;  %v6264_v7 = vpop.f32.mrb[108].mxu1 }
 0x1bf   : > { %v3755_v1 = vpop.f32.mrb[109].mxu0  ;;  %v3369_v54 = vadd.f32 %v6264_v7, %v3333_v63  ;;  %v3248_v59 = vpop.f32.mrb[109].mxu1  ;;  %v3340_v7 = vld [vmem:[#allocation2 + $0xe8] sm:$0xff] }
 0x1c0   : > { %v6301_v2 = vpop.f32.mrb[110].mxu0  ;;  %v3852_v62 = vld [vmem:[#allocation2 + $0x90] sm:$0xff]  ;;  %v3367_v3 = vadd.f32 %v3331_v27, %v3248_v59  ;;  %v6265_v4 = vpop.f32.mrb[110].mxu1 }
 0x1c1   : > { %v3758_v6 = vpop.f32.mrb[111].mxu0  ;;  %3405 = vst.msk [vmem:[#allocation2 + $0xb0] sm:$0xff] %vm519_vm5, %v3369_v54  ;;  %v3888_v9 = vadd.f32 %v6300_v28, %v3852_v62  ;;  %v3850_v58 = vld [vmem:[#allocation2 + $0x80] sm:$0xff]  ;;  %v3370_v12 = vadd.f32 %v6265_v4, %v3334_v5  ;;  %v3251_v48 = vpop.f32.mrb[111].mxu1  ;;  %v3345_v4 = vld [vmem:[#allocation2 + $0x110] sm:$0xff] }
 0x1c2   : > { %3403 = vst.msk [vmem:[#allocation2 + $0xa0] sm:$0xff] %vm519_vm5, %v3367_v3  ;;  %v3886_v14 = vadd.f32 %v3850_v58, %v3755_v1  ;;  %v3853_v26 = vld [vmem:[#allocation2 + $0x98] sm:$0xff]  ;;  %v3368_v16 = vadd.f32 %v3332_v11, %v3251_v48  ;;  %v3343_v58 = vld [vmem:[#allocation2 + $0x100] sm:$0xff] }
 0x1c3   : > { %3924 = vst.msk [vmem:[#allocation2 + $0x90] sm:$0xff] %vm519_vm5, %v3888_v9  ;;  %3406 = vst.msk [vmem:[#allocation2 + $0xb8] sm:$0xff] %vm519_vm5, %v3370_v12  ;;  %v3889_v17 = vadd.f32 %v6301_v2, %v3853_v26  ;;  %v3851_v18 = vld [vmem:[#allocation2 + $0x88] sm:$0xff]  ;;  %v3346_v26 = vld [vmem:[#allocation2 + $0x118] sm:$0xff] }
 0x1c4   : > { %3922 = vst.msk [vmem:[#allocation2 + $0x80] sm:$0xff] %vm519_vm5, %v3886_v14  ;;  %3404 = vst.msk [vmem:[#allocation2 + $0xa8] sm:$0xff] %vm519_vm5, %v3368_v16  ;;  %v3887_v10 = vadd.f32 %v3851_v18, %v3758_v6 }
 0x1c5   : > { %3925 = vst.msk [vmem:[#allocation2 + $0x98] sm:$0xff] %vm519_vm5, %v3889_v17 }
 0x1c6   : > { %v6304_v20 = vpop.f32.mrb[112].mxu0  ;;  %3923 = vst.msk [vmem:[#allocation2 + $0x88] sm:$0xff] %vm519_vm5, %v3887_v10  ;;  %v6268_v21 = vpop.f32.mrb[112].mxu1 }
 0x1c7   : > { %v3771_v23 = vpop.f32.mrb[113].mxu0  ;;  %v3373_v52 = vadd.f32 %v6268_v21, %v3337_v22  ;;  %v3264_v13 = vpop.f32.mrb[113].mxu1  ;;  %v3344_v21 = vld [vmem:[#allocation2 + $0x108] sm:$0xff] }
 0x1c8   : > { %v6305_v25 = vpop.f32.mrb[114].mxu0  ;;  %v3856_v29 = vld [vmem:[#allocation2 + $0xb0] sm:$0xff]  ;;  %v3371_v30 = vadd.f32 %v3335_v24, %v3264_v13  ;;  %v6269_v31 = vpop.f32.mrb[114].mxu1 }
 0x1c9   : > { %v3774_v33 = vpop.f32.mrb[115].mxu0  ;;  %3409 = vst.msk [vmem:[#allocation2 + $0xd0] sm:$0xff] %vm519_vm5, %v3373_v52  ;;  %v3892_v36 = vadd.f32 %v6304_v20, %v3856_v29  ;;  %v3854_v37 = vld [vmem:[#allocation2 + $0xa0] sm:$0xff]  ;;  %v3374_v38 = vadd.f32 %v6269_v31, %v3338_v19  ;;  %v3267_v39 = vpop.f32.mrb[115].mxu1  ;;  %v4493_v31 = vld [vmem:[#allocation2 + $0x10] sm:$0xff] }
 0x1ca   : > { %3407 = vst.msk [vmem:[#allocation2 + $0xc0] sm:$0xff] %vm519_vm5, %v3371_v30  ;;  %v3890_v40 = vadd.f32 %v3854_v37, %v3771_v23  ;;  %v3857_v34 = vld [vmem:[#allocation2 + $0xb8] sm:$0xff]  ;;  %v3372_v41 = vadd.f32 %v3336_v0, %v3267_v39  ;;  %v4491_v37 = vld [vmem:[#allocation2] sm:$0xff] }
 0x1cb   : > { %3928 = vst.msk [vmem:[#allocation2 + $0xb0] sm:$0xff] %vm519_vm5, %v3892_v36  ;;  %3410 = vst.msk [vmem:[#allocation2 + $0xd8] sm:$0xff] %vm519_vm5, %v3374_v38  ;;  %v3893_v15 = vadd.f32 %v6305_v25, %v3857_v34  ;;  %v3855_v42 = vld [vmem:[#allocation2 + $0xa8] sm:$0xff]  ;;  %v4494_v34 = vld [vmem:[#allocation2 + $0x18] sm:$0xff] }
 0x1cc   : > { %3926 = vst.msk [vmem:[#allocation2 + $0xa0] sm:$0xff] %vm519_vm5, %v3890_v40  ;;  %3408 = vst.msk [vmem:[#allocation2 + $0xc8] sm:$0xff] %vm519_vm5, %v3372_v41  ;;  %v3891_v43 = vadd.f32 %v3855_v42, %v3774_v33 }
 0x1cd   : > { %3929 = vst.msk [vmem:[#allocation2 + $0xb8] sm:$0xff] %vm519_vm5, %v3893_v15 }
 0x1ce   : > { %v6308_v44 = vpop.f32.mrb[116].mxu0  ;;  %3927 = vst.msk [vmem:[#allocation2 + $0xa8] sm:$0xff] %vm519_vm5, %v3891_v43  ;;  %v6272_v35 = vpop.f32.mrb[116].mxu1 }
 0x1cf   : > { %v3787_v46 = vpop.f32.mrb[117].mxu0  ;;  %v3377_v47 = vadd.f32 %v6272_v35, %v3341_v45  ;;  %v3280_v49 = vpop.f32.mrb[117].mxu1  ;;  %v4492_v35 = vld [vmem:[#allocation2 + $0x8] sm:$0xff] }
 0x1d0   : > { %v6309_v51 = vpop.f32.mrb[118].mxu0  ;;  %v3860_v32 = vld [vmem:[#allocation2 + $0xd0] sm:$0xff]  ;;  %v3375_v53 = vadd.f32 %v3339_v50, %v3280_v49  ;;  %v6273_v8 = vpop.f32.mrb[118].mxu1 }
 0x1d1   : > { %v3790_v56 = vpop.f32.mrb[119].mxu0  ;;  %3413 = vst.msk [vmem:[#allocation2 + $0xf0] sm:$0xff] %vm519_vm5, %v3377_v47  ;;  %v3896_v57 = vadd.f32 %v6308_v44, %v3860_v32  ;;  %v3858_v60 = vld [vmem:[#allocation2 + $0xc0] sm:$0xff]  ;;  %v3378_v61 = vadd.f32 %v6273_v8, %v3342_v55  ;;  %v3283_v28 = vpop.f32.mrb[119].mxu1  ;;  %v4497_v8 = vld [vmem:[#allocation2 + $0x30] sm:$0xff] }
 0x1d2   : > { %3411 = vst.msk [vmem:[#allocation2 + $0xe0] sm:$0xff] %vm519_vm5, %v3375_v53  ;;  %v3894_v63 = vadd.f32 %v3858_v60, %v3787_v46  ;;  %v3861_v1 = vld [vmem:[#allocation2 + $0xd8] sm:$0xff]  ;;  %v3376_v54 = vadd.f32 %v3340_v7, %v3283_v28  ;;  %v4495_v60 = vld [vmem:[#allocation2 + $0x20] sm:$0xff] }
 0x1d3   : > { %3932 = vst.msk [vmem:[#allocation2 + $0xd0] sm:$0xff] %vm519_vm5, %v3896_v57  ;;  %3414 = vst.msk [vmem:[#allocation2 + $0xf8] sm:$0xff] %vm519_vm5, %v3378_v61  ;;  %v3897_v59 = vadd.f32 %v6309_v51, %v3861_v1  ;;  %v3859_v27 = vld [vmem:[#allocation2 + $0xc8] sm:$0xff]  ;;  %v4498_v1 = vld [vmem:[#allocation2 + $0x38] sm:$0xff] }
 0x1d4   : > { %3930 = vst.msk [vmem:[#allocation2 + $0xc0] sm:$0xff] %vm519_vm5, %v3894_v63  ;;  %3412 = vst.msk [vmem:[#allocation2 + $0xe8] sm:$0xff] %vm519_vm5, %v3376_v54  ;;  %v3895_v2 = vadd.f32 %v3859_v27, %v3790_v56 }
 0x1d5   : > { %3933 = vst.msk [vmem:[#allocation2 + $0xd8] sm:$0xff] %vm519_vm5, %v3897_v59 }
 0x1d6   : > { %v6312_v62 = vpop.f32.mrb[120].mxu0  ;;  %3931 = vst.msk [vmem:[#allocation2 + $0xc8] sm:$0xff] %vm519_vm5, %v3895_v2  ;;  %v6276_v3 = vpop.f32.mrb[120].mxu1 }
 0x1d7   : > { %v3803_v5 = vpop.f32.mrb[121].mxu0  ;;  %v3381_v6 = vadd.f32 %v6276_v3, %v3345_v4  ;;  %v3296_v9 = vpop.f32.mrb[121].mxu1  ;;  %v4496_v3 = vld [vmem:[#allocation2 + $0x28] sm:$0xff] }
 0x1d8   : > { %v6313_v12 = vpop.f32.mrb[122].mxu0  ;;  %v3864_v48 = vld [vmem:[#allocation2 + $0xf0] sm:$0xff]  ;;  %v3379_v11 = vadd.f32 %v3343_v58, %v3296_v9  ;;  %v6277_v14 = vpop.f32.mrb[122].mxu1 }
 0x1d9   : > { %v3806_v16 = vpop.f32.mrb[123].mxu0  ;;  %3417 = vst.msk [vmem:[#allocation2 + $0x110] sm:$0xff] %vm519_vm5, %v3381_v6  ;;  %v3900_v17 = vadd.f32 %v6312_v62, %v3864_v48  ;;  %v3862_v18 = vld [vmem:[#allocation2 + $0xe0] sm:$0xff]  ;;  %v3382_v10 = vadd.f32 %v6277_v14, %v3346_v26  ;;  %v3299_v20 = vpop.f32.mrb[123].mxu1  ;;  %v4501_v14 = vld [vmem:[#allocation2 + $0x50] sm:$0xff] }
 0x1da   : > { %3415 = vst.msk [vmem:[#allocation2 + $0x100] sm:$0xff] %vm519_vm5, %v3379_v11  ;;  %v3898_v22 = vadd.f32 %v3862_v18, %v3803_v5  ;;  %v3865_v23 = vld [vmem:[#allocation2 + $0xf8] sm:$0xff]  ;;  %v3380_v52 = vadd.f32 %v3344_v21, %v3299_v20  ;;  %v4499_v18 = vld [vmem:[#allocation2 + $0x40] sm:$0xff] }
 0x1db   : > { %3936 = vst.msk [vmem:[#allocation2 + $0xf0] sm:$0xff] %vm519_vm5, %v3900_v17  ;;  %3418 = vst.msk [vmem:[#allocation2 + $0x118] sm:$0xff] %vm519_vm5, %v3382_v10  ;;  %v3901_v13 = vadd.f32 %v6313_v12, %v3865_v23  ;;  %v3863_v24 = vld [vmem:[#allocation2 + $0xe8] sm:$0xff]  ;;  %v4502_v23 = vld [vmem:[#allocation2 + $0x58] sm:$0xff] }
 0x1dc   : > { %3934 = vst.msk [vmem:[#allocation2 + $0xe0] sm:$0xff] %vm519_vm5, %v3898_v22  ;;  %3416 = vst.msk [vmem:[#allocation2 + $0x108] sm:$0xff] %vm519_vm5, %v3380_v52  ;;  %v3899_v25 = vadd.f32 %v3863_v24, %v3806_v16 }
 0x1dd   : > { %3937 = vst.msk [vmem:[#allocation2 + $0xf8] sm:$0xff] %vm519_vm5, %v3901_v13 }
 0x1de   : > { %v6316_v29 = vpop.f32.mrb[124].mxu0  ;;  %3935 = vst.msk [vmem:[#allocation2 + $0xe8] sm:$0xff] %vm519_vm5, %v3899_v25  ;;  %v6324_v30 = vpop.f32.mrb[124].mxu1 }
 0x1df   : > { %v3819_v19 = vpop.f32.mrb[125].mxu0  ;;  %v4529_v33 = vadd.f32 %v6324_v30, %v4493_v31  ;;  %v4348_v36 = vpop.f32.mrb[125].mxu1  ;;  %v4500_v30 = vld [vmem:[#allocation2 + $0x48] sm:$0xff] }
 0x1e0   : > { %v6317_v38 = vpop.f32.mrb[126].mxu0  ;;  %v3868_v39 = vld [vmem:[#allocation2 + $0x110] sm:$0xff]  ;;  %v4527_v0 = vadd.f32 %v4491_v37, %v4348_v36  ;;  %v6325_v40 = vpop.f32.mrb[126].mxu1 }
 0x1e1   : > { %v3822_v41 = vpop.f32.mrb[127].mxu0  ;;  %v3904_v15 = vadd.f32 %v6316_v29, %v3868_v39  ;;  %4565 = vst.msk [vmem:[#allocation2 + $0x10] sm:$0xff] %vm519_vm5, %v4529_v33  ;;  %v3866_v42 = vld [vmem:[#allocation2 + $0x100] sm:$0xff]  ;;  %v4530_v43 = vadd.f32 %v6325_v40, %v4494_v34  ;;  %v4351_v44 = vpop.f32.mrb[127].mxu1 }
 0x1e2   : > { %v3902_v45 = vadd.f32 %v3866_v42, %v3819_v19  ;;  %4563 = vst.msk [vmem:[#allocation2] sm:$0xff] %vm519_vm5, %v4527_v0  ;;  %v3869_v46 = vld [vmem:[#allocation2 + $0x118] sm:$0xff]  ;;  %v4528_v47 = vadd.f32 %v4492_v35, %v4351_v44 }
 0x1e3   : > { %3940 = vst.msk [vmem:[#allocation2 + $0x110] sm:$0xff] %vm519_vm5, %v3904_v15  ;;  %v3905_v49 = vadd.f32 %v6317_v38, %v3869_v46  ;;  %4566 = vst.msk [vmem:[#allocation2 + $0x18] sm:$0xff] %vm519_vm5, %v4530_v43  ;;  %v3867_v50 = vld [vmem:[#allocation2 + $0x108] sm:$0xff] }
 0x1e4   : > { %3938 = vst.msk [vmem:[#allocation2 + $0x100] sm:$0xff] %vm519_vm5, %v3902_v45  ;;  %v3903_v51 = vadd.f32 %v3867_v50, %v3822_v41  ;;  %4564 = vst.msk [vmem:[#allocation2 + $0x8] sm:$0xff] %vm519_vm5, %v4528_v47  ;;  %v4505_v45 = vld [vmem:[#allocation2 + $0x70] sm:$0xff]  ;;  %v4503_v50 = vld [vmem:[#allocation2 + $0x60] sm:$0xff] }
 0x1e5   : > { %3941 = vst.msk [vmem:[#allocation2 + $0x118] sm:$0xff] %vm519_vm5, %v3905_v49 }
 0x1e6   : > { %v6364_v32 = vpop.f32.mrb[128].mxu0  ;;  %3939 = vst.msk [vmem:[#allocation2 + $0x108] sm:$0xff] %vm519_vm5, %v3903_v51  ;;  %v6328_v53 = vpop.f32.mrb[128].mxu1 }
 0x1e7   : > { %v4872_v55 = vpop.f32.mrb[129].mxu0  ;;  %v4533_v56 = vadd.f32 %v6328_v53, %v4497_v8  ;;  %v4364_v57 = vpop.f32.mrb[129].mxu1 }
 0x1e8   : > { %v6365_v61 = vpop.f32.mrb[130].mxu0  ;;  %v5017_v28 = vld [vmem:[#allocation2 + $0x10] sm:$0xff]  ;;  %v4531_v7 = vadd.f32 %v4495_v60, %v4364_v57  ;;  %v6329_v63 = vpop.f32.mrb[130].mxu1 }
 0x1e9   : > { %v4875_v54 = vpop.f32.mrb[131].mxu0  ;;  %4569 = vst.msk [vmem:[#allocation2 + $0x30] sm:$0xff] %vm519_vm5, %v4533_v56  ;;  %v5053_v59 = vadd.f32 %v6364_v32, %v5017_v28  ;;  %v5015_v27 = vld [vmem:[#allocation2] sm:$0xff]  ;;  %v4534_v2 = vadd.f32 %v6329_v63, %v4498_v1  ;;  %v4367_v62 = vpop.f32.mrb[131].mxu1 }
 0x1ea   : > { %4567 = vst.msk [vmem:[#allocation2 + $0x20] sm:$0xff] %vm519_vm5, %v4531_v7  ;;  %v5051_v4 = vadd.f32 %v5015_v27, %v4872_v55  ;;  %v5018_v5 = vld [vmem:[#allocation2 + $0x18] sm:$0xff]  ;;  %v4532_v6 = vadd.f32 %v4496_v3, %v4367_v62  ;;  %v4504_v7 = vld [vmem:[#allocation2 + $0x68] sm:$0xff] }
 0x1eb   : > { %5089 = vst.msk [vmem:[#allocation2 + $0x10] sm:$0xff] %vm519_vm5, %v5053_v59  ;;  %4570 = vst.msk [vmem:[#allocation2 + $0x38] sm:$0xff] %vm519_vm5, %v4534_v2  ;;  %v5054_v9 = vadd.f32 %v6365_v61, %v5018_v5  ;;  %v5016_v58 = vld [vmem:[#allocation2 + $0x8] sm:$0xff]  ;;  %v4506_v55 = vld [vmem:[#allocation2 + $0x78] sm:$0xff] }
 0x1ec   : > { %5087 = vst.msk [vmem:[#allocation2] sm:$0xff] %vm519_vm5, %v5051_v4  ;;  %4568 = vst.msk [vmem:[#allocation2 + $0x28] sm:$0xff] %vm519_vm5, %v4532_v6  ;;  %v5052_v12 = vadd.f32 %v5016_v58, %v4875_v54 }
 0x1ed   : > { %5090 = vst.msk [vmem:[#allocation2 + $0x18] sm:$0xff] %vm519_vm5, %v5054_v9 }
 0x1ee   : > { %v6368_v48 = vpop.f32.mrb[132].mxu0  ;;  %5088 = vst.msk [vmem:[#allocation2 + $0x8] sm:$0xff] %vm519_vm5, %v5052_v12  ;;  %v6332_v11 = vpop.f32.mrb[132].mxu1 }
 0x1ef   : > { %v4888_v26 = vpop.f32.mrb[133].mxu0  ;;  %v4537_v16 = vadd.f32 %v6332_v11, %v4501_v14  ;;  %v4380_v17 = vpop.f32.mrb[133].mxu1  ;;  %v4509_v14 = vld [vmem:[#allocation2 + $0x90] sm:$0xff] }
 0x1f0   : > { %v6369_v10 = vpop.f32.mrb[134].mxu0  ;;  %v5021_v20 = vld [vmem:[#allocation2 + $0x30] sm:$0xff]  ;;  %v4535_v21 = vadd.f32 %v4499_v18, %v4380_v17  ;;  %v6333_v22 = vpop.f32.mrb[134].mxu1  ;;  %v4507_v18 = vld [vmem:[#allocation2 + $0x80] sm:$0xff] }
 0x1f1   : > { %v4891_v52 = vpop.f32.mrb[135].mxu0  ;;  %4573 = vst.msk [vmem:[#allocation2 + $0x50] sm:$0xff] %vm519_vm5, %v4537_v16  ;;  %v5057_v13 = vadd.f32 %v6368_v48, %v5021_v20  ;;  %v5019_v24 = vld [vmem:[#allocation2 + $0x20] sm:$0xff]  ;;  %v4538_v25 = vadd.f32 %v6333_v22, %v4502_v23  ;;  %v4383_v29 = vpop.f32.mrb[135].mxu1  ;;  %v4510_v23 = vld [vmem:[#allocation2 + $0x98] sm:$0xff] }
 0x1f2   : > { %v5125_v31 = vld [vmem:[#allocation2 + $0x10] sm:$0xff]  ;;  %4571 = vst.msk [vmem:[#allocation2 + $0x40] sm:$0xff] %vm519_vm5, %v4535_v21  ;;  %v5055_v19 = vadd.f32 %v5019_v24, %v4888_v26  ;;  %v5022_v33 = vld [vmem:[#allocation2 + $0x38] sm:$0xff]  ;;  %v4536_v36 = vadd.f32 %v4500_v30, %v4383_v29  ;;  %v4508_v30 = vld [vmem:[#allocation2 + $0x88] sm:$0xff] }
 0x1f3   : > { %v5824_v37 = vpack.c.bf16 %v5125_v31, %v5125_v31  ;;  %v5123_v38 = vld [vmem:[#allocation2] sm:$0xff]  ;;  %5093 = vst.msk [vmem:[#allocation2 + $0x30] sm:$0xff] %vm519_vm5, %v5057_v13  ;;  %4574 = vst.msk [vmem:[#allocation2 + $0x58] sm:$0xff] %vm519_vm5, %v4538_v25  ;;  %v5058_v39 = vadd.f32 %v6369_v10, %v5022_v33  ;;  %v5020_v0 = vld [vmem:[#allocation2 + $0x28] sm:$0xff] }
 0x1f4   : > { %v5822_v40 = vpack.c.bf16 %v5123_v38, %v5123_v38  ;;  %v5126_v34 = vld [vmem:[#allocation2 + $0x18] sm:$0xff]  ;;  %5091 = vst.msk [vmem:[#allocation2 + $0x20] sm:$0xff] %vm519_vm5, %v5055_v19  ;;  %4572 = vst.msk [vmem:[#allocation2 + $0x48] sm:$0xff] %vm519_vm5, %v4536_v36  ;;  %v5056_v41 = vadd.f32 %v5020_v0, %v4891_v52 }
 0x1f5   : > { %5306 = vst.msk [vmem:[%s7578_s27 + $0x8] sm:$0xf] %vm5303_vm8, %v5824_v37  ;;  %v5825_v15 = vpack.c.bf16 %v5126_v34, %v5126_v34  ;;  %v5124_v42 = vld [vmem:[#allocation2 + $0x8] sm:$0xff] }
 0x1f6   : > { %5094 = vst.msk [vmem:[#allocation2 + $0x38] sm:$0xff] %vm519_vm5, %v5058_v39  ;;  %v6372_v43 = vpop.f32.mrb[136].mxu0  ;;  %v5823_v44 = vpack.c.bf16 %v5124_v42, %v5124_v42  ;;  %5092 = vst.msk [vmem:[#allocation2 + $0x28] sm:$0xff] %vm519_vm5, %v5056_v41  ;;  %v6336_v35 = vpop.f32.mrb[136].mxu1 }
 0x1f7   : > { %5304 = vst.msk [vmem:[%s7578_s27] sm:$0xf] %vm5303_vm8, %v5822_v40  ;;  %v4904_v46 = vpop.f32.mrb[137].mxu0  ;;  %5307 = vst.msk [vmem:[%s7578_s27 + $0xc] sm:$0xf] %vm5303_vm8, %v5825_v15  ;;  %v4541_v47 = vadd.f32 %v6336_v35, %v4505_v45  ;;  %v4396_v49 = vpop.f32.mrb[137].mxu1 }
 0x1f8   : > { %v6373_v51 = vpop.f32.mrb[138].mxu0  ;;  %5305 = vst.msk [vmem:[%s7578_s27 + $0x4] sm:$0xf] %vm5303_vm8, %v5823_v44  ;;  %v5025_v32 = vld [vmem:[#allocation2 + $0x50] sm:$0xff]  ;;  %v4539_v53 = vadd.f32 %v4503_v50, %v4396_v49  ;;  %v6337_v8 = vpop.f32.mrb[138].mxu1  ;;  %v4511_v50 = vld [vmem:[#allocation2 + $0xa0] sm:$0xff] }
 0x1f9   : > { %v4907_v56 = vpop.f32.mrb[139].mxu0  ;;  %4577 = vst.msk [vmem:[#allocation2 + $0x70] sm:$0xff] %vm519_vm5, %v4541_v47  ;;  %v5061_v57 = vadd.f32 %v6372_v43, %v5025_v32  ;;  %v5023_v60 = vld [vmem:[#allocation2 + $0x40] sm:$0xff]  ;;  %v4542_v61 = vadd.f32 %v6337_v8, %v4506_v55  ;;  %v4399_v28 = vpop.f32.mrb[139].mxu1  ;;  %v4513_v45 = vld [vmem:[#allocation2 + $0xb0] sm:$0xff]  ;;  %v4514_v55 = vld [vmem:[#allocation2 + $0xb8] sm:$0xff] }
 0x1fa   : > { %v5129_v63 = vld [vmem:[#allocation2 + $0x30] sm:$0xff]  ;;  %4575 = vst.msk [vmem:[#allocation2 + $0x60] sm:$0xff] %vm519_vm5, %v4539_v53  ;;  %v5059_v1 = vadd.f32 %v5023_v60, %v4904_v46  ;;  %v5026_v54 = vld [vmem:[#allocation2 + $0x58] sm:$0xff]  ;;  %v4540_v59 = vadd.f32 %v4504_v7, %v4399_v28  ;;  %v4512_v7 = vld [vmem:[#allocation2 + $0xa8] sm:$0xff] }
 0x1fb   : > { %v5828_v27 = vpack.c.bf16 %v5129_v63, %v5129_v63  ;;  %v5127_v2 = vld [vmem:[#allocation2 + $0x20] sm:$0xff]  ;;  %5097 = vst.msk [vmem:[#allocation2 + $0x50] sm:$0xff] %vm519_vm5, %v5061_v57  ;;  %4578 = vst.msk [vmem:[#allocation2 + $0x78] sm:$0xff] %vm519_vm5, %v4542_v61  ;;  %v5062_v62 = vadd.f32 %v6373_v51, %v5026_v54  ;;  %v5024_v3 = vld [vmem:[#allocation2 + $0x48] sm:$0xff] }
 0x1fc   : > { %v5826_v4 = vpack.c.bf16 %v5127_v2, %v5127_v2  ;;  %5095 = vst.msk [vmem:[#allocation2 + $0x40] sm:$0xff] %vm519_vm5, %v5059_v1  ;;  %4576 = vst.msk [vmem:[#allocation2 + $0x68] sm:$0xff] %vm519_vm5, %v4540_v59  ;;  %v5060_v6 = vadd.f32 %v5024_v3, %v4907_v56 }
 0x1fd   : > { %v5130_v5 = vld [vmem:[#allocation2 + $0x38] sm:$0xff]  ;;  %5310 = vst.msk [vmem:[%s7578_s27 + $0x18] sm:$0xf] %vm5303_vm8, %v5828_v27  ;;  %v5128_v58 = vld [vmem:[#allocation2 + $0x28] sm:$0xff] }
 0x1fe   : > { %v5829_v9 = vpack.c.bf16 %v5130_v5, %v5130_v5  ;;  %5098 = vst.msk [vmem:[#allocation2 + $0x58] sm:$0xff] %vm519_vm5, %v5062_v62  ;;  %v6376_v12 = vpop.f32.mrb[140].mxu0  ;;  %v5827_v48 = vpack.c.bf16 %v5128_v58, %v5128_v58  ;;  %5096 = vst.msk [vmem:[#allocation2 + $0x48] sm:$0xff] %vm519_vm5, %v5060_v6  ;;  %v6340_v11 = vpop.f32.mrb[140].mxu1 }
 0x1ff   : > { %5308 = vst.msk [vmem:[%s7578_s27 + $0x10] sm:$0xf] %vm5303_vm8, %v5826_v4  ;;  %v4920_v26 = vpop.f32.mrb[141].mxu0  ;;  %v4545_v16 = vadd.f32 %v6340_v11, %v4509_v14  ;;  %v4412_v17 = vpop.f32.mrb[141].mxu1  ;;  %v4517_v14 = vld [vmem:[#allocation2 + $0xd0] sm:$0xff] }
 0x200   : > { %5311 = vst.msk [vmem:[%s7578_s27 + $0x1c] sm:$0xf] %vm5303_vm8, %v5829_v9  ;;  %v6377_v10 = vpop.f32.mrb[142].mxu0  ;;  %5309 = vst.msk [vmem:[%s7578_s27 + $0x14] sm:$0xf] %vm5303_vm8, %v5827_v48  ;;  %v5029_v20 = vld [vmem:[#allocation2 + $0x70] sm:$0xff]  ;;  %v4543_v21 = vadd.f32 %v4507_v18, %v4412_v17 }
 0x201   : > { %v6341_v22 = vpop.f32.mrb[142].mxu1  ;;  %v4923_v52 = vpop.f32.mrb[143].mxu0  ;;  %4581 = vst.msk [vmem:[#allocation2 + $0x90] sm:$0xff] %vm519_vm5, %v4545_v16  ;;  %v5065_v13 = vadd.f32 %v6376_v12, %v5029_v20  ;;  %v5027_v24 = vld [vmem:[#allocation2 + $0x60] sm:$0xff] }
 0x202   : > { %v4546_v25 = vadd.f32 %v6341_v22, %v4510_v23  ;;  %v4415_v29 = vpop.f32.mrb[143].mxu1  ;;  %v5133_v31 = vld [vmem:[#allocation2 + $0x50] sm:$0xff]  ;;  %4579 = vst.msk [vmem:[#allocation2 + $0x80] sm:$0xff] %vm519_vm5, %v4543_v21  ;;  %v5063_v19 = vadd.f32 %v5027_v24, %v4920_v26  ;;  %v5030_v33 = vld [vmem:[#allocation2 + $0x78] sm:$0xff]  ;;  %v4515_v18 = vld [vmem:[#allocation2 + $0xc0] sm:$0xff] }
 0x203   : > { %v4544_v36 = vadd.f32 %v4508_v30, %v4415_v29  ;;  %v5832_v37 = vpack.c.bf16 %v5133_v31, %v5133_v31  ;;  %v5131_v38 = vld [vmem:[#allocation2 + $0x40] sm:$0xff]  ;;  %5101 = vst.msk [vmem:[#allocation2 + $0x70] sm:$0xff] %vm519_vm5, %v5065_v13  ;;  %v5066_v39 = vadd.f32 %v6377_v10, %v5030_v33  ;;  %v5028_v0 = vld [vmem:[#allocation2 + $0x68] sm:$0xff]  ;;  %v4518_v23 = vld [vmem:[#allocation2 + $0xd8] sm:$0xff] }
 0x204   : > { %4582 = vst.msk [vmem:[#allocation2 + $0x98] sm:$0xff] %vm519_vm5, %v4546_v25  ;;  %v5830_v40 = vpack.c.bf16 %v5131_v38, %v5131_v38  ;;  %5099 = vst.msk [vmem:[#allocation2 + $0x60] sm:$0xff] %vm519_vm5, %v5063_v19  ;;  %v5064_v41 = vadd.f32 %v5028_v0, %v4923_v52  ;;  %v4516_v30 = vld [vmem:[#allocation2 + $0xc8] sm:$0xff] }
 0x205   : > { %v5134_v34 = vld [vmem:[#allocation2 + $0x58] sm:$0xff]  ;;  %4580 = vst.msk [vmem:[#allocation2 + $0x88] sm:$0xff] %vm519_vm5, %v4544_v36  ;;  %v5132_v42 = vld [vmem:[#allocation2 + $0x48] sm:$0xff]  ;;  %5102 = vst.msk [vmem:[#allocation2 + $0x78] sm:$0xff] %vm519_vm5, %v5066_v39 }
 0x206   : > { %5314 = vst.msk [vmem:[%s7578_s27 + $0x28] sm:$0xf] %vm5303_vm8, %v5832_v37  ;;  %v5833_v15 = vpack.c.bf16 %v5134_v34, %v5134_v34  ;;  %v6380_v43 = vpop.f32.mrb[144].mxu0  ;;  %5312 = vst.msk [vmem:[%s7578_s27 + $0x20] sm:$0xf] %vm5303_vm8, %v5830_v40  ;;  %v5831_v44 = vpack.c.bf16 %v5132_v42, %v5132_v42  ;;  %v6344_v35 = vpop.f32.mrb[144].mxu1 }
 0x207   : > { %5100 = vst.msk [vmem:[#allocation2 + $0x68] sm:$0xff] %vm519_vm5, %v5064_v41  ;;  %v4936_v46 = vpop.f32.mrb[145].mxu0  ;;  %v4549_v47 = vadd.f32 %v6344_v35, %v4513_v45  ;;  %v4428_v49 = vpop.f32.mrb[145].mxu1  ;;  %v4521_v45 = vld [vmem:[#allocation2 + $0xf0] sm:$0xff] }
 0x208   : > { %5315 = vst.msk [vmem:[%s7578_s27 + $0x2c] sm:$0xf] %vm5303_vm8, %v5833_v15  ;;  %v6381_v51 = vpop.f32.mrb[146].mxu0  ;;  %5313 = vst.msk [vmem:[%s7578_s27 + $0x24] sm:$0xf] %vm5303_vm8, %v5831_v44  ;;  %v5033_v32 = vld [vmem:[#allocation2 + $0x90] sm:$0xff]  ;;  %v4547_v53 = vadd.f32 %v4511_v50, %v4428_v49 }
 0x209   : > { %v6345_v8 = vpop.f32.mrb[146].mxu1  ;;  %v4939_v56 = vpop.f32.mrb[147].mxu0  ;;  %4585 = vst.msk [vmem:[#allocation2 + $0xb0] sm:$0xff] %vm519_vm5, %v4549_v47  ;;  %v5069_v57 = vadd.f32 %v6380_v43, %v5033_v32  ;;  %v5031_v60 = vld [vmem:[#allocation2 + $0x80] sm:$0xff] }
 0x20a   : > { %v4550_v61 = vadd.f32 %v6345_v8, %v4514_v55  ;;  %v4431_v28 = vpop.f32.mrb[147].mxu1  ;;  %v5137_v63 = vld [vmem:[#allocation2 + $0x70] sm:$0xff]  ;;  %4583 = vst.msk [vmem:[#allocation2 + $0xa0] sm:$0xff] %vm519_vm5, %v4547_v53  ;;  %v5067_v1 = vadd.f32 %v5031_v60, %v4936_v46  ;;  %v4519_v50 = vld [vmem:[#allocation2 + $0xe0] sm:$0xff]  ;;  %v4522_v55 = vld [vmem:[#allocation2 + $0xf8] sm:$0xff] }
 0x20b   : > { %v5034_v54 = vld [vmem:[#allocation2 + $0x98] sm:$0xff]  ;;  %v4548_v59 = vadd.f32 %v4512_v7, %v4431_v28  ;;  %v5836_v27 = vpack.c.bf16 %v5137_v63, %v5137_v63  ;;  %v5135_v2 = vld [vmem:[#allocation2 + $0x60] sm:$0xff]  ;;  %5105 = vst.msk [vmem:[#allocation2 + $0x90] sm:$0xff] %vm519_vm5, %v5069_v57  ;;  %v4520_v7 = vld [vmem:[#allocation2 + $0xe8] sm:$0xff] }
 0x20c   : > { %4586 = vst.msk [vmem:[#allocation2 + $0xb8] sm:$0xff] %vm519_vm5, %v4550_v61  ;;  %v5070_v62 = vadd.f32 %v6381_v51, %v5034_v54  ;;  %v5032_v3 = vld [vmem:[#allocation2 + $0x88] sm:$0xff]  ;;  %v5834_v4 = vpack.c.bf16 %v5135_v2, %v5135_v2  ;;  %v5138_v5 = vld [vmem:[#allocation2 + $0x78] sm:$0xff]  ;;  %5103 = vst.msk [vmem:[#allocation2 + $0x80] sm:$0xff] %vm519_vm5, %v5067_v1 }
 0x20d   : > { %4584 = vst.msk [vmem:[#allocation2 + $0xa8] sm:$0xff] %vm519_vm5, %v4548_v59  ;;  %v5068_v6 = vadd.f32 %v5032_v3, %v4939_v56  ;;  %v5837_v9 = vpack.c.bf16 %v5138_v5, %v5138_v5 }
 0x20e   : > { %5318 = vst.msk [vmem:[%s7578_s27 + $0x38] sm:$0xf] %vm5303_vm8, %v5836_v27  ;;  %v5136_v58 = vld [vmem:[#allocation2 + $0x68] sm:$0xff]  ;;  %v6384_v12 = vpop.f32.mrb[148].mxu0  ;;  %5316 = vst.msk [vmem:[%s7578_s27 + $0x30] sm:$0xf] %vm5303_vm8, %v5834_v4 }
 0x20f   : > { %5106 = vst.msk [vmem:[#allocation2 + $0x98] sm:$0xff] %vm519_vm5, %v5070_v62  ;;  %v5835_v48 = vpack.c.bf16 %v5136_v58, %v5136_v58  ;;  %5104 = vst.msk [vmem:[#allocation2 + $0x88] sm:$0xff] %vm519_vm5, %v5068_v6  ;;  %v6348_v11 = vpop.f32.mrb[148].mxu1  ;;  %v4952_v26 = vpop.f32.mrb[149].mxu0 }
 0x210   : > { %5319 = vst.msk [vmem:[%s7578_s27 + $0x3c] sm:$0xf] %vm5303_vm8, %v5837_v9  ;;  %v4553_v16 = vadd.f32 %v6348_v11, %v4517_v14  ;;  %v4444_v17 = vpop.f32.mrb[149].mxu1  ;;  %v6385_v10 = vpop.f32.mrb[150].mxu0  ;;  %v5037_v20 = vld [vmem:[#allocation2 + $0xb0] sm:$0xff] }
 0x211   : > { %5317 = vst.msk [vmem:[%s7578_s27 + $0x34] sm:$0xf] %vm5303_vm8, %v5835_v48  ;;  %v4551_v21 = vadd.f32 %v4515_v18, %v4444_v17  ;;  %v6349_v22 = vpop.f32.mrb[150].mxu1  ;;  %v4955_v52 = vpop.f32.mrb[151].mxu0  ;;  %v5073_v13 = vadd.f32 %v6384_v12, %v5037_v20  ;;  %v5035_v24 = vld [vmem:[#allocation2 + $0xa0] sm:$0xff]  ;;  %v4525_v14 = vld [vmem:[#allocation2 + $0x110] sm:$0xff] }
 0x212   : > { %4589 = vst.msk [vmem:[#allocation2 + $0xd0] sm:$0xff] %vm519_vm5, %v4553_v16  ;;  %v4554_v25 = vadd.f32 %v6349_v22, %v4518_v23  ;;  %v4447_v29 = vpop.f32.mrb[151].mxu1  ;;  %v5141_v31 = vld [vmem:[#allocation2 + $0x90] sm:$0xff]  ;;  %v5071_v19 = vadd.f32 %v5035_v24, %v4952_v26  ;;  %v4523_v18 = vld [vmem:[#allocation2 + $0x100] sm:$0xff]  ;;  %v4526_v23 = vld [vmem:[#allocation2 + $0x118] sm:$0xff] }
 0x213   : > { %4587 = vst.msk [vmem:[#allocation2 + $0xc0] sm:$0xff] %vm519_vm5, %v4551_v21  ;;  %v5038_v33 = vld [vmem:[#allocation2 + $0xb8] sm:$0xff]  ;;  %v4552_v36 = vadd.f32 %v4516_v30, %v4447_v29  ;;  %v5840_v37 = vpack.c.bf16 %v5141_v31, %v5141_v31  ;;  %v5139_v38 = vld [vmem:[#allocation2 + $0x80] sm:$0xff]  ;;  %5109 = vst.msk [vmem:[#allocation2 + $0xb0] sm:$0xff] %vm519_vm5, %v5073_v13 }
 0x214   : > { %4590 = vst.msk [vmem:[#allocation2 + $0xd8] sm:$0xff] %vm519_vm5, %v4554_v25  ;;  %v5074_v39 = vadd.f32 %v6385_v10, %v5038_v33  ;;  %v5036_v0 = vld [vmem:[#allocation2 + $0xa8] sm:$0xff]  ;;  %v5838_v40 = vpack.c.bf16 %v5139_v38, %v5139_v38  ;;  %5107 = vst.msk [vmem:[#allocation2 + $0xa0] sm:$0xff] %vm519_vm5, %v5071_v19 }
 0x215   : > { %4588 = vst.msk [vmem:[#allocation2 + $0xc8] sm:$0xff] %vm519_vm5, %v4552_v36  ;;  %v5072_v41 = vadd.f32 %v5036_v0, %v4955_v52  ;;  %v4524_v30 = vld [vmem:[#allocation2 + $0x108] sm:$0xff] }
 0x216   : > { %v5142_v34 = vld [vmem:[#allocation2 + $0x98] sm:$0xff]  ;;  %5322 = vst.msk [vmem:[%s7578_s27 + $0x48] sm:$0xf] %vm5303_vm8, %v5840_v37  ;;  %v5140_v42 = vld [vmem:[#allocation2 + $0x88] sm:$0xff]  ;;  %v6388_v43 = vpop.f32.mrb[152].mxu0  ;;  %v6352_v35 = vpop.f32.mrb[152].mxu1 }
 0x217   : > { %v5841_v15 = vpack.c.bf16 %v5142_v34, %v5142_v34  ;;  %5110 = vst.msk [vmem:[#allocation2 + $0xb8] sm:$0xff] %vm519_vm5, %v5074_v39  ;;  %v5839_v44 = vpack.c.bf16 %v5140_v42, %v5140_v42  ;;  %5108 = vst.msk [vmem:[#allocation2 + $0xa8] sm:$0xff] %vm519_vm5, %v5072_v41  ;;  %v4968_v46 = vpop.f32.mrb[153].mxu0  ;;  %v4557_v47 = vadd.f32 %v6352_v35, %v4521_v45  ;;  %v4460_v49 = vpop.f32.mrb[153].mxu1 }
 0x218   : > { %5320 = vst.msk [vmem:[%s7578_s27 + $0x40] sm:$0xf] %vm5303_vm8, %v5838_v40  ;;  %v6389_v51 = vpop.f32.mrb[154].mxu0  ;;  %v4555_v53 = vadd.f32 %v4519_v50, %v4460_v49  ;;  %v6353_v8 = vpop.f32.mrb[154].mxu1 }
 0x219   : > { %5323 = vst.msk [vmem:[%s7578_s27 + $0x4c] sm:$0xf] %vm5303_vm8, %v5841_v15  ;;  %5321 = vst.msk [vmem:[%s7578_s27 + $0x44] sm:$0xf] %vm5303_vm8, %v5839_v44  ;;  %v5041_v32 = vld [vmem:[#allocation2 + $0xd0] sm:$0xff]  ;;  %v4971_v56 = vpop.f32.mrb[155].mxu0  ;;  %v4558_v61 = vadd.f32 %v6353_v8, %v4522_v55 }
 0x21a   : > { %4593 = vst.msk [vmem:[#allocation2 + $0xf0] sm:$0xff] %vm519_vm5, %v4557_v47  ;;  %v5077_v57 = vadd.f32 %v6388_v43, %v5041_v32  ;;  %v5039_v60 = vld [vmem:[#allocation2 + $0xc0] sm:$0xff]  ;;  %v4463_v28 = vpop.f32.mrb[155].mxu1  ;;  %v5145_v63 = vld [vmem:[#allocation2 + $0xb0] sm:$0xff]  ;;  %4591 = vst.msk [vmem:[#allocation2 + $0xe0] sm:$0xff] %vm519_vm5, %v4555_v53 }
 0x21b   : > { %v5075_v1 = vadd.f32 %v5039_v60, %v4968_v46  ;;  %v5042_v54 = vld [vmem:[#allocation2 + $0xd8] sm:$0xff]  ;;  %v4556_v59 = vadd.f32 %v4520_v7, %v4463_v28  ;;  %v5844_v27 = vpack.c.bf16 %v5145_v63, %v5145_v63  ;;  %v5143_v2 = vld [vmem:[#allocation2 + $0xa0] sm:$0xff]  ;;  %4594 = vst.msk [vmem:[#allocation2 + $0xf8] sm:$0xff] %vm519_vm5, %v4558_v61 }
 0x21c   : > { %5113 = vst.msk [vmem:[#allocation2 + $0xd0] sm:$0xff] %vm519_vm5, %v5077_v57  ;;  %v5078_v62 = vadd.f32 %v6389_v51, %v5042_v54  ;;  %v5040_v3 = vld [vmem:[#allocation2 + $0xc8] sm:$0xff]  ;;  %v5842_v4 = vpack.c.bf16 %v5143_v2, %v5143_v2 }
 0x21d   : > { %5111 = vst.msk [vmem:[#allocation2 + $0xc0] sm:$0xff] %vm519_vm5, %v5075_v1  ;;  %4592 = vst.msk [vmem:[#allocation2 + $0xe8] sm:$0xff] %vm519_vm5, %v4556_v59  ;;  %v5076_v6 = vadd.f32 %v5040_v3, %v4971_v56 }
 0x21e   : > { %v5146_v5 = vld [vmem:[#allocation2 + $0xb8] sm:$0xff]  ;;  %5326 = vst.msk [vmem:[%s7578_s27 + $0x58] sm:$0xf] %vm5303_vm8, %v5844_v27  ;;  %v5144_v58 = vld [vmem:[#allocation2 + $0xa8] sm:$0xff]  ;;  %v6392_v12 = vpop.f32.mrb[156].mxu0  ;;  %v6356_v11 = vpop.f32.mrb[156].mxu1 }
 0x21f   : > { %v5845_v9 = vpack.c.bf16 %v5146_v5, %v5146_v5  ;;  %5114 = vst.msk [vmem:[#allocation2 + $0xd8] sm:$0xff] %vm519_vm5, %v5078_v62  ;;  %v5843_v48 = vpack.c.bf16 %v5144_v58, %v5144_v58  ;;  %5112 = vst.msk [vmem:[#allocation2 + $0xc8] sm:$0xff] %vm519_vm5, %v5076_v6  ;;  %v4984_v26 = vpop.f32.mrb[157].mxu0  ;;  %v4561_v16 = vadd.f32 %v6356_v11, %v4525_v14  ;;  %v4476_v17 = vpop.f32.mrb[157].mxu1 }
 0x220   : > { %5324 = vst.msk [vmem:[%s7578_s27 + $0x50] sm:$0xf] %vm5303_vm8, %v5842_v4  ;;  %v6393_v10 = vpop.f32.mrb[158].mxu0  ;;  %v4559_v21 = vadd.f32 %v4523_v18, %v4476_v17  ;;  %v6357_v22 = vpop.f32.mrb[158].mxu1 }
 0x221   : > { %5327 = vst.msk [vmem:[%s7578_s27 + $0x5c] sm:$0xf] %vm5303_vm8, %v5845_v9  ;;  %5325 = vst.msk [vmem:[%s7578_s27 + $0x54] sm:$0xf] %vm5303_vm8, %v5843_v48  ;;  %v5045_v20 = vld [vmem:[#allocation2 + $0xf0] sm:$0xff]  ;;  %v4987_v52 = vpop.f32.mrb[159].mxu0  ;;  %v4562_v25 = vadd.f32 %v6357_v22, %v4526_v23 }
 0x222   : > { %4597 = vst.msk [vmem:[#allocation2 + $0x110] sm:$0xff] %vm519_vm5, %v4561_v16  ;;  %v5081_v13 = vadd.f32 %v6392_v12, %v5045_v20  ;;  %v5043_v24 = vld [vmem:[#allocation2 + $0xe0] sm:$0xff]  ;;  %v4479_v29 = vpop.f32.mrb[159].mxu1  ;;  %4595 = vst.msk [vmem:[#allocation2 + $0x100] sm:$0xff] %vm519_vm5, %v4559_v21  ;;  %v5046_v33 = vld [vmem:[#allocation2 + $0xf8] sm:$0xff] }
 0x223   : > { %v5149_v31 = vld [vmem:[#allocation2 + $0xd0] sm:$0xff]  ;;  %v5079_v19 = vadd.f32 %v5043_v24, %v4984_v26  ;;  %v4560_v36 = vadd.f32 %v4524_v30, %v4479_v29  ;;  %4598 = vst.msk [vmem:[#allocation2 + $0x118] sm:$0xff] %vm519_vm5, %v4562_v25  ;;  %v5082_v39 = vadd.f32 %v6393_v10, %v5046_v33 }
 0x224   : > { %v5848_v37 = vpack.c.bf16 %v5149_v31, %v5149_v31  ;;  %v5147_v38 = vld [vmem:[#allocation2 + $0xc0] sm:$0xff]  ;;  %5117 = vst.msk [vmem:[#allocation2 + $0xf0] sm:$0xff] %vm519_vm5, %v5081_v13  ;;  %v5044_v0 = vld [vmem:[#allocation2 + $0xe8] sm:$0xff] }
 0x225   : > { %v5846_v40 = vpack.c.bf16 %v5147_v38, %v5147_v38  ;;  %5115 = vst.msk [vmem:[#allocation2 + $0xe0] sm:$0xff] %vm519_vm5, %v5079_v19  ;;  %4596 = vst.msk [vmem:[#allocation2 + $0x108] sm:$0xff] %vm519_vm5, %v4560_v36  ;;  %v5080_v41 = vadd.f32 %v5044_v0, %v4987_v52 }
 0x226   : > { %v5150_v34 = vld [vmem:[#allocation2 + $0xd8] sm:$0xff]  ;;  %5330 = vst.msk [vmem:[%s7578_s27 + $0x68] sm:$0xf] %vm5303_vm8, %v5848_v37  ;;  %v5148_v42 = vld [vmem:[#allocation2 + $0xc8] sm:$0xff]  ;;  %v6396_v43 = vpop.f32.mrb[160].mxu0 }
 0x227   : > { %v5849_v15 = vpack.c.bf16 %v5150_v34, %v5150_v34  ;;  %5118 = vst.msk [vmem:[#allocation2 + $0xf8] sm:$0xff] %vm519_vm5, %v5082_v39  ;;  %v5847_v44 = vpack.c.bf16 %v5148_v42, %v5148_v42  ;;  %5116 = vst.msk [vmem:[#allocation2 + $0xe8] sm:$0xff] %vm519_vm5, %v5080_v41  ;;  %v5000_v35 = vpop.f32.mrb[161].mxu0 }
 0x228   : > { %5328 = vst.msk [vmem:[%s7578_s27 + $0x60] sm:$0xf] %vm5303_vm8, %v5846_v40  ;;  %v6397_v45 = vpop.f32.mrb[162].mxu0 }
 0x229   : > { %5331 = vst.msk [vmem:[%s7578_s27 + $0x6c] sm:$0xf] %vm5303_vm8, %v5849_v15  ;;  %5329 = vst.msk [vmem:[%s7578_s27 + $0x64] sm:$0xf] %vm5303_vm8, %v5847_v44  ;;  %v5049_v46 = vld [vmem:[#allocation2 + $0x110] sm:$0xff]  ;;  %v5003_v47 = vpop.f32.mrb[163].mxu0 }
 0x22a   : > { %v5085_v49 = vadd.f32 %v6396_v43, %v5049_v46  ;;  %v5047_v50 = vld [vmem:[#allocation2 + $0x100] sm:$0xff]  ;;  %v5050_v53 = vld [vmem:[#allocation2 + $0x118] sm:$0xff] }
 0x22b   : > { %v5153_v51 = vld [vmem:[#allocation2 + $0xf0] sm:$0xff]  ;;  %v5083_v32 = vadd.f32 %v5047_v50, %v5000_v35  ;;  %v5086_v56 = vadd.f32 %v6397_v45, %v5050_v53 }
 0x22c   : > { %v5852_v8 = vpack.c.bf16 %v5153_v51, %v5153_v51  ;;  %v5151_v55 = vld [vmem:[#allocation2 + $0xe0] sm:$0xff]  ;;  %5121 = vst.msk [vmem:[#allocation2 + $0x110] sm:$0xff] %vm519_vm5, %v5085_v49  ;;  %v5048_v57 = vld [vmem:[#allocation2 + $0x108] sm:$0xff] }
 0x22d   : > { %v5850_v60 = vpack.c.bf16 %v5151_v55, %v5151_v55  ;;  %5119 = vst.msk [vmem:[#allocation2 + $0x100] sm:$0xff] %vm519_vm5, %v5083_v32  ;;  %v5084_v28 = vadd.f32 %v5048_v57, %v5003_v47  ;;  %5122 = vst.msk [vmem:[#allocation2 + $0x118] sm:$0xff] %vm519_vm5, %v5086_v56 }
 0x22e   : > { %v5154_v61 = vld [vmem:[#allocation2 + $0xf8] sm:$0xff]  ;;  %5334 = vst.msk [vmem:[%s7578_s27 + $0x78] sm:$0xf] %vm5303_vm8, %v5852_v8  ;;  %v5152_v63 = vld [vmem:[#allocation2 + $0xe8] sm:$0xff] }
 0x22f   : > { %v5853_v7 = vpack.c.bf16 %v5154_v61, %v5154_v61  ;;  %5332 = vst.msk [vmem:[%s7578_s27 + $0x70] sm:$0xf] %vm5303_vm8, %v5850_v60  ;;  %v5851_v1 = vpack.c.bf16 %v5152_v63, %v5152_v63 }
 0x230   : > { %5120 = vst.msk [vmem:[#allocation2 + $0x108] sm:$0xff] %vm519_vm5, %v5084_v28 }
 0x231   : > { %5335 = vst.msk [vmem:[%s7578_s27 + $0x7c] sm:$0xf] %vm5303_vm8, %v5853_v7  ;;  %5333 = vst.msk [vmem:[%s7578_s27 + $0x74] sm:$0xf] %vm5303_vm8, %v5851_v1 }
 0x233   : > { %v5157_v54 = vld [vmem:[#allocation2 + $0x110] sm:$0xff] }
 0x234   : > { %v5856_v59 = vpack.c.bf16 %v5157_v54, %v5157_v54  ;;  %v5155_v27 = vld [vmem:[#allocation2 + $0x100] sm:$0xff]  ;;  %v5158_v62 = vld [vmem:[#allocation2 + $0x118] sm:$0xff] }
 0x235   : > { %v5854_v2 = vpack.c.bf16 %v5155_v27, %v5155_v27  ;;  %v5857_v3 = vpack.c.bf16 %v5158_v62, %v5158_v62 }
 0x236   : > { %5338 = vst.msk [vmem:[%s7578_s27 + $0x88] sm:$0xf] %vm5303_vm8, %v5856_v59 }
 0x237   : > { %v5156_v4 = vld [vmem:[#allocation2 + $0x108] sm:$0xff]  ;;  %5336 = vst.msk [vmem:[%s7578_s27 + $0x80] sm:$0xf] %vm5303_vm8, %v5854_v2  ;;  %5339 = vst.msk [vmem:[%s7578_s27 + $0x8c] sm:$0xf] %vm5303_vm8, %v5857_v3 }
 0x238   : > { %v5855_v5 = vpack.c.bf16 %v5156_v4, %v5156_v4 }
 0x23a   : > { %5337 = vst.msk [vmem:[%s7578_s27 + $0x84] sm:$0xf] %vm5303_vm8, %v5855_v5 }
 0x23b PF: > { %s12_s9 = sadd.s32 1, %s6606_s9  }
 0x23c   : > { %p9_p4 = scmp.ge.s32.totalorder %s12_s9, 4  }
 0x23e   :  { %11 = sbr.rel (!%p9_p4) target bundleno = 1 (0x1), region = 66 }

</bundles_post_ra>
